<compile_context>
chip_gen: v7x
topology: tpu7x:2x2x1
jax: 0.10.0
libtpu: 0.0.40
codegen_flags: <defaults>
</compile_context>

<pallas_src>
import functools

import jax
import jax.numpy as jnp
from jax.experimental import pallas as pl
from jax.experimental.pallas import tpu as pltpu


def _norm(x, eps=1e-5):
    """LayerNorm without affine (gamma/beta folded into the next Linear); one-pass variance."""
    mu = jnp.mean(x, axis=-1, keepdims=True)
    ms = jnp.mean(x * x, axis=-1, keepdims=True)
    var = ms - mu * mu
    return (x - mu) * jax.lax.rsqrt(var + eps)


def policy_kernel(split, obs_ref,
                  w0_ref, b0_ref,
                  w1a_ref, w1b_ref, b1_ref,
                  w2_ref, b2_ref,
                  wh_ref, bh_ref,
                  out_ref):
    f32, bf16 = jnp.float32, jnp.bfloat16

    # Stage 0: fused network/flow processors (block-diagonal weight) -> [TB, 512].
    h0 = jnp.dot(obs_ref[...].astype(bf16), w0_ref[...], preferred_element_type=f32)
    h0 = jnp.maximum(h0 + b0_ref[...], 0.0)
    net = _norm(h0[:, :split])            # LayerNorm over the network-processor half
    flw = _norm(h0[:, split:])            # LayerNorm over the flow-processor half

    # combined_processor Linear(512, 512): split-K matmul replaces torch.cat(..., dim=1).
    s1 = (jnp.dot(net.astype(bf16), w1a_ref[...], preferred_element_type=f32)
          + jnp.dot(flw.astype(bf16), w1b_ref[...], preferred_element_type=f32)
          + b1_ref[...])
    s1 = _norm(jnp.maximum(s1, 0.0))

    # combined_processor Linear(512, 256).
    s2 = jnp.dot(s1.astype(bf16), w2_ref[...], preferred_element_type=f32) + b2_ref[...]
    s2 = _norm(jnp.maximum(s2, 0.0))

    # Fused flow-routing heads (output lane-padded to a multiple of 128).
    out_ref[...] = (jnp.dot(s2.astype(bf16), wh_ref[...], preferred_element_type=f32)
                    + bh_ref[...])


def prepare_params(raw_params):
    """Fold / fuse the module's parameters into the kernel layout.

    raw_params (all f32, Linear weights as [in, out], biases / LN params as [1, dim]):
      (wn, bn, gn, hn,  wf, bf, gf, hf,  w1, b1, g1, h1,  w2, b2, g2, h2,  wh, bh)
    """
    (wn, bn, gn, hn, wf, bf, gf, hf,
     w1, b1, g1, h1, w2, b2, g2, h2, wh, bh) = raw_params
    nsd, dn = wn.shape            # network_state_dim, 256
    fid, df = wf.shape            # flow_info_dim,     256
    obs_dim = nsd + fid

    # Stage 0: block-diagonal fusion of the two processors -> one [obs_dim, 512] weight.
    w0 = jnp.zeros((obs_dim, dn + df), jnp.float32)
    w0 = w0.at[:nsd, :dn].set(wn).at[nsd:, dn:].set(wf)
    b0 = jnp.concatenate([bn, bf], axis=-1)

    # Fold the processors' LN gamma/beta into w1 and split w1 along its rows
    # (no concat needed in the kernel):  (n*g + h) @ w1a == n @ (g*w1a) + h @ w1a.
    w1a = w1[:dn] * gn.reshape(dn, 1)
    w1b = w1[dn:] * gf.reshape(df, 1)
    b1f = b1 + hn @ w1[:dn] + hf @ w1[dn:]

    # Fold LN1 gamma/beta into w2.
    w2f = w2 * g1.reshape(-1, 1)
    b2f = b2 + h1 @ w2

    # Fold LN2 gamma/beta into the fused routing heads; pad lanes to a 128 multiple.
    whf = wh * g2.reshape(-1, 1)
    bhf = bh + h2 @ wh
    act = wh.shape[1]
    act_pad = pl.cdiv(act, 128) * 128
    wh_pad = jnp.zeros((wh.shape[0], act_pad), jnp.float32).at[:, :act].set(whf)
    bh_pad = jnp.zeros((1, act_pad), jnp.float32).at[:, :act].set(bhf)

    cast = lambda a: a.astype(jnp.bfloat16)     # bf16 weights: halve weight HBM->VMEM bytes
    return (cast(w0), b0, cast(w1a), cast(w1b), b1f, cast(w2f), b2f, cast(wh_pad), bh_pad)


def network_policy_forward(observations, kernel_params, *, action_dim, block_b=128):
    B, obs_dim = observations.shape
    split = kernel_params[2].shape[0]            # rows of w1a == width of the "net" half (256)
    act_pad = kernel_params[-1].shape[-1]        # lane-padded output width

    TB = min(block_b, pl.cdiv(B, 8) * 8)         # batch tile (multiple of 8 sublanes)
    Bp = pl.cdiv(B, TB) * TB
    obs = observations if Bp == B else jnp.pad(observations, ((0, Bp - B), (0, 0)))

    weight_specs = [pl.BlockSpec(p.shape, lambda i: (0, 0)) for p in kernel_params]
    out = pl.pallas_call(
        functools.partial(policy_kernel, split),
        out_shape=jax.ShapeDtypeStruct((Bp, act_pad), jnp.float32),
        grid_spec=pltpu.PrefetchScalarGridSpec(
            num_scalar_prefetch=0,
            grid=(Bp // TB,),
            in_specs=[pl.BlockSpec((TB, obs_dim), lambda i: (i, 0))] + weight_specs,
            out_specs=pl.BlockSpec((TB, act_pad), lambda i: (i, 0)),
        ),
        compiler_params=pltpu.CompilerParams(dimension_semantics=("parallel",)),
    )(obs, *kernel_params)
    return out[:B, :action_dim]


# ----------------------------- reference & test harness -----------------------------

def _init_linear(key, fan_in, fan_out):
    # deterministic synthetic init (stand-in for orthogonal_ gain=sqrt(2), bias=0)
    w = jax.random.normal(key, (fan_in, fan_out), jnp.float32) * jnp.sqrt(2.0 / fan_in)
    b = jnp.zeros((1, fan_out), jnp.float32)
    return w, b


def _ln_params(dim):
    # nn.LayerNorm default affine init: weight=1, bias=0
    return jnp.ones((1, dim), jnp.float32), jnp.zeros((1, dim), jnp.float32)


def _reference_forward(obs, raw_params, *, max_flows, num_paths):
    """PyTorch-faithful structure (slice / two processors / concat / stacked heads).
    Matmul inputs are cast to bf16 (f32 accumulation) to mirror the kernel's MXU numerics."""
    (wn, bn, gn, hn, wf, bf, gf, hf,
     w1, b1, g1, h1, w2, b2, g2, h2, wh, bh) = raw_params
    nsd = obs.shape[1] - max_flows * 6
    ns, fi = obs[:, :nsd], obs[:, nsd:]

    def mm(a, w):
        return jnp.dot(a.astype(jnp.bfloat16), w.astype(jnp.bfloat16),
                       preferred_element_type=jnp.float32)

    def ln(x, g, b, eps=1e-5):
        mu = jnp.mean(x, axis=-1, keepdims=True)
        var = jnp.mean(jnp.square(x - mu), axis=-1, keepdims=True)
        return (x - mu) * jax.lax.rsqrt(var + eps) * g + b

    def blk(x, w, b, g, beta):                 # Linear -> ReLU -> LayerNorm (Dropout = id)
        return ln(jnp.maximum(mm(x, w) + b, 0.0), g, beta)

    net = blk(ns, wn, bn, gn, hn)
    flw = blk(fi, wf, bf, gf, hf)
    c = jnp.concatenate([net, flw], axis=-1)
    s1 = blk(c, w1, b1, g1, h1)
    s2 = blk(s1, w2, b2, g2, h2)
    return mm(s2, wh) + bh                     # fused head == torch.stack(heads).view(B, -1)


if __name__ == "__main__":
    B = 256                                    # batched rollout observations per call
    max_flows = 4
    num_paths = 5
    network_state_dim = 40
    flow_info_dim = max_flows * 6              # 24
    obs_dim = network_state_dim + flow_info_dim
    action_dim = max_flows * num_paths         # 20

    key = jax.random.PRNGKey(0)
    k_obs, k_net, k_flow, k_c1, k_c2, k_heads = jax.random.split(key, 6)

    observations = jax.random.normal(k_obs, (B, obs_dim), jnp.float32)

    wn, bn = _init_linear(k_net, network_state_dim, 256)   # network_processor
    gn, hn = _ln_params(256)
    wf, bf = _init_linear(k_flow, flow_info_dim, 256)      # flow_processor
    gf, hf = _ln_params(256)
    w1, b1 = _init_linear(k_c1, 512, 512)                  # combined_processor layer 1
    g1, h1 = _ln_params(512)
    w2, b2 = _init_linear(k_c2, 512, 256)                  # combined_processor layer 2
    g2, h2 = _ln_params(256)
    wh, bh = _init_linear(k_heads, 256, action_dim)        # fused flow_routing_heads

    raw_params = (wn, bn, gn, hn, wf, bf, gf, hf,
                  w1, b1, g1, h1, w2, b2, g2, h2, wh, bh)
    kernel_params = prepare_params(raw_params)

    out = network_policy_forward(observations, kernel_params,
                                 action_dim=action_dim, block_b=128)
    out = jax.block_until_ready(out)

    ref = _reference_forward(observations, raw_params,
                             max_flows=max_flows, num_paths=num_paths)
    assert out.shape == (B, action_dim)
    max_err = float(jnp.max(jnp.abs(out - ref)))
    assert jnp.allclose(out, ref, atol=2e-2, rtol=2e-2), \
        f"mismatch vs JAX reference (max abs err {max_err})"

    print("KERNEL_OK")
</pallas_src>

<mosaic_0001>
module attributes {stable_mosaic.version = 11 : i64} {
  func.func @policy_kernel(%arg0: i32, %arg1: memref<128x64xf32, #tpu.memory_space<vmem>>, %arg2: memref<64x512xbf16, #tpu.memory_space<vmem>>, %arg3: memref<1x512xf32, #tpu.memory_space<vmem>>, %arg4: memref<256x512xbf16, #tpu.memory_space<vmem>>, %arg5: memref<256x512xbf16, #tpu.memory_space<vmem>>, %arg6: memref<1x512xf32, #tpu.memory_space<vmem>>, %arg7: memref<512x256xbf16, #tpu.memory_space<vmem>>, %arg8: memref<1x256xf32, #tpu.memory_space<vmem>>, %arg9: memref<256x128xbf16, #tpu.memory_space<vmem>>, %arg10: memref<1x128xf32, #tpu.memory_space<vmem>>, %arg11: memref<128x128xf32, #tpu.memory_space<vmem>>) attributes {dimension_semantics = [#tpu.dimension_semantics<parallel>], iteration_bounds = array<i64: 2>, scalar_prefetch = 0 : i64, scratch_operands = 0 : i64, tpu.core_type = #tpu.core_type<tc>, window_params = [{transform_indices = @transform_0, window_bounds = array<i64: 128, 64>}, {pipeline_mode = #tpu.pipeline_mode<synchronous>, transform_indices = @transform_1, window_bounds = array<i64: 64, 512>}, {pipeline_mode = #tpu.pipeline_mode<synchronous>, transform_indices = @transform_2, window_bounds = array<i64: 1, 512>}, {pipeline_mode = #tpu.pipeline_mode<synchronous>, transform_indices = @transform_3, window_bounds = array<i64: 256, 512>}, {pipeline_mode = #tpu.pipeline_mode<synchronous>, transform_indices = @transform_4, window_bounds = array<i64: 256, 512>}, {pipeline_mode = #tpu.pipeline_mode<synchronous>, transform_indices = @transform_5, window_bounds = array<i64: 1, 512>}, {pipeline_mode = #tpu.pipeline_mode<synchronous>, transform_indices = @transform_6, window_bounds = array<i64: 512, 256>}, {pipeline_mode = #tpu.pipeline_mode<synchronous>, transform_indices = @transform_7, window_bounds = array<i64: 1, 256>}, {pipeline_mode = #tpu.pipeline_mode<synchronous>, transform_indices = @transform_8, window_bounds = array<i64: 256, 128>}, {pipeline_mode = #tpu.pipeline_mode<synchronous>, transform_indices = @transform_9, window_bounds = array<i64: 1, 128>}, {transform_indices = @transform_10, window_bounds = array<i64: 128, 128>}]} {
    %c0 = arith.constant 0 : index
    %c0_0 = arith.constant 0 : index
    %0 = vector.load %arg1[%c0, %c0_0] : memref<128x64xf32, #tpu.memory_space<vmem>>, vector<128x64xf32>
    %1 = arith.truncf %0 : vector<128x64xf32> to vector<128x64xbf16>
    %c0_1 = arith.constant 0 : index
    %c0_2 = arith.constant 0 : index
    %2 = vector.load %arg2[%c0_1, %c0_2] : memref<64x512xbf16, #tpu.memory_space<vmem>>, vector<64x512xbf16>
    %cst = arith.constant dense<0.000000e+00> : vector<128x512xf32>
    %3 = tpu.matmul %1, %2, %cst {dimension_numbers = #tpu.dot_dimension_numbers<[1], [0], [0], [1], [0, 0, 1, 1], [], []>} : vector<128x64xbf16>, vector<64x512xbf16>, vector<128x512xf32> -> vector<128x512xf32>
    %c0_3 = arith.constant 0 : index
    %c0_4 = arith.constant 0 : index
    %4 = vector.load %arg3[%c0_3, %c0_4] : memref<1x512xf32, #tpu.memory_space<vmem>>, vector<1x512xf32>
    %5 = vector.broadcast %4 : vector<1x512xf32> to vector<128x512xf32>
    %6 = arith.addf %3, %5 : vector<128x512xf32>
    %cst_5 = arith.constant 0.000000e+00 : f32
    %7 = vector.broadcast %cst_5 : f32 to vector<128x512xf32>
    %8 = arith.maximumf %6, %7 : vector<128x512xf32>
    %9 = vector.extract_strided_slice %8 {offsets = [0, 0], sizes = [128, 256], strides = [1, 1]} : vector<128x512xf32> to vector<128x256xf32>
    %cst_6 = arith.constant dense<0.000000e+00> : vector<128xf32>
    %10 = vector.multi_reduction <add>, %9, %cst_6 [1] : vector<128x256xf32> to vector<128xf32>
    %11 = vector.shape_cast %10 : vector<128xf32> to vector<128x1xf32>
    %cst_7 = arith.constant 2.560000e+02 : f32
    %12 = vector.broadcast %cst_7 : f32 to vector<128x1xf32>
    %13 = arith.divf %11, %12 : vector<128x1xf32>
    %14 = arith.mulf %9, %9 : vector<128x256xf32>
    %cst_8 = arith.constant dense<0.000000e+00> : vector<128xf32>
    %15 = vector.multi_reduction <add>, %14, %cst_8 [1] : vector<128x256xf32> to vector<128xf32>
    %16 = vector.shape_cast %15 : vector<128xf32> to vector<128x1xf32>
    %cst_9 = arith.constant 2.560000e+02 : f32
    %17 = vector.broadcast %cst_9 : f32 to vector<128x1xf32>
    %18 = arith.divf %16, %17 : vector<128x1xf32>
    %19 = arith.mulf %13, %13 : vector<128x1xf32>
    %20 = arith.subf %18, %19 : vector<128x1xf32>
    %21 = vector.broadcast %13 : vector<128x1xf32> to vector<128x256xf32>
    %22 = arith.subf %9, %21 : vector<128x256xf32>
    %cst_10 = arith.constant 9.99999974E-6 : f32
    %23 = vector.broadcast %cst_10 : f32 to vector<128x1xf32>
    %24 = arith.addf %20, %23 : vector<128x1xf32>
    %25 = math.rsqrt %24 : vector<128x1xf32>
    %26 = vector.broadcast %25 : vector<128x1xf32> to vector<128x256xf32>
    %27 = arith.mulf %22, %26 : vector<128x256xf32>
    %28 = vector.extract_strided_slice %8 {offsets = [0, 256], sizes = [128, 256], strides = [1, 1]} : vector<128x512xf32> to vector<128x256xf32>
    %cst_11 = arith.constant dense<0.000000e+00> : vector<128xf32>
    %29 = vector.multi_reduction <add>, %28, %cst_11 [1] : vector<128x256xf32> to vector<128xf32>
    %30 = vector.shape_cast %29 : vector<128xf32> to vector<128x1xf32>
    %cst_12 = arith.constant 2.560000e+02 : f32
    %31 = vector.broadcast %cst_12 : f32 to vector<128x1xf32>
    %32 = arith.divf %30, %31 : vector<128x1xf32>
    %33 = arith.mulf %28, %28 : vector<128x256xf32>
    %cst_13 = arith.constant dense<0.000000e+00> : vector<128xf32>
    %34 = vector.multi_reduction <add>, %33, %cst_13 [1] : vector<128x256xf32> to vector<128xf32>
    %35 = vector.shape_cast %34 : vector<128xf32> to vector<128x1xf32>
    %cst_14 = arith.constant 2.560000e+02 : f32
    %36 = vector.broadcast %cst_14 : f32 to vector<128x1xf32>
    %37 = arith.divf %35, %36 : vector<128x1xf32>
    %38 = arith.mulf %32, %32 : vector<128x1xf32>
    %39 = arith.subf %37, %38 : vector<128x1xf32>
    %40 = vector.broadcast %32 : vector<128x1xf32> to vector<128x256xf32>
    %41 = arith.subf %28, %40 : vector<128x256xf32>
    %cst_15 = arith.constant 9.99999974E-6 : f32
    %42 = vector.broadcast %cst_15 : f32 to vector<128x1xf32>
    %43 = arith.addf %39, %42 : vector<128x1xf32>
    %44 = math.rsqrt %43 : vector<128x1xf32>
    %45 = vector.broadcast %44 : vector<128x1xf32> to vector<128x256xf32>
    %46 = arith.mulf %41, %45 : vector<128x256xf32>
    %47 = arith.truncf %27 : vector<128x256xf32> to vector<128x256xbf16>
    %c0_16 = arith.constant 0 : index
    %c0_17 = arith.constant 0 : index
    %48 = vector.load %arg4[%c0_16, %c0_17] : memref<256x512xbf16, #tpu.memory_space<vmem>>, vector<256x512xbf16>
    %cst_18 = arith.constant dense<0.000000e+00> : vector<128x512xf32>
    %49 = tpu.matmul %47, %48, %cst_18 {dimension_numbers = #tpu.dot_dimension_numbers<[1], [0], [0], [1], [0, 0, 1, 1], [], []>} : vector<128x256xbf16>, vector<256x512xbf16>, vector<128x512xf32> -> vector<128x512xf32>
    %50 = arith.truncf %46 : vector<128x256xf32> to vector<128x256xbf16>
    %c0_19 = arith.constant 0 : index
    %c0_20 = arith.constant 0 : index
    %51 = vector.load %arg5[%c0_19, %c0_20] : memref<256x512xbf16, #tpu.memory_space<vmem>>, vector<256x512xbf16>
    %cst_21 = arith.constant dense<0.000000e+00> : vector<128x512xf32>
    %52 = tpu.matmul %50, %51, %cst_21 {dimension_numbers = #tpu.dot_dimension_numbers<[1], [0], [0], [1], [0, 0, 1, 1], [], []>} : vector<128x256xbf16>, vector<256x512xbf16>, vector<128x512xf32> -> vector<128x512xf32>
    %53 = arith.addf %49, %52 : vector<128x512xf32>
    %c0_22 = arith.constant 0 : index
    %c0_23 = arith.constant 0 : index
    %54 = vector.load %arg6[%c0_22, %c0_23] : memref<1x512xf32, #tpu.memory_space<vmem>>, vector<1x512xf32>
    %55 = vector.broadcast %54 : vector<1x512xf32> to vector<128x512xf32>
    %56 = arith.addf %53, %55 : vector<128x512xf32>
    %cst_24 = arith.constant 0.000000e+00 : f32
    %57 = vector.broadcast %cst_24 : f32 to vector<128x512xf32>
    %58 = arith.maximumf %56, %57 : vector<128x512xf32>
    %cst_25 = arith.constant dense<0.000000e+00> : vector<128xf32>
    %59 = vector.multi_reduction <add>, %58, %cst_25 [1] : vector<128x512xf32> to vector<128xf32>
    %60 = vector.shape_cast %59 : vector<128xf32> to vector<128x1xf32>
    %cst_26 = arith.constant 5.120000e+02 : f32
    %61 = vector.broadcast %cst_26 : f32 to vector<128x1xf32>
    %62 = arith.divf %60, %61 : vector<128x1xf32>
    %63 = arith.mulf %58, %58 : vector<128x512xf32>
    %cst_27 = arith.constant dense<0.000000e+00> : vector<128xf32>
    %64 = vector.multi_reduction <add>, %63, %cst_27 [1] : vector<128x512xf32> to vector<128xf32>
    %65 = vector.shape_cast %64 : vector<128xf32> to vector<128x1xf32>
    %cst_28 = arith.constant 5.120000e+02 : f32
    %66 = vector.broadcast %cst_28 : f32 to vector<128x1xf32>
    %67 = arith.divf %65, %66 : vector<128x1xf32>
    %68 = arith.mulf %62, %62 : vector<128x1xf32>
    %69 = arith.subf %67, %68 : vector<128x1xf32>
    %70 = vector.broadcast %62 : vector<128x1xf32> to vector<128x512xf32>
    %71 = arith.subf %58, %70 : vector<128x512xf32>
    %cst_29 = arith.constant 9.99999974E-6 : f32
    %72 = vector.broadcast %cst_29 : f32 to vector<128x1xf32>
    %73 = arith.addf %69, %72 : vector<128x1xf32>
    %74 = math.rsqrt %73 : vector<128x1xf32>
    %75 = vector.broadcast %74 : vector<128x1xf32> to vector<128x512xf32>
    %76 = arith.mulf %71, %75 : vector<128x512xf32>
    %77 = arith.truncf %76 : vector<128x512xf32> to vector<128x512xbf16>
    %c0_30 = arith.constant 0 : index
    %c0_31 = arith.constant 0 : index
    %78 = vector.load %arg7[%c0_30, %c0_31] : memref<512x256xbf16, #tpu.memory_space<vmem>>, vector<512x256xbf16>
    %cst_32 = arith.constant dense<0.000000e+00> : vector<128x256xf32>
    %79 = tpu.matmul %77, %78, %cst_32 {dimension_numbers = #tpu.dot_dimension_numbers<[1], [0], [0], [1], [0, 0, 1, 1], [], []>} : vector<128x512xbf16>, vector<512x256xbf16>, vector<128x256xf32> -> vector<128x256xf32>
    %c0_33 = arith.constant 0 : index
    %c0_34 = arith.constant 0 : index
    %80 = vector.load %arg8[%c0_33, %c0_34] : memref<1x256xf32, #tpu.memory_space<vmem>>, vector<1x256xf32>
    %81 = vector.broadcast %80 : vector<1x256xf32> to vector<128x256xf32>
    %82 = arith.addf %79, %81 : vector<128x256xf32>
    %cst_35 = arith.constant 0.000000e+00 : f32
    %83 = vector.broadcast %cst_35 : f32 to vector<128x256xf32>
    %84 = arith.maximumf %82, %83 : vector<128x256xf32>
    %cst_36 = arith.constant dense<0.000000e+00> : vector<128xf32>
    %85 = vector.multi_reduction <add>, %84, %cst_36 [1] : vector<128x256xf32> to vector<128xf32>
    %86 = vector.shape_cast %85 : vector<128xf32> to vector<128x1xf32>
    %cst_37 = arith.constant 2.560000e+02 : f32
    %87 = vector.broadcast %cst_37 : f32 to vector<128x1xf32>
    %88 = arith.divf %86, %87 : vector<128x1xf32>
    %89 = arith.mulf %84, %84 : vector<128x256xf32>
    %cst_38 = arith.constant dense<0.000000e+00> : vector<128xf32>
    %90 = vector.multi_reduction <add>, %89, %cst_38 [1] : vector<128x256xf32> to vector<128xf32>
    %91 = vector.shape_cast %90 : vector<128xf32> to vector<128x1xf32>
    %cst_39 = arith.constant 2.560000e+02 : f32
    %92 = vector.broadcast %cst_39 : f32 to vector<128x1xf32>
    %93 = arith.divf %91, %92 : vector<128x1xf32>
    %94 = arith.mulf %88, %88 : vector<128x1xf32>
    %95 = arith.subf %93, %94 : vector<128x1xf32>
    %96 = vector.broadcast %88 : vector<128x1xf32> to vector<128x256xf32>
    %97 = arith.subf %84, %96 : vector<128x256xf32>
    %cst_40 = arith.constant 9.99999974E-6 : f32
    %98 = vector.broadcast %cst_40 : f32 to vector<128x1xf32>
    %99 = arith.addf %95, %98 : vector<128x1xf32>
    %100 = math.rsqrt %99 : vector<128x1xf32>
    %101 = vector.broadcast %100 : vector<128x1xf32> to vector<128x256xf32>
    %102 = arith.mulf %97, %101 : vector<128x256xf32>
    %103 = arith.truncf %102 : vector<128x256xf32> to vector<128x256xbf16>
    %c0_41 = arith.constant 0 : index
    %c0_42 = arith.constant 0 : index
    %104 = vector.load %arg9[%c0_41, %c0_42] : memref<256x128xbf16, #tpu.memory_space<vmem>>, vector<256x128xbf16>
    %cst_43 = arith.constant dense<0.000000e+00> : vector<128x128xf32>
    %105 = tpu.matmul %103, %104, %cst_43 {dimension_numbers = #tpu.dot_dimension_numbers<[1], [0], [0], [1], [0, 0, 1, 1], [], []>} : vector<128x256xbf16>, vector<256x128xbf16>, vector<128x128xf32> -> vector<128x128xf32>
    %c0_44 = arith.constant 0 : index
    %c0_45 = arith.constant 0 : index
    %106 = vector.load %arg10[%c0_44, %c0_45] : memref<1x128xf32, #tpu.memory_space<vmem>>, vector<1x128xf32>
    %107 = vector.broadcast %106 : vector<1x128xf32> to vector<128x128xf32>
    %108 = arith.addf %105, %107 : vector<128x128xf32>
    %c0_46 = arith.constant 0 : index
    %c0_47 = arith.constant 0 : index
    %109 = vector.load %arg11[%c0_46, %c0_47] : memref<128x128xf32, #tpu.memory_space<vmem>>, vector<128x128xf32>
    tpu.vector_store %arg11[%c0_46, %c0_47], %108 {strides = array<i32>} : memref<128x128xf32, #tpu.memory_space<vmem>>, vector<128x128xf32>,
    return
  }
  func.func @transform_0(%arg0: i32) -> (i32, i32) {
    %c0_i32 = arith.constant 0 : i32
    %c0_i32_0 = arith.constant 0 : i32
    return %arg0, %c0_i32 : i32, i32
  }
  func.func @transform_1(%arg0: i32) -> (i32, i32) {
    %c0_i32 = arith.constant 0 : i32
    %c0_i32_0 = arith.constant 0 : i32
    %c0_i32_1 = arith.constant 0 : i32
    return %c0_i32, %c0_i32_0 : i32, i32
  }
  func.func @transform_2(%arg0: i32) -> (i32, i32) {
    %c0_i32 = arith.constant 0 : i32
    %c0_i32_0 = arith.constant 0 : i32
    %c0_i32_1 = arith.constant 0 : i32
    return %c0_i32, %c0_i32_0 : i32, i32
  }
  func.func @transform_3(%arg0: i32) -> (i32, i32) {
    %c0_i32 = arith.constant 0 : i32
    %c0_i32_0 = arith.constant 0 : i32
    %c0_i32_1 = arith.constant 0 : i32
    return %c0_i32, %c0_i32_0 : i32, i32
  }
  func.func @transform_4(%arg0: i32) -> (i32, i32) {
    %c0_i32 = arith.constant 0 : i32
    %c0_i32_0 = arith.constant 0 : i32
    %c0_i32_1 = arith.constant 0 : i32
    return %c0_i32, %c0_i32_0 : i32, i32
  }
  func.func @transform_5(%arg0: i32) -> (i32, i32) {
    %c0_i32 = arith.constant 0 : i32
    %c0_i32_0 = arith.constant 0 : i32
    %c0_i32_1 = arith.constant 0 : i32
    return %c0_i32, %c0_i32_0 : i32, i32
  }
  func.func @transform_6(%arg0: i32) -> (i32, i32) {
    %c0_i32 = arith.constant 0 : i32
    %c0_i32_0 = arith.constant 0 : i32
    %c0_i32_1 = arith.constant 0 : i32
    return %c0_i32, %c0_i32_0 : i32, i32
  }
  func.func @transform_7(%arg0: i32) -> (i32, i32) {
    %c0_i32 = arith.constant 0 : i32
    %c0_i32_0 = arith.constant 0 : i32
    %c0_i32_1 = arith.constant 0 : i32
    return %c0_i32, %c0_i32_0 : i32, i32
  }
  func.func @transform_8(%arg0: i32) -> (i32, i32) {
    %c0_i32 = arith.constant 0 : i32
    %c0_i32_0 = arith.constant 0 : i32
    %c0_i32_1 = arith.constant 0 : i32
    return %c0_i32, %c0_i32_0 : i32, i32
  }
  func.func @transform_9(%arg0: i32) -> (i32, i32) {
    %c0_i32 = arith.constant 0 : i32
    %c0_i32_0 = arith.constant 0 : i32
    %c0_i32_1 = arith.constant 0 : i32
    return %c0_i32, %c0_i32_0 : i32, i32
  }
  func.func @transform_10(%arg0: i32) -> (i32, i32) {
    %c0_i32 = arith.constant 0 : i32
    %c0_i32_0 = arith.constant 0 : i32
    return %arg0, %c0_i32 : i32, i32
  }
}

</mosaic_0001>

<bundles_post_ra>
// kernel: tpu_custom_call.1
= control target key start
LH: loop header
LB: loop body
LE: loop exit
PB: predicated region body
PF: predicated region fallthrough
CT: control target
= control target key end

     0   :  { %15 = vsyncpa [#allocation3], 0  ;;  %s8160_s0 = inlined_call_operand.vmem [shape: f32[256,64], index: 0, kind: input, shape index: {}]   ;;  %s8161_s1 = inlined_call_operand.vmem [shape: bf16[64,512], index: 1, kind: input, shape index: {}]   ;;  %s8162_s2 = inlined_call_operand.vmem [shape: f32[1,512], index: 2, kind: input, shape index: {}]   ;;  %s8163_s3 = inlined_call_operand.hbm [shape: bf16[256,512], index: 3, kind: input, shape index: {}]   ;;  %s8164_s4 = inlined_call_operand.hbm [shape: bf16[256,512], index: 4, kind: input, shape index: {}]   ;;  %s8165_s5 = inlined_call_operand.vmem [shape: f32[1,512], index: 5, kind: input, shape index: {}]   ;;  %s8166_s6 = inlined_call_operand.hbm [shape: bf16[512,256], index: 6, kind: input, shape index: {}]   ;;  %s8167_s7 = inlined_call_operand.vmem [shape: f32[1,256], index: 7, kind: input, shape index: {}]   ;;  %s8168_s8 = inlined_call_operand.vmem [shape: bf16[256,128], index: 8, kind: input, shape index: {}]   ;;  %s8169_s9 = inlined_call_operand.vmem [shape: f32[1,128], index: 9, kind: input, shape index: {}]   ;;  %s8170_s10 = inlined_call_operand.hbm [shape: f32[256,128], index: 10, kind: output, shape index: {}]  }
   0x1   :  { %16 = vsyncpa [#allocation6], 0 }
   0x2   :  { %17 = vsyncpa [#allocation4], 0 }
   0x3   :  { %19 = vsyncpa [#allocation4 + $0x1], 0  ;;  %s5876_s13 = smov 0   ;;  %s5878_s14 = smov 0  }
   0x4   :  { %s5880_s15 = smov 0   ;;  %s5882_s16 = smov 0  }
   0x5 LB: > { %8272 = sst [smem:[#allocation12_spill]] %s5796_s13  ;;  %s5897_s17 = sadd.s32 4294967295, %s5808_s16   ;;  %s5808_s16 = sphi %s5882_s16, %s8479_s16   ;;  %s5804_s15 = sphi %s5880_s15, %s8484_s15   ;;  %s5800_s14 = sphi %s5878_s14, %s8483_s14   ;;  %s5796_s13 = sphi %s5876_s13, %s8482_s13  }
   0x6   : > { %8273 = sst [smem:[#allocation13_spill]] %s5804_s15  ;;  %s4636_s18 = sadd.s32 4294967294, %s5808_s16  }
   0x7   : > { %8274 = sst [smem:[#allocation14_spill]] %s5808_s16  ;;  %s5901_s19 = sadd.s32 1, %s5808_s16  }
   0x8   : > { %8275 = sst [smem:[#allocation15_spill]] %s5901_s19  ;;  %s247_s20 = sadd.s32 1, %s5804_s15 }
   0x9   : > { %s244_s21 = ssub.s32 %s5808_s16, %s5901_s19  ;;  %p257_p0 = scmp.ne.s32.totalorder %s5804_s15, %s5800_s14 }
   0xa   : > { %p245_p1 = scmp.eq.s32.totalorder %s244_s21, 0  ;;  %p258_p2 = scmp.eq.s32.totalorder %s5897_s17, 1 }
   0xb   : > { %p263_p3 = scmp.ne.s32.totalorder %s5800_s14, %s5796_s13  ;;  %p264_p4 = scmp.eq.s32.totalorder %s4636_s18, 1 }
   0xc   : > { %s5912_s22 = scalar_select %p245_p1, %s5804_s15, %s247_s20  }
   0xd   : > { %p5914_p5 = por %p258_p2, %p257_p0  ;;  %p5918_p6 = por %p264_p4, %p263_p3 }
   0xe   : > { %8276 = sst [smem:[#allocation16_spill]] %s5912_s22  ;;  %p4637_p7 = scmp.ge.s32.totalorder %s5808_s16, 1 }
   0xf   : > { %s8277_s23 = scalar_select %p5914_p5, 1, 0 }
  0x10   : > { %s8278_s24 = scalar_select %p5918_p6, 1, 0 }
  0x11   : > { %p271_p8 = scmp.lt.s32.totalorder %s5808_s16, 3  ;;  %p8172_p9 = scmp.eq.s32.totalorder %s5897_s17, 0 }
  0x12   : > { %8279 = sst [smem:[#allocation17_spill]] %s8278_s24  ;;  %s5810_s26 = smov [#allocation5]  }
  0x13   : > { %p5925_p10 = pnand %p4637_p7, %p271_p8  ;;  %s302_s27 = sshll.u32 %s5810_s26, 4  ;;  %s5931_s27 = int_to_ptr.vmem [resolvable:$true] %s302_s27 }
  0x14   : > { %s5811_s29 = smov [#allocation2]   ;;  %s5812_s11 = smov [#allocation7]  }
  0x15   : > { %s8280_s25 = scalar_select %p5925_p10, 1, 0 }
  0x16   : > { %p5134_p11 = pneg %p5925_p10  ;;  %s289_s30 = sshll.u32 %s5811_s29, 4  ;;  %s5939_s30 = int_to_ptr.vmem [resolvable:$true] %s289_s30 }
  0x17   : > { %s5941_s12 = sshll.u32 %s5812_s11, 4  ;;  %s5654_s21 = scalar_lea.hbm %s8164_s4, 8192  ;;  %s319_s12 = int_to_ptr.vmem [resolvable:$true] %s5941_s12 }
  0x18   : > { %p5935_p12 = pnand %p8172_p9, %p5134_p11  ;;  %p5655_p13 = scmp.ne.s32.totalorder %s8164_s4, %s5654_s21 }
  0x19   : > { %p5661_p3 = scmp.lt.u32.totalorder %s5654_s21, %s8164_s4 }
  0x1a   : > { %p5951_p0 = pneg %p5935_p12 }
  0x1c   : > { %p5657_p1 = pnand %p5951_p0, %p5655_p13 }
  0x1e   : > { %p5658_p2 = pneg %p5657_p1 }
  0x20   : > { %p5663_p4 = pnand %p5661_p3, %p5658_p2 }
  0x22   : > { %5666 = shalt.err (!%p5663_p4)
}
  0x23   : > { %s5667_s22 = scalar_lea.vmem %s5931_s27, 8192  ;;  %p5675_p9 = scmp.lt.s32.totalorder %s5931_s27, %s5931_s27 }
  0x24   : > { %p5668_p7 = scmp.ne.s32.totalorder %s5931_s27, %s5667_s22  ;;  %p5676_p6 = scmp.lt.s32.totalorder %s5667_s22, %s5667_s22 }
  0x26   : > { %p5670_p8 = pnand %p5668_p7, %p5951_p0  ;;  %p5677_p13 = por %p5676_p6, %p5675_p9 }
  0x28   : > { %p5671_p11 = pneg %p5670_p8 }
  0x2a   : > { %p5678_p1 = pnand %p5677_p13, %p5671_p11 }
  0x2c   : > { %5681 = shalt.err (!%p5678_p1)
}
  0x2d   : > { %s5813_s18 = smov 256   ;;  %s5814_s20 = smov 16  }
  0x2e   : > { %5140 = dma.hbm_to_vmem [thread:$0]  (!%p5935_p12), %s8164_s4, 8192, %s5931_s27, [#allocation6], %s5813_s18, %s5813_s18, %s5814_s20  }
  0x2f   : > { %s5682_s19 = scalar_lea.hbm %s8163_s3, 8192 }
  0x30   : > { %p5683_p6 = scmp.ne.s32.totalorder %s8163_s3, %s5682_s19  ;;  %p5689_p3 = scmp.lt.u32.totalorder %s5682_s19, %s8163_s3 }
  0x32   : > { %p5685_p9 = pnand %p5683_p6, %p5951_p0 }
  0x34   : > { %p5686_p2 = pneg %p5685_p9 }
  0x36   : > { %p5691_p4 = pnand %p5689_p3, %p5686_p2 }
  0x38   : > { %5694 = shalt.err (!%p5691_p4)
}
  0x39   : > { %s5695_s27 = scalar_lea.vmem %s5939_s30, 8192  ;;  %p5703_p13 = scmp.lt.s32.totalorder %s5939_s30, %s5939_s30 }
  0x3a   : > { %p5696_p7 = scmp.ne.s32.totalorder %s5939_s30, %s5695_s27  ;;  %p5704_p1 = scmp.lt.s32.totalorder %s5695_s27, %s5695_s27 }
  0x3c   : > { %p5698_p8 = pnand %p5696_p7, %p5951_p0  ;;  %p5705_p6 = por %p5704_p1, %p5703_p13 }
  0x3e   : > { %p5699_p11 = pneg %p5698_p8 }
  0x40   : > { %p5706_p9 = pnand %p5705_p6, %p5699_p11 }
  0x42   : > { %5709 = shalt.err (!%p5706_p9)
}
  0x43   : > { %5137 = dma.hbm_to_vmem [thread:$0]  (!%p5935_p12), %s8163_s3, 8192, %s5939_s30, [#allocation3], %s5813_s18, %s5813_s18, %s5814_s20  }
  0x44   : > { %s5710_s21 = scalar_lea.hbm %s8166_s6, 8192 }
  0x45   : > { %p5711_p2 = scmp.ne.s32.totalorder %s8166_s6, %s5710_s21  ;;  %p5717_p7 = scmp.lt.u32.totalorder %s5710_s21, %s8166_s6 }
  0x47   : > { %p5713_p3 = pnand %p5711_p2, %p5951_p0 }
  0x49   : > { %p5714_p4 = pneg %p5713_p3 }
  0x4b   : > { %p5719_p8 = pnand %p5717_p7, %p5714_p4 }
  0x4d   : > { %5722 = shalt.err (!%p5719_p8)
}
  0x4e   : > { %s5723_s27 = scalar_lea.vmem %s319_s12, 8192  ;;  %p5731_p6 = scmp.lt.s32.totalorder %s319_s12, %s319_s12 }
  0x4f   : > { %p5724_p11 = scmp.ne.s32.totalorder %s319_s12, %s5723_s27  ;;  %p5732_p9 = scmp.lt.s32.totalorder %s5723_s27, %s5723_s27 }
  0x51   : > { %p5726_p13 = pnand %p5724_p11, %p5951_p0  ;;  %p5733_p5 = por %p5732_p9, %p5731_p6 }
  0x53   : > { %p5727_p1 = pneg %p5726_p13 }
  0x55   : > { %p5734_p10 = pnand %p5733_p5, %p5727_p1 }
  0x57   : > { %5737 = shalt.err (!%p5734_p10)
}
  0x58   : > { %s5815_s30 = smov 128   ;;  %s5816_s18 = smov 8  }
  0x59   : > { %5143 = dma.hbm_to_vmem [thread:$0]  (!%p5935_p12), %s8166_s6, 8192, %s319_s12, [#allocation6], %s5815_s30, %s5815_s30, %s5816_s18  }
  0x5a   : > { %p8283_p2 = scmp.ne.s32.totalorder %s8280_s25, 0 }
  0x5c   : > { %352 = sbr.rel (%p8283_p2) target bundleno = 1724 (0x6bc), region = 60 }
  0x63   : > { %p8284_p3 = scmp.eq.s32.totalorder %s5897_s17, 0 }
  0x65   : > { %5783 = dma.done.wait (%p8284_p3), [#allocation3], 8192   ;;  %p8285_p0 = pmov %p8284_p3 }
  0x67   : > { %5785 = vsyncadd (%p8285_p0), [#allocation3], 4294959104  ;;  %p8286_p5 = pmov %p8285_p0 }
  0x68   : > { %p8287_p10 = pmov %p8285_p0 }
  0x69   : > { %5787 = dma.done.wait (%p8286_p5), [#allocation6], 16384  }
  0x6a   : > { %5789 = vsyncadd (%p8287_p10), [#allocation6], 4294950912  ;;  %s4647_s15 = sshll.u32 %s5897_s17, 4  ;;  %v5817_v0 = vmov 0   ;;  %v5197_v1 = vld [vmem:[%s8161_s1 + $0xc] ss:$16 sps:$4 sm:$0xff]   ;;  %v448_v44 = vlaneseq }
  0x6b   : > { %718 = vmatprep.mubr.bf16.mxu1 %v5817_v0  ;;  %605 = vmatprep.mubr.bf16.mxu0 %v5817_v0  ;;  %p399_p12 = scmp.lt.s32.totalorder %s4647_s15, 31  ;;  %v5199_v2 = vld [vmem:[%s8161_s1 + $0x8] ss:$16 sps:$4 sm:$0xff]   ;;  %v5200_v3 = vld [vmem:[%s8161_s1 + $0x2c] ss:$16 sps:$4 sm:$0xff]   ;;  %vm548_vm0 = vcmask 523264  }
  0x6c   : > { %686 = vmatprep.subr.bf16.mxu1 %v5197_v1  ;;  %v5202_v4 = vld [vmem:[%s8161_s1 + $0x28] ss:$16 sps:$4 sm:$0xff]   ;;  %v5203_v5 = vld [vmem:[%s8161_s1 + $0x4c] ss:$16 sps:$4 sm:$0xff]   ;;  %v5209_v10 = vld [vmem:[%s8161_s1 + $0x4] ss:$16 sps:$4 sm:$0xff]  }
  0x6d   : > { %s8486_s15 = smov (!%p399_p12, %s4647_s15), 31  ;;  %687 = vmatpush1.bf16.msra.mxu1 %v5199_v2  ;;  %v5205_v6 = vld [vmem:[%s8161_s1 + $0x48] ss:$16 sps:$4 sm:$0xff]   ;;  %v5206_v7 = vld [vmem:[%s8161_s1 + $0x6c] ss:$16 sps:$4 sm:$0xff]   ;;  %573 = vmatprep.subr.bf16.mxu0 %v5209_v10  ;;  %v6126_v49 = vshrl.u32 %v448_v44, 7 }
  0x6e   : > { %688 = vmatprep.subr.bf16.mxu1 %v5200_v3  ;;  %s4648_s22 = sshll.u32 %s8486_s15, 3  ;;  %v5208_v8 = vld [vmem:[%s8161_s1 + $0x68] ss:$16 sps:$4 sm:$0xff]   ;;  %v5211_v11 = vld [vmem:[%s8161_s1] ss:$16 sps:$4 sm:$0xff]   ;;  %s395_s21 = sand.u32 1, %s5800_s14  }
  0x6f   : > { %s6048_s13 = scalar_lea.vmem %s8160_s0, %s4648_s22  ;;  %v5212_v13 = vld [vmem:[%s8161_s1 + $0x24] ss:$16 sps:$4 sm:$0xff]   ;;  %574 = vmatpush1.bf16.msra.mxu0 %v5211_v11  ;;  %v5214_v14 = vld [vmem:[%s8161_s1 + $0x20] ss:$16 sps:$4 sm:$0xff]   ;;  %v5224_v43 = vld [vmem:[#allocation5 + $0x8] ss:$16 sps:$4 sm:$0xff]  }
  0x70   : > { %v406_v9 = vld [vmem:[%s6048_s13] sm:$0xff]  ;;  %v407_v12 = vld [vmem:[%s6048_s13 + $0x8] sm:$0xff]  ;;  %575 = vmatprep.subr.bf16.mxu0 %v5212_v13  ;;  %v408_v19 = vld [vmem:[%s6048_s13 + $0x10] sm:$0xff]  ;;  %8288 = vst [vmem:[#allocation18_spill] sm:$0xff] %v6126_v49  ;;  %v8181_v54 = vsub.s32 2, %v6126_v49  ;;  %v8180_v57 = vsub.s32 3, %v6126_v49 }
  0x71   : > { %689 = vmatpush1.bf16.msra.mxu1 %v5202_v4  ;;  %v422_v15 = vpack.c.bf16 %v407_v12, %v406_v9  ;;  %v5215_v16 = vld [vmem:[%s8161_s1 + $0x44] ss:$16 sps:$4 sm:$0xff]   ;;  %v5217_v17 = vld [vmem:[%s8161_s1 + $0x40] ss:$16 sps:$4 sm:$0xff]   ;;  %v409_v20 = vld [vmem:[%s6048_s13 + $0x18] sm:$0xff]  ;;  %v6147_v12 = vsub.s32 0, %v6126_v49 }
  0x72   : > { %690 = vmatprep.subr.bf16.mxu1 %v5203_v5  ;;  %v5218_v18 = vld [vmem:[%s8161_s1 + $0x64] ss:$16 sps:$4 sm:$0xff]   ;;  %v5220_v21 = vld [vmem:[%s8161_s1 + $0x60] ss:$16 sps:$4 sm:$0xff]   ;;  %v423_v22 = vpack.c.bf16 %v409_v20, %v408_v19  ;;  %v411_v24 = vld [vmem:[%s6048_s13 + $0x28] sm:$0xff]  ;;  %v6150_v13 = vsub.s32 1, %v6126_v49 }
  0x73   : > { %576 = vmatpush1.bf16.msra.mxu0 %v5214_v14  ;;  %v410_v23 = vld [vmem:[%s6048_s13 + $0x20] sm:$0xff]  ;;  %v412_v26 = vld [vmem:[%s6048_s13 + $0x30] sm:$0xff]  ;;  %v413_v27 = vld [vmem:[%s6048_s13 + $0x38] sm:$0xff]  ;;  %8289 = vst [vmem:[#allocation19_spill] sm:$0xff] %v6147_v12  ;;  %s4646_s26 = sshll.u32 %s395_s21, 7  ;;  %s4895_s27 = sshll.u32 %s5897_s17, 11 }
  0x74   : > { %577 = vmatprep.subr.bf16.mxu0 %v5215_v16  ;;  %v424_v25 = vpack.c.bf16 %v411_v24, %v410_v23  ;;  %v425_v28 = vpack.c.bf16 %v413_v27, %v412_v26  ;;  %v414_v29 = vld [vmem:[%s6048_s13 + $0x40] sm:$0xff]  ;;  %v415_v30 = vld [vmem:[%s6048_s13 + $0x48] sm:$0xff]  ;;  %v416_v32 = vld [vmem:[%s6048_s13 + $0x50] sm:$0xff]  ;;  %8290 = vst [vmem:[#allocation20_spill] sm:$0xff] %v6150_v13  ;;  %s8075_s22 = scalar_lea.vmem [#allocation8], %s4646_s26  ;;  %s8110_s25 = scalar_lea.hbm %s8170_s10, %s4895_s27 }
  0x75   : > { %691 = vmatpush1.bf16.msra.mxu1 %v5205_v6  ;;  %v426_v31 = vpack.c.bf16 %v415_v30, %v414_v29  ;;  %v417_v33 = vld [vmem:[%s6048_s13 + $0x58] sm:$0xff]  ;;  %v418_v35 = vld [vmem:[%s6048_s13 + $0x60] sm:$0xff]  ;;  %v419_v36 = vld [vmem:[%s6048_s13 + $0x68] sm:$0xff]  ;;  %s4543_s30 = sshll.u32 %s8075_s22, 4  ;;  %s8119_s17 = scalar_lea.sflag [#allocation4], %s395_s21  ;;  %s8112_s30 = int_to_ptr.vmem [resolvable:$true] %s4543_s30 }
  0x76   : > { %692 = vmatprep.subr.bf16.mxu1 %v5206_v7  ;;  %v427_v34 = vpack.c.bf16 %v417_v33, %v416_v32  ;;  %v428_v37 = vpack.c.bf16 %v419_v36, %v418_v35  ;;  %v420_v38 = vld [vmem:[%s6048_s13 + $0x70] sm:$0xff]  ;;  %v421_v39 = vld [vmem:[%s6048_s13 + $0x78] sm:$0xff]  ;;  %v446_v56 = vld [vmem:[%s8162_s2] sm:$0xf]  ;;  %s5738_s28 = scalar_lea.vmem %s8112_s30, 2048  ;;  %p8474_p7 = scmp.ne.s32.totalorder %s8277_s23, 0 }
  0x77   : > { %578 = vmatpush1.bf16.msra.mxu0 %v5217_v17  ;;  %v429_v40 = vpack.c.bf16 %v421_v39, %v420_v38  ;;  %v5221_v41 = vld [vmem:[#allocation5] ss:$16 sps:$4 sm:$0xff]   ;;  %v5223_v42 = vld [vmem:[#allocation5 + $0x4] ss:$16 sps:$4 sm:$0xff]   ;;  %v5226_v45 = vld [vmem:[#allocation5 + $0xc] ss:$16 sps:$4 sm:$0xff]   ;;  %v6135_v61 = vrot.slane %v446_v56, %v8181_v54  ;;  %v6139_v63 = vrot.slane %v446_v56, %v8180_v57  ;;  %v6166_v26 = vrot.slane %v446_v56, %v6147_v12  ;;  %p5739_p4 = scmp.ne.s32.totalorder %s8112_s30, %s5738_s28 }
  0x78   : > { %579 = vmatprep.subr.bf16.mxu0 %v5218_v18  ;;  %v5227_v46 = vld [vmem:[#allocation5 + $0x20] ss:$16 sps:$4 sm:$0xff]   ;;  %v5229_v47 = vld [vmem:[#allocation5 + $0x24] ss:$16 sps:$4 sm:$0xff]   ;;  %v5230_v48 = vld [vmem:[#allocation5 + $0x28] ss:$16 sps:$4 sm:$0xff]   ;;  %v6169_v27 = vrot.slane %v446_v56, %v6150_v13 }
  0x79   : > { %693 = vmatpush1.bf16.msra.mxu1 %v5208_v8  ;;  %v5232_v50 = vld [vmem:[#allocation5 + $0x2c] ss:$16 sps:$4 sm:$0xff]   ;;  %v5233_v51 = vld [vmem:[#allocation5 + $0x40] ss:$16 sps:$4 sm:$0xff]   ;;  %v5235_v52 = vld [vmem:[#allocation5 + $0x44] ss:$16 sps:$4 sm:$0xff]   ;;  %p5740_p8 = pnand %p5739_p4, %p8474_p7 }
  0x7a   : > { %2033 = vmatprep.subr.bf16.mxu1 %v5226_v45  ;;  %v5236_v53 = vld [vmem:[#allocation5 + $0x48] ss:$16 sps:$4 sm:$0xff]   ;;  %v5238_v55 = vld [vmem:[#allocation5 + $0x4c] ss:$16 sps:$4 sm:$0xff]   ;;  %v5239_v58 = vld [vmem:[#allocation5 + $0x60] ss:$16 sps:$4 sm:$0xff]  }
  0x7b   : > { %580 = vmatpush1.bf16.msra.mxu0 %v5220_v21  ;;  %v5241_v59 = vld [vmem:[#allocation5 + $0x64] ss:$16 sps:$4 sm:$0xff]   ;;  %v5242_v60 = vld [vmem:[#allocation5 + $0x68] ss:$16 sps:$4 sm:$0xff]   ;;  %v5244_v62 = vld [vmem:[#allocation5 + $0x6c] ss:$16 sps:$4 sm:$0xff]   ;;  %p5741_p11 = pneg %p5740_p8 }
  0x7c   : > { %4673 = vmatmul.mubr.msk.bf16.vlgmr.msra.gmra.mrb[0].mxu1 %vm548_vm0, %v422_v15  ;;  %1920 = vmatprep.subr.bf16.mxu0 %v5223_v42  ;;  %v5245_v1 = vld [vmem:[#allocation5 + $0x80] ss:$16 sps:$4 sm:$0xff]   ;;  %v5247_v2 = vld [vmem:[#allocation5 + $0x84] ss:$16 sps:$4 sm:$0xff]   ;;  %v5248_v5 = vld [vmem:[#allocation5 + $0x88] ss:$16 sps:$4 sm:$0xff]  }
  0x7d   : > { %728 = vmatprep.mubr.bf16.mxu1 %v5817_v0  ;;  %2034 = vmatpush1.bf16.msra.mxu1 %v5224_v43  ;;  %v5250_v6 = vld [vmem:[#allocation5 + $0x8c] ss:$16 sps:$4 sm:$0xff]   ;;  %v5251_v16 = vld [vmem:[#allocation5 + $0xa0] ss:$16 sps:$4 sm:$0xff]   ;;  %v5253_v17 = vld [vmem:[#allocation5 + $0xa4] ss:$16 sps:$4 sm:$0xff]  }
  0x7e   : > { %4665 = vmatmul.mubr.msk.bf16.vlgmr.msra.gmra.mrb[0].mxu0 %vm548_vm0, %v422_v15  ;;  %2035 = vmatprep.subr.bf16.mxu1 %v5232_v50  ;;  %v5254_v20 = vld [vmem:[#allocation5 + $0xa8] ss:$16 sps:$4 sm:$0xff]   ;;  %v5256_v21 = vld [vmem:[#allocation5 + $0xac] ss:$16 sps:$4 sm:$0xff]   ;;  %v5319_v12 = vld [vmem:[#allocation2 + $0x4] ss:$16 sps:$4 sm:$0xff]  }
  0x7f   : > { %615 = vmatprep.mubr.bf16.mxu0 %v5817_v0  ;;  %1921 = vmatpush1.bf16.msra.mxu0 %v5221_v41  ;;  %v5262_v29 = vld [vmem:[#allocation5 + $0xcc] ss:$16 sps:$4 sm:$0xff]   ;;  %s5818_s12 = smov [#allocation8]  }
  0x80   : > { %1922 = vmatprep.subr.bf16.mxu0 %v5229_v47  ;;  %v5268_v38 = vld [vmem:[#allocation5 + $0xec] ss:$16 sps:$4 sm:$0xff]   ;;  %s5742_s16 = sshll.u32 %s5818_s12, 4  ;;  %s5743_s16 = int_to_ptr.vmem [resolvable:$false] %s5742_s16 }
  0x81   : > { %2036 = vmatpush1.bf16.msra.mxu1 %v5230_v48  ;;  %v5263_v48 = vld [vmem:[#allocation5 + $0xe0] ss:$16 sps:$4 sm:$0xff]   ;;  %s5744_s13 = scalar_lea.vmem %s5743_s16, 4096  ;;  %p5745_p13 = scmp.lt.s32.totalorder %s8112_s30, %s5743_s16 }
  0x82   : > { %2037 = vmatprep.subr.bf16.mxu1 %v5238_v55  ;;  %p5746_p1 = scmp.lt.s32.totalorder %s5744_s13, %s5738_s28 }
  0x83   : > { %1923 = vmatpush1.bf16.msra.mxu0 %v5227_v46 }
  0x84   : > { %4674 = vmatmul.mubr.msk.bf16.gmra.mrb[4].mxu1 %vm548_vm0, %v423_v22  ;;  %1924 = vmatprep.subr.bf16.mxu0 %v5235_v52  ;;  %p5747_p6 = por %p5746_p1, %p5745_p13 }
  0x85   : > { %738 = vmatprep.mubr.bf16.mxu1 %v5817_v0  ;;  %2038 = vmatpush1.bf16.msra.mxu1 %v5236_v53 }
  0x86   : > { %4666 = vmatmul.mubr.msk.bf16.gmra.mrb[4].mxu0 %vm548_vm0, %v423_v22  ;;  %2039 = vmatprep.subr.bf16.mxu1 %v5244_v62  ;;  %v5271_v62 = vld [vmem:[#allocation5 + $0x104] ss:$16 sps:$4 sm:$0xff]   ;;  %p5748_p9 = pnand %p5747_p6, %p5741_p11 }
  0x87   : > { %625 = vmatprep.mubr.bf16.mxu0 %v5817_v0  ;;  %1925 = vmatpush1.bf16.msra.mxu0 %v5233_v51 }
  0x88   : > { %1926 = vmatprep.subr.bf16.mxu0 %v5241_v59 }
  0x89   : > { %2040 = vmatpush1.bf16.msra.mxu1 %v5242_v60  ;;  %v5266_v60 = vld [vmem:[#allocation5 + $0xe8] ss:$16 sps:$4 sm:$0xff]  }
  0x8a   : > { %2041 = vmatprep.subr.bf16.mxu1 %v5250_v6  ;;  %v5269_v6 = vld [vmem:[#allocation5 + $0x100] ss:$16 sps:$4 sm:$0xff]  }
  0x8b   : > { %1927 = vmatpush1.bf16.msra.mxu0 %v5239_v58 }
  0x8c   : > { %4675 = vmatmul.mubr.msk.bf16.gmra.mrb[8].mxu1 %vm548_vm0, %v424_v25  ;;  %1928 = vmatprep.subr.bf16.mxu0 %v5247_v2 }
  0x8d   : > { %748 = vmatprep.mubr.bf16.mxu1 %v5817_v0  ;;  %2042 = vmatpush1.bf16.msra.mxu1 %v5248_v5 }
  0x8e   : > { %4667 = vmatmul.mubr.msk.bf16.gmra.mrb[8].mxu0 %vm548_vm0, %v424_v25  ;;  %v5259_v25 = vld [vmem:[#allocation5 + $0xc4] ss:$16 sps:$4 sm:$0xff]   ;;  %2043 = vmatprep.subr.bf16.mxu1 %v5256_v21 }
  0x8f   : > { %635 = vmatprep.mubr.bf16.mxu0 %v5817_v0  ;;  %1929 = vmatpush1.bf16.msra.mxu0 %v5245_v1 }
  0x90   : > { %1930 = vmatprep.subr.bf16.mxu0 %v5253_v17  ;;  %v5272_v17 = vld [vmem:[#allocation5 + $0x108] ss:$16 sps:$4 sm:$0xff]  }
  0x91   : > { %2044 = vmatpush1.bf16.msra.mxu1 %v5254_v20 }
  0x92   : > { %2045 = vmatprep.subr.bf16.mxu1 %v5262_v29 }
  0x93   : > { %1931 = vmatpush1.bf16.msra.mxu0 %v5251_v16 }
  0x94   : > { %4676 = vmatmul.mubr.msk.bf16.gmra.mrb[12].mxu1 %vm548_vm0, %v425_v28  ;;  %1932 = vmatprep.subr.bf16.mxu0 %v5259_v25 }
  0x95   : > { %758 = vmatprep.mubr.bf16.mxu1 %v5817_v0 }
  0x96   : > { %4668 = vmatmul.mubr.msk.bf16.gmra.mrb[12].mxu0 %vm548_vm0, %v425_v28  ;;  %v5257_v28 = vld [vmem:[#allocation5 + $0xc0] ss:$16 sps:$4 sm:$0xff]  }
  0x97   : > { %645 = vmatprep.mubr.bf16.mxu0 %v5817_v0  ;;  %1933 = vmatpush1.bf16.msra.mxu0 %v5257_v28 }
  0x9c   : > { %4677 = vmatmul.mubr.msk.bf16.gmra.mrb[16].mxu1 %vm548_vm0, %v426_v31 }
  0x9d   : > { %768 = vmatprep.mubr.bf16.mxu1 %v5817_v0 }
  0x9e   : > { %4669 = vmatmul.mubr.msk.bf16.gmra.mrb[16].mxu0 %vm548_vm0, %v426_v31 }
  0x9f   : > { %655 = vmatprep.mubr.bf16.mxu0 %v5817_v0 }
  0xa4   : > { %4678 = vmatmul.mubr.msk.bf16.gmra.mrb[20].mxu1 %vm548_vm0, %v427_v34 }
  0xa5   : > { %778 = vmatprep.mubr.bf16.mxu1 %v5817_v0 }
  0xa6   : > { %4670 = vmatmul.mubr.msk.bf16.gmra.mrb[20].mxu0 %vm548_vm0, %v427_v34  ;;  %v5260_v34 = vld [vmem:[#allocation5 + $0xc8] ss:$16 sps:$4 sm:$0xff]  }
  0xa7   : > { %665 = vmatprep.mubr.bf16.mxu0 %v5817_v0  ;;  %2046 = vmatpush1.bf16.msra.mxu1 %v5260_v34 }
  0xa8   : > { %2047 = vmatprep.subr.bf16.mxu1 %v5268_v38 }
  0xab   : > { %2048 = vmatpush1.bf16.msra.mxu1 %v5266_v60 }
  0xac   : > { %4679 = vmatmul.mubr.msk.bf16.gmra.mrb[24].mxu1 %vm548_vm0, %v428_v37 }
  0xad   : > { %788 = vmatprep.mubr.bf16.mxu1 %v5817_v0 }
  0xae   : > { %4671 = vmatmul.mubr.msk.bf16.gmra.mrb[24].mxu0 %vm548_vm0, %v428_v37  ;;  %v5265_v37 = vld [vmem:[#allocation5 + $0xe4] ss:$16 sps:$4 sm:$0xff]  }
  0xaf   : > { %675 = vmatprep.mubr.bf16.mxu0 %v5817_v0  ;;  %1934 = vmatprep.subr.bf16.mxu0 %v5265_v37  ;;  %v5280_v37 = vld [vmem:[#allocation5 + $0x12c] ss:$16 sps:$4 sm:$0xff]  }
  0xb0   : > { %1935 = vmatpush1.bf16.msra.mxu0 %v5263_v48  ;;  %v5278_v48 = vld [vmem:[#allocation5 + $0x128] ss:$16 sps:$4 sm:$0xff]  }
  0xb1   : > { %1936 = vmatprep.subr.bf16.mxu0 %v5271_v62  ;;  %v5283_v62 = vld [vmem:[#allocation5 + $0x144] ss:$16 sps:$4 sm:$0xff]  }
  0xb4   : > { %4680 = vmatmul.mubr.msk.bf16.gmra.mrb[28].mxu1 %vm548_vm0, %v429_v40  ;;  %1937 = vmatpush1.bf16.msra.mxu0 %v5269_v6  ;;  %v5284_v6 = vld [vmem:[#allocation5 + $0x148] ss:$16 sps:$4 sm:$0xff]  }
  0xb6   : > { %4672 = vmatmul.mubr.msk.bf16.gmra.mrb[28].mxu0 %vm548_vm0, %v429_v40 }
 0x14f   : > { %v720_v0 = vpop.f32.mrb[0].mxu1 }
 0x150   : > { %v721_v3 = vadd.f32 %v720_v0, %v6135_v61  ;;  %v722_v4 = vpop.f32.mrb[1].mxu1 }
 0x151   : > { %v723_v7 = vadd.f32 %v722_v4, %v6139_v63  ;;  %v724_v8 = vpop.f32.mrb[2].mxu1  ;;  %v607_v42 = vpop.f32.mrb[0].mxu0  ;;  %v5274_v4 = vld [vmem:[#allocation5 + $0x10c] ss:$16 sps:$4 sm:$0xff]  }
 0x152   : > { %v6143_v9 = vmax.f32 %v721_v3, 0.0  ;;  %v725_v10 = vadd.f32 %v724_v8, %v6135_v61  ;;  %v726_v11 = vpop.f32.mrb[3].mxu1  ;;  %v6183_v46 = vadd.f32 %v607_v42, %v6166_v26  ;;  %v609_v47 = vpop.f32.mrb[1].mxu0  ;;  %2049 = vmatprep.subr.bf16.mxu1 %v5274_v4  ;;  %v5281_v4 = vld [vmem:[#allocation5 + $0x140] ss:$16 sps:$4 sm:$0xff]  }
 0x153   : > { %v6152_v14 = vmax.f32 %v723_v7, 0.0  ;;  %v727_v15 = vadd.f32 %v726_v11, %v6139_v63  ;;  %v6189_v53 = vadd.f32 %v609_v47, %v6169_v27  ;;  %v611_v55 = vpop.f32.mrb[2].mxu0  ;;  %2050 = vmatpush1.bf16.msra.mxu1 %v5272_v17 }
 0x154   : > { %v6155_v18 = vmax.f32 %v725_v10, 0.0  ;;  %v1216_v19 = vmul.f32 %v6143_v9, %v6143_v9  ;;  %v6194_v58 = vadd.f32 %v611_v55, %v6166_v26  ;;  %v613_v59 = vpop.f32.mrb[3].mxu0  ;;  %2051 = vmatprep.subr.bf16.mxu1 %v5280_v37 }
 0x155   : > { %v6159_v22 = vmax.f32 %v727_v15, 0.0  ;;  %v1152_v23 = vadd.f32 %v6152_v14, %v6143_v9  ;;  %v1217_v24 = vmul.f32 %v6152_v14, %v6152_v14  ;;  %v6205_v5 = vadd.f32 %v613_v59, %v6169_v27 }
 0x156   : > { %v1218_v32 = vmul.f32 %v6155_v18, %v6155_v18 }
 0x157   : > { %v730_v30 = vpop.f32.mrb[4].mxu1  ;;  %1153 = vadd.xlane.f32.xlu0 %v1152_v23  ;;  %v1248_v31 = vadd.f32 %v1217_v24, %v1216_v19  ;;  %v1219_v33 = vmul.f32 %v6159_v22, %v6159_v22  ;;  %v1155_v41 = vadd.f32 %v6159_v22, %v6155_v18  ;;  %2052 = vmatpush1.bf16.msra.mxu1 %v5278_v48  ;;  %v5290_v48 = vld [vmem:[#allocation5 + $0x168] ss:$16 sps:$4 sm:$0xff]  }
 0x158   : > { %v731_v35 = vadd.f32 %v730_v30, %v6135_v61  ;;  %v732_v36 = vpop.f32.mrb[5].mxu1 }
 0x159   : > { %v733_v39 = vadd.f32 %v732_v36, %v6139_v63  ;;  %v734_v40 = vpop.f32.mrb[6].mxu1  ;;  %1249 = vadd.xlane.f32.xlu1 %v1248_v31  ;;  %v1251_v52 = vadd.f32 %v1219_v33, %v1218_v32  ;;  %v617_v23 = vpop.f32.mrb[4].mxu0  ;;  %v5277_v36 = vld [vmem:[#allocation5 + $0x124] ss:$16 sps:$4 sm:$0xff]  }
 0x15a   : > { %v6179_v43 = vmax.f32 %v731_v35, 0.0  ;;  %v735_v44 = vadd.f32 %v734_v40, %v6135_v61  ;;  %v736_v45 = vpop.f32.mrb[7].mxu1  ;;  %v6219_v29 = vadd.f32 %v617_v23, %v6166_v26  ;;  %v619_v30 = vpop.f32.mrb[5].mxu0  ;;  %1938 = vmatprep.subr.bf16.mxu0 %v5277_v36  ;;  %v5289_v36 = vld [vmem:[#allocation5 + $0x164] ss:$16 sps:$4 sm:$0xff]  }
 0x15b   : > { %v6185_v50 = vmax.f32 %v733_v39, 0.0  ;;  %v737_v51 = vadd.f32 %v736_v45, %v6139_v63  ;;  %1156 = vadd.xlane.f32.xlu0 %v1155_v41  ;;  %v6225_v34 = vadd.f32 %v619_v30, %v6169_v27  ;;  %v621_v35 = vpop.f32.mrb[6].mxu0  ;;  %v5275_v41 = vld [vmem:[#allocation5 + $0x120] ss:$16 sps:$4 sm:$0xff]  }
 0x15c   : > { %v6191_v56 = vmax.f32 %v735_v44, 0.0  ;;  %v1220_v2 = vmul.f32 %v6179_v43, %v6179_v43  ;;  %v6230_v39 = vadd.f32 %v621_v35, %v6166_v26  ;;  %v623_v40 = vpop.f32.mrb[7].mxu0  ;;  %1939 = vmatpush1.bf16.msra.mxu0 %v5275_v41 }
 0x15d   : > { %v6196_v0 = vmax.f32 %v737_v51, 0.0  ;;  %1252 = vadd.xlane.f32.xlu1 %v1251_v52  ;;  %v1158_v1 = vadd.f32 %v6185_v50, %v6179_v43  ;;  %v1221_v3 = vmul.f32 %v6185_v50, %v6185_v50  ;;  %v6241_v51 = vadd.f32 %v623_v40, %v6169_v27  ;;  %1940 = vmatprep.subr.bf16.mxu0 %v5283_v62 }
 0x15e   : > { %v1222_v10 = vmul.f32 %v6191_v56, %v6191_v56 }
 0x15f   : > { %v740_v7 = vpop.f32.mrb[8].mxu1  ;;  %1159 = vadd.xlane.f32.xlu0 %v1158_v1  ;;  %v1161_v8 = vadd.f32 %v6196_v0, %v6191_v56  ;;  %v1223_v11 = vmul.f32 %v6196_v0, %v6196_v0  ;;  %v1254_v21 = vadd.f32 %v1221_v3, %v1220_v2  ;;  %v5286_v1 = vld [vmem:[#allocation5 + $0x14c] ss:$16 sps:$4 sm:$0xff]  }
 0x160   : > { %v741_v15 = vadd.f32 %v740_v7, %v6135_v61  ;;  %v742_v16 = vpop.f32.mrb[9].mxu1  ;;  %2053 = vmatprep.subr.bf16.mxu1 %v5286_v1  ;;  %1941 = vmatpush1.bf16.msra.mxu0 %v5281_v4  ;;  %v5298_v4 = vld [vmem:[#allocation5 + $0x18c] ss:$16 sps:$4 sm:$0xff]  }
 0x161   : > { %v743_v19 = vadd.f32 %v742_v16, %v6139_v63  ;;  %v744_v20 = vpop.f32.mrb[10].mxu1  ;;  %1162 = vadd.xlane.f32.xlu1 %v1161_v8  ;;  %v1257_v33 = vadd.f32 %v1223_v11, %v1222_v10  ;;  %v627_v11 = vpop.f32.mrb[8].mxu0  ;;  %2054 = vmatpush1.bf16.msra.mxu1 %v5284_v6 }
 0x162   : > { %v6215_v24 = vmax.f32 %v741_v15, 0.0  ;;  %v745_v25 = vadd.f32 %v744_v20, %v6135_v61  ;;  %v746_v28 = vpop.f32.mrb[11].mxu1  ;;  %v629_v20 = vpop.f32.mrb[9].mxu0  ;;  %1942 = vmatprep.subr.bf16.mxu0 %v5289_v36 }
 0x163   : > { %v6221_v31 = vmax.f32 %v743_v19, 0.0  ;;  %v747_v32 = vadd.f32 %v746_v28, %v6139_v63  ;;  %1255 = vadd.xlane.f32.xlu0 %v1254_v21  ;;  %v6255_v19 = vadd.f32 %v627_v11, %v6166_v26  ;;  %v6261_v28 = vadd.f32 %v629_v20, %v6169_v27  ;;  %v631_v30 = vpop.f32.mrb[10].mxu0  ;;  %v5293_v11 = vld [vmem:[#allocation5 + $0x180] ss:$16 sps:$4 sm:$0xff]  }
 0x164   : > { %v6227_v38 = vmax.f32 %v745_v25, 0.0  ;;  %v1224_v45 = vmul.f32 %v6215_v24, %v6215_v24  ;;  %v633_v35 = vpop.f32.mrb[11].mxu0 }
 0x165   : > { %v6232_v42 = vmax.f32 %v747_v32, 0.0  ;;  %1258 = vadd.xlane.f32.xlu1 %v1257_v33  ;;  %v1164_v44 = vadd.f32 %v6221_v31, %v6215_v24  ;;  %v1225_v47 = vmul.f32 %v6221_v31, %v6221_v31  ;;  %v6266_v33 = vadd.f32 %v631_v30, %v6166_v26  ;;  %v5296_v30 = vld [vmem:[#allocation5 + $0x188] ss:$16 sps:$4 sm:$0xff]  }
 0x166   : > { %v1226_v59 = vmul.f32 %v6227_v38, %v6227_v38 }
 0x167   : > { %v750_v52 = vpop.f32.mrb[12].mxu1  ;;  %1165 = vadd.xlane.f32.xlu0 %v1164_v44  ;;  %v1167_v55 = vadd.f32 %v6232_v42, %v6227_v38  ;;  %v1227_v60 = vmul.f32 %v6232_v42, %v6232_v42  ;;  %v1260_v10 = vadd.f32 %v1225_v47, %v1224_v45  ;;  %v5287_v45 = vld [vmem:[#allocation5 + $0x160] ss:$16 sps:$4 sm:$0xff]   ;;  %v6277_v47 = vadd.f32 %v633_v35, %v6169_v27 }
 0x168   : > { %v751_v2 = vadd.f32 %v750_v52, %v6135_v61  ;;  %v752_v3 = vpop.f32.mrb[13].mxu1  ;;  %v5292_v52 = vld [vmem:[#allocation5 + $0x16c] ss:$16 sps:$4 sm:$0xff]   ;;  %1943 = vmatpush1.bf16.msra.mxu0 %v5287_v45 }
 0x169   : > { %v753_v7 = vadd.f32 %v752_v3, %v6139_v63  ;;  %v754_v8 = vpop.f32.mrb[14].mxu1  ;;  %1168 = vadd.xlane.f32.xlu1 %v1167_v55  ;;  %v1263_v25 = vadd.f32 %v1227_v60, %v1226_v59  ;;  %2055 = vmatprep.subr.bf16.mxu1 %v5292_v52  ;;  %v5295_v3 = vld [vmem:[#allocation5 + $0x184] ss:$16 sps:$4 sm:$0xff]  }
 0x16a   : > { %v6251_v15 = vmax.f32 %v751_v2, 0.0  ;;  %v755_v16 = vadd.f32 %v754_v8, %v6135_v61  ;;  %v756_v17 = vpop.f32.mrb[15].mxu1  ;;  %2056 = vmatpush1.bf16.msra.mxu1 %v5290_v48  ;;  %1944 = vmatprep.subr.bf16.mxu0 %v5295_v3  ;;  %v5301_v48 = vld [vmem:[#allocation5 + $0x1a4] ss:$16 sps:$4 sm:$0xff]  }
 0x16b   : > { %v6257_v21 = vmax.f32 %v753_v7, 0.0  ;;  %v757_v23 = vadd.f32 %v756_v17, %v6139_v63  ;;  %1261 = vadd.xlane.f32.xlu0 %v1260_v10  ;;  %v637_v10 = vpop.f32.mrb[12].mxu0  ;;  %2057 = vmatprep.subr.bf16.mxu1 %v5298_v4  ;;  %v5302_v4 = vld [vmem:[#allocation5 + $0x1a8] ss:$16 sps:$4 sm:$0xff]  }
 0x16c   : > { %v6263_v32 = vmax.f32 %v755_v16, 0.0  ;;  %v1228_v41 = vmul.f32 %v6251_v15, %v6251_v15  ;;  %1945 = vmatpush1.bf16.msra.mxu0 %v5293_v11 }
 0x16d   : > { %v6268_v37 = vmax.f32 %v757_v23, 0.0  ;;  %1264 = vadd.xlane.f32.xlu1 %v1263_v25  ;;  %v1170_v40 = vadd.f32 %v6257_v21, %v6251_v15  ;;  %v1229_v44 = vmul.f32 %v6257_v21, %v6257_v21  ;;  %v6291_v23 = vadd.f32 %v637_v10, %v6166_v26  ;;  %v639_v25 = vpop.f32.mrb[13].mxu0  ;;  %1946 = vmatprep.subr.bf16.mxu0 %v5301_v48  ;;  %v5305_v48 = vld [vmem:[#allocation5 + $0x1c0] ss:$16 sps:$4 sm:$0xff]  }
 0x16e   : > { %v1230_v60 = vmul.f32 %v6263_v32, %v6263_v32  ;;  %2058 = vmatpush1.bf16.msra.mxu1 %v5296_v30  ;;  %v5310_v30 = vld [vmem:[#allocation5 + $0x1cc] ss:$16 sps:$4 sm:$0xff]  }
 0x16f   : > { %v760_v55 = vpop.f32.mrb[16].mxu1  ;;  %1171 = vadd.xlane.f32.xlu0 %v1170_v40  ;;  %v1173_v59 = vadd.f32 %v6268_v37, %v6263_v32  ;;  %v1231_v62 = vmul.f32 %v6268_v37, %v6268_v37  ;;  %v1266_v8 = vadd.f32 %v1229_v44, %v1228_v41  ;;  %v6297_v41 = vadd.f32 %v639_v25, %v6169_v27  ;;  %v641_v44 = vpop.f32.mrb[14].mxu0  ;;  %v5307_v25 = vld [vmem:[#allocation5 + $0x1c4] ss:$16 sps:$4 sm:$0xff]  }
 0x170   : > { %v761_v1 = vadd.f32 %v760_v55, %v6135_v61  ;;  %v762_v2 = vpop.f32.mrb[17].mxu1  ;;  %v6302_v52 = vadd.f32 %v641_v44, %v6166_v26  ;;  %v643_v55 = vpop.f32.mrb[15].mxu0 }
 0x171   : > { %v763_v6 = vadd.f32 %v762_v2, %v6139_v63  ;;  %v764_v7 = vpop.f32.mrb[18].mxu1  ;;  %1174 = vadd.xlane.f32.xlu1 %v1173_v59  ;;  %v1269_v40 = vadd.f32 %v1231_v62, %v1230_v60  ;;  %v5299_v2 = vld [vmem:[#allocation5 + $0x1a0] ss:$16 sps:$4 sm:$0xff]   ;;  %v6313_v3 = vadd.f32 %v643_v55, %v6169_v27  ;;  %v647_v55 = vpop.f32.mrb[16].mxu0 }
 0x172   : > { %v6287_v16 = vmax.f32 %v761_v1, 0.0  ;;  %v765_v17 = vadd.f32 %v764_v7, %v6135_v61  ;;  %v766_v20 = vpop.f32.mrb[19].mxu1  ;;  %1947 = vmatpush1.bf16.msra.mxu0 %v5299_v2  ;;  %v6327_v13 = vadd.f32 %v647_v55, %v6166_v26  ;;  %v5308_v2 = vld [vmem:[#allocation5 + $0x1c8] ss:$16 sps:$4 sm:$0xff]  }
 0x173   : > { %v6293_v35 = vmax.f32 %v763_v6, 0.0  ;;  %v767_v36 = vadd.f32 %v766_v20, %v6139_v63  ;;  %1267 = vadd.xlane.f32.xlu0 %v1266_v8  ;;  %v5304_v6 = vld [vmem:[#allocation5 + $0x1ac] ss:$16 sps:$4 sm:$0xff]   ;;  %1948 = vmatprep.subr.bf16.mxu0 %v5307_v25 }
 0x174   : > { %8291 = vst [vmem:[#allocation21_spill] sm:$0xff] %v6287_v16  ;;  %v6299_v45 = vmax.f32 %v765_v17, 0.0  ;;  %v1232_v60 = vmul.f32 %v6287_v16, %v6287_v16  ;;  %2059 = vmatprep.subr.bf16.mxu1 %v5304_v6 }
 0x175   : > { %v6304_v59 = vmax.f32 %v767_v36, 0.0  ;;  %1270 = vadd.xlane.f32.xlu1 %v1269_v40  ;;  %v1176_v1 = vadd.f32 %v6293_v35, %v6287_v16  ;;  %v1233_v62 = vmul.f32 %v6293_v35, %v6293_v35  ;;  %2060 = vmatpush1.bf16.msra.mxu1 %v5302_v4  ;;  %v5313_v4 = vld [vmem:[#allocation5 + $0x1e4] ss:$16 sps:$4 sm:$0xff]  }
 0x176   : > { %8292 = vst [vmem:[#allocation22_spill] sm:$0xff] %v6299_v45  ;;  %v1234_v10 = vmul.f32 %v6299_v45, %v6299_v45  ;;  %2061 = vmatprep.subr.bf16.mxu1 %v5310_v30  ;;  %1949 = vmatpush1.bf16.msra.mxu0 %v5305_v48 }
 0x177   : > { %8293 = vst [vmem:[#allocation23_spill] sm:$0xff] %v6304_v59  ;;  %v770_v7 = vpop.f32.mrb[20].mxu1  ;;  %1177 = vadd.xlane.f32.xlu0 %v1176_v1  ;;  %v1179_v8 = vadd.f32 %v6304_v59, %v6299_v45  ;;  %v1235_v11 = vmul.f32 %v6304_v59, %v6304_v59  ;;  %v1272_v44 = vadd.f32 %v1233_v62, %v1232_v60 }
 0x178   : > { %v771_v17 = vadd.f32 %v770_v7, %v6135_v61  ;;  %v772_v20 = vpop.f32.mrb[21].mxu1  ;;  %v649_v7 = vpop.f32.mrb[17].mxu0  ;;  %1950 = vmatprep.subr.bf16.mxu0 %v5313_v4 }
 0x179   : > { %v773_v36 = vadd.f32 %v772_v20, %v6139_v63  ;;  %v774_v40 = vpop.f32.mrb[22].mxu1  ;;  %1180 = vadd.xlane.f32.xlu1 %v1179_v8  ;;  %v1275_v60 = vadd.f32 %v1235_v11, %v1234_v10  ;;  %v6333_v62 = vadd.f32 %v649_v7, %v6169_v27  ;;  %v651_v8 = vpop.f32.mrb[18].mxu0  ;;  %2062 = vmatpush1.bf16.msra.mxu1 %v5308_v2 }
 0x17a   : > { %v6323_v1 = vmax.f32 %v771_v17, 0.0  ;;  %v775_v57 = vadd.f32 %v774_v40, %v6135_v61  ;;  %v776_v54 = vpop.f32.mrb[23].mxu1  ;;  %v6338_v40 = vadd.f32 %v651_v8, %v6166_v26  ;;  %v653_v55 = vpop.f32.mrb[19].mxu0 }
 0x17b   : > { %v6329_v6 = vmax.f32 %v773_v36, 0.0  ;;  %v777_v20 = vadd.f32 %v776_v54, %v6139_v63  ;;  %1273 = vadd.xlane.f32.xlu0 %v1272_v44  ;;  %v6349_v30 = vadd.f32 %v653_v55, %v6169_v27  ;;  %v5314_v36 = vld [vmem:[#allocation5 + $0x1e8] ss:$16 sps:$4 sm:$0xff]   ;;  %v5316_v44 = vld [vmem:[#allocation5 + $0x1ec] ss:$16 sps:$4 sm:$0xff]  }
 0x17c   : > { %8294 = vst [vmem:[#allocation24_spill] sm:$0xff] %v6323_v1  ;;  %v6335_v17 = vmax.f32 %v775_v57, 0.0  ;;  %v1236_v10 = vmul.f32 %v6323_v1, %v6323_v1  ;;  %v5311_v57 = vld [vmem:[#allocation5 + $0x1e0] ss:$16 sps:$4 sm:$0xff]   ;;  %2063 = vmatprep.subr.bf16.mxu1 %v5316_v44 }
 0x17d   : > { %8295 = vst [vmem:[#allocation25_spill] sm:$0xff] %v6329_v6  ;;  %v6340_v25 = vmax.f32 %v777_v20, 0.0  ;;  %1276 = vadd.xlane.f32.xlu1 %v1275_v60  ;;  %v1182_v54 = vadd.f32 %v6329_v6, %v6323_v1  ;;  %v1237_v11 = vmul.f32 %v6329_v6, %v6329_v6  ;;  %1951 = vmatpush1.bf16.msra.mxu0 %v5311_v57  ;;  %v5322_v1 = vld [vmem:[#allocation2 + $0xc] ss:$16 sps:$4 sm:$0xff]  }
 0x17e   : > { %8296 = vst [vmem:[#allocation26_spill] sm:$0xff] %v6335_v17  ;;  %v1238_v20 = vmul.f32 %v6335_v17, %v6335_v17  ;;  %2064 = vmatpush1.bf16.msra.mxu1 %v5314_v36  ;;  %2466 = vmatprep.subr.bf16.mxu0 %v5319_v12 }
 0x17f   : > { %8297 = vst [vmem:[#allocation27_spill] sm:$0xff] %v6340_v25  ;;  %v780_v48 = vpop.f32.mrb[24].mxu1  ;;  %1183 = vadd.xlane.f32.xlu0 %v1182_v54  ;;  %v1185_v7 = vadd.f32 %v6340_v25, %v6335_v17  ;;  %v1239_v60 = vmul.f32 %v6340_v25, %v6340_v25  ;;  %v1278_v4 = vadd.f32 %v1237_v11, %v1236_v10  ;;  %v657_v54 = vpop.f32.mrb[20].mxu0 }
 0x180   : > { %v781_v8 = vadd.f32 %v780_v48, %v6135_v61  ;;  %v782_v49 = vpop.f32.mrb[25].mxu1  ;;  %v6363_v25 = vadd.f32 %v657_v54, %v6166_v26  ;;  %v659_v48 = vpop.f32.mrb[21].mxu0  ;;  %2579 = vmatprep.subr.bf16.mxu1 %v5322_v1 }
 0x181   : > { %v783_v2 = vadd.f32 %v782_v49, %v6139_v63  ;;  %v784_v55 = vpop.f32.mrb[26].mxu1  ;;  %1186 = vadd.xlane.f32.xlu1 %v1185_v7  ;;  %v1281_v44 = vadd.f32 %v1239_v60, %v1238_v20  ;;  %v6369_v10 = vadd.f32 %v659_v48, %v6169_v27  ;;  %v661_v11 = vpop.f32.mrb[22].mxu0 }
 0x182   : > { %v6359_v6 = vmax.f32 %v781_v8, 0.0  ;;  %v785_v17 = vadd.f32 %v784_v55, %v6135_v61  ;;  %v786_v16 = vpop.f32.mrb[27].mxu1  ;;  %v6374_v8 = vadd.f32 %v661_v11, %v6166_v26  ;;  %v663_v55 = vpop.f32.mrb[23].mxu0 }
 0x183   : > { %v6365_v57 = vmax.f32 %v783_v2, 0.0  ;;  %v787_v49 = vadd.f32 %v786_v16, %v6139_v63  ;;  %1279 = vadd.xlane.f32.xlu0 %v1278_v4  ;;  %v6385_v12 = vadd.f32 %v663_v55, %v6169_v27  ;;  %v667_v55 = vpop.f32.mrb[24].mxu0 }
 0x184   : > { %8298 = vst [vmem:[#allocation28_spill] sm:$0xff] %v6359_v6  ;;  %v6371_v7 = vmax.f32 %v785_v17, 0.0  ;;  %v1240_v36 = vmul.f32 %v6359_v6, %v6359_v6  ;;  %v6399_v59 = vadd.f32 %v667_v55, %v6166_v26 }
 0x185   : > { %8299 = vst [vmem:[#allocation29_spill] sm:$0xff] %v6365_v57  ;;  %v6376_v54 = vmax.f32 %v787_v49, 0.0  ;;  %1282 = vadd.xlane.f32.xlu1 %v1281_v44  ;;  %v1188_v16 = vadd.f32 %v6365_v57, %v6359_v6  ;;  %v1241_v20 = vmul.f32 %v6365_v57, %v6365_v57 }
 0x186   : > { %8300 = vst [vmem:[#allocation30_spill] sm:$0xff] %v6371_v7  ;;  %v1242_v60 = vmul.f32 %v6371_v7, %v6371_v7 }
 0x187   : > { %8301 = vst [vmem:[#allocation31_spill] sm:$0xff] %v6376_v54  ;;  %v790_v17 = vpop.f32.mrb[28].mxu1  ;;  %1189 = vadd.xlane.f32.xlu0 %v1188_v16  ;;  %v1191_v1 = vadd.f32 %v6376_v54, %v6371_v7  ;;  %v1243_v2 = vmul.f32 %v6376_v54, %v6376_v54  ;;  %v1284_v11 = vadd.f32 %v1241_v20, %v1240_v36  ;;  %v669_v7 = vpop.f32.mrb[25].mxu0 }
 0x188   : > { %v791_v4 = vadd.f32 %v790_v17, %v6135_v61  ;;  %v792_v48 = vpop.f32.mrb[29].mxu1  ;;  %v671_v36 = vpop.f32.mrb[26].mxu0 }
 0x189   : > { %v793_v49 = vadd.f32 %v792_v48, %v6139_v63  ;;  %v794_v44 = vpop.f32.mrb[30].mxu1  ;;  %1192 = vadd.xlane.f32.xlu1 %v1191_v1  ;;  %v1287_v54 = vadd.f32 %v1243_v2, %v1242_v60  ;;  %v6405_v48 = vadd.f32 %v669_v7, %v6169_v27  ;;  %v6410_v1 = vadd.f32 %v671_v36, %v6166_v26 }
 0x18a   : > { %v6395_v6 = vmax.f32 %v791_v4, 0.0  ;;  %v795_v16 = vadd.f32 %v794_v44, %v6135_v61  ;;  %v796_v57 = vpop.f32.mrb[31].mxu1  ;;  %v673_v61 = vpop.f32.mrb[27].mxu0  ;;  %v6421_v7 = vmax.f32 %v6183_v46, 0.0  ;;  %v6427_v2 = vmax.f32 %v6189_v53, 0.0 }
 0x18b   : > { %v6401_v45 = vmax.f32 %v793_v49, 0.0  ;;  %v797_v17 = vadd.f32 %v796_v57, %v6139_v63  ;;  %1285 = vadd.xlane.f32.xlu0 %v1284_v11  ;;  %v6424_v60 = vadd.f32 %v673_v61, %v6169_v27  ;;  %v677_v46 = vpop.f32.mrb[28].mxu0  ;;  %v6442_v36 = vmax.f32 %v6205_v5, 0.0 }
 0x18c   : > { %8302 = vst [vmem:[#allocation32_spill] sm:$0xff] %v6395_v6  ;;  %v6407_v20 = vmax.f32 %v795_v16, 0.0  ;;  %v1244_v63 = vmul.f32 %v6395_v6, %v6395_v6  ;;  %v6436_v16 = vmax.f32 %v6194_v58, 0.0  ;;  %v679_v53 = vpop.f32.mrb[29].mxu0  ;;  %v929_v5 = vmul.f32 %v6427_v2, %v6427_v2 }
 0x18d   : > { %v6412_v4 = vmax.f32 %v797_v17, 0.0  ;;  %1288 = vadd.xlane.f32.xlu1 %v1287_v54  ;;  %v1194_v49 = vadd.f32 %v6401_v45, %v6395_v6  ;;  %v1245_v57 = vmul.f32 %v6401_v45, %v6401_v45  ;;  %v6439_v17 = vadd.f32 %v677_v46, %v6166_v26 }
 0x18e   : > { %v1246_v44 = vmul.f32 %v6407_v20, %v6407_v20  ;;  %v6447_v6 = vadd.f32 %v679_v53, %v6169_v27  ;;  %v866_v46 = vadd.f32 %v6442_v36, %v6436_v16  ;;  %v931_v53 = vmul.f32 %v6442_v36, %v6442_v36 }
 0x18f   : > { %1195 = vadd.xlane.f32.xlu0 %v1194_v49  ;;  %v1197_v54 = vadd.f32 %v6412_v4, %v6407_v20  ;;  %v1247_v11 = vmul.f32 %v6412_v4, %v6412_v4  ;;  %v1290_v55 = vadd.f32 %v1245_v57, %v1244_v63  ;;  %v863_v49 = vadd.f32 %v6427_v2, %v6421_v7  ;;  %v681_v63 = vpop.f32.mrb[30].mxu0 }
 0x190   : > { %v6450_v57 = vadd.f32 %v681_v63, %v6166_v26  ;;  %v683_v58 = vpop.f32.mrb[31].mxu0  ;;  %v6465_v26 = vmax.f32 %v6225_v34, 0.0  ;;  %v6475_v63 = vmax.f32 %v6241_v51, 0.0  ;;  %v6489_v51 = vmax.f32 %v6261_v28, 0.0 }
 0x191   : > { %1198 = vadd.xlane.f32.xlu1 %v1197_v54  ;;  %v1293_v61 = vadd.f32 %v1247_v11, %v1246_v44  ;;  %v928_v54 = vmul.f32 %v6421_v7, %v6421_v7  ;;  %v6457_v44 = vadd.f32 %v683_v58, %v6169_v27  ;;  %v930_v11 = vmul.f32 %v6436_v16, %v6436_v16 }
 0x192   : > { %v6472_v27 = vmax.f32 %v6230_v39, 0.0  ;;  %v933_v58 = vmul.f32 %v6465_v26, %v6465_v26  ;;  %v6486_v39 = vmax.f32 %v6255_v19, 0.0 }
 0x193   : > { %1291 = vadd.xlane.f32.xlu0 %v1290_v55  ;;  %v6462_v55 = vmax.f32 %v6219_v29, 0.0  ;;  %v963_v29 = vadd.f32 %v931_v53, %v930_v11  ;;  %v935_v11 = vmul.f32 %v6475_v63, %v6475_v63  ;;  %v6496_v53 = vmax.f32 %v6266_v33, 0.0 }
 0x194   : > { %v875_v28 = vadd.f32 %v6489_v51, %v6486_v39  ;;  %v6510_v33 = vmax.f32 %v6291_v23, 0.0 }
 0x195   : > { %1294 = vadd.xlane.f32.xlu1 %v1293_v61  ;;  %v960_v61 = vadd.f32 %v929_v5, %v928_v54  ;;  %v869_v34 = vadd.f32 %v6465_v26, %v6462_v55  ;;  %v934_v54 = vmul.f32 %v6472_v27, %v6472_v27  ;;  %v872_v5 = vadd.f32 %v6475_v63, %v6472_v27 }
 0x197   : > { %864 = vadd.xlane.f32.xlu0 %v863_v49  ;;  %v932_v49 = vmul.f32 %v6462_v55, %v6462_v55  ;;  %v969_v19 = vadd.f32 %v935_v11, %v934_v54  ;;  %v6520_v11 = vmax.f32 %v6302_v52, 0.0  ;;  %v6534_v52 = vmax.f32 %v6327_v13, 0.0 }
 0x199   : > { %867 = vadd.xlane.f32.xlu1 %v866_v46  ;;  %v966_v46 = vadd.f32 %v933_v58, %v932_v49  ;;  %v938_v49 = vmul.f32 %v6496_v53, %v6496_v53  ;;  %8303 = vst [vmem:[#allocation33_spill] sm:$0xff] %v6534_v52 }
 0x19b   : > { %961 = vadd.xlane.f32.xlu0 %v960_v61  ;;  %v6499_v61 = vmax.f32 %v6277_v47, 0.0  ;;  %v6513_v47 = vmax.f32 %v6297_v41, 0.0 }
 0x19d   : > { %964 = vadd.xlane.f32.xlu1 %v963_v29  ;;  %v936_v29 = vmul.f32 %v6486_v39, %v6486_v39  ;;  %v878_v58 = vadd.f32 %v6499_v61, %v6496_v53  ;;  %v939_v54 = vmul.f32 %v6499_v61, %v6499_v61  ;;  %v881_v41 = vadd.f32 %v6513_v47, %v6510_v33 }
 0x19f   : > { %870 = vadd.xlane.f32.xlu0 %v869_v34  ;;  %v937_v34 = vmul.f32 %v6489_v51, %v6489_v51  ;;  %v975_v23 = vadd.f32 %v939_v54, %v938_v49  ;;  %v6544_v54 = vmax.f32 %v6338_v40, 0.0  ;;  %v6558_v40 = vmax.f32 %v6363_v25, 0.0 }
 0x1a1   : > { %873 = vadd.xlane.f32.xlu1 %v872_v5  ;;  %v972_v5 = vadd.f32 %v937_v34, %v936_v29  ;;  %v942_v29 = vmul.f32 %v6520_v11, %v6520_v11  ;;  %8304 = vst [vmem:[#allocation34_spill] sm:$0xff] %v6544_v54  ;;  %8306 = vst [vmem:[#allocation36_spill] sm:$0xff] %v6558_v40 }
 0x1a3   : > { %967 = vadd.xlane.f32.xlu0 %v966_v46  ;;  %v6523_v46 = vmax.f32 %v6313_v3, 0.0  ;;  %v6537_v3 = vmax.f32 %v6333_v62, 0.0 }
 0x1a5   : > { %970 = vadd.xlane.f32.xlu1 %v969_v19  ;;  %v940_v19 = vmul.f32 %v6510_v33, %v6510_v33  ;;  %v884_v34 = vadd.f32 %v6523_v46, %v6520_v11  ;;  %v943_v49 = vmul.f32 %v6523_v46, %v6523_v46  ;;  %v887_v62 = vadd.f32 %v6537_v3, %v6534_v52 }
 0x1a7   : > { %876 = vadd.xlane.f32.xlu0 %v875_v28  ;;  %v941_v28 = vmul.f32 %v6513_v47, %v6513_v47  ;;  %v981_v13 = vadd.f32 %v943_v49, %v942_v29  ;;  %v6568_v49 = vmax.f32 %v6374_v8, 0.0  ;;  %v6582_v8 = vmax.f32 %v6399_v59, 0.0 }
 0x1a9   : > { %879 = vadd.xlane.f32.xlu1 %v878_v58  ;;  %v978_v58 = vadd.f32 %v941_v28, %v940_v19  ;;  %v946_v19 = vmul.f32 %v6544_v54, %v6544_v54  ;;  %8308 = vst [vmem:[#allocation38_spill] sm:$0xff] %v6568_v49  ;;  %8310 = vst [vmem:[#allocation40_spill] sm:$0xff] %v6582_v8 }
 0x1ab   : > { %973 = vadd.xlane.f32.xlu0 %v972_v5  ;;  %v6547_v5 = vmax.f32 %v6349_v30, 0.0  ;;  %v6561_v30 = vmax.f32 %v6369_v10, 0.0 }
 0x1ad   : > { %976 = vadd.xlane.f32.xlu1 %v975_v23  ;;  %8305 = vst [vmem:[#allocation35_spill] sm:$0xff] %v6547_v5  ;;  %v944_v23 = vmul.f32 %v6534_v52, %v6534_v52  ;;  %8307 = vst [vmem:[#allocation37_spill] sm:$0xff] %v6561_v30  ;;  %v890_v28 = vadd.f32 %v6547_v5, %v6544_v54  ;;  %v947_v29 = vmul.f32 %v6547_v5, %v6547_v5  ;;  %v5317_v54 = vld [vmem:[#allocation2] ss:$16 sps:$4 sm:$0xff]  }
 0x1ae   : > { %v893_v10 = vadd.f32 %v6561_v30, %v6558_v40 }
 0x1af   : > { %882 = vadd.xlane.f32.xlu0 %v881_v41  ;;  %v945_v41 = vmul.f32 %v6537_v3, %v6537_v3  ;;  %v987_v25 = vadd.f32 %v947_v29, %v946_v19  ;;  %v6592_v29 = vmax.f32 %v6410_v1, 0.0  ;;  %v6606_v1 = vmax.f32 %v6439_v17, 0.0 }
 0x1b1   : > { %885 = vadd.xlane.f32.xlu1 %v884_v34  ;;  %v984_v34 = vadd.f32 %v945_v41, %v944_v23  ;;  %v950_v23 = vmul.f32 %v6568_v49, %v6568_v49  ;;  %8312 = vst [vmem:[#allocation42_spill] sm:$0xff] %v6592_v29  ;;  %8314 = vst [vmem:[#allocation44_spill] sm:$0xff] %v6606_v1 }
 0x1b3   : > { %979 = vadd.xlane.f32.xlu0 %v978_v58  ;;  %v6571_v58 = vmax.f32 %v6385_v12, 0.0  ;;  %v6585_v12 = vmax.f32 %v6405_v48, 0.0 }
 0x1b5   : > { %982 = vadd.xlane.f32.xlu1 %v981_v13  ;;  %8309 = vst [vmem:[#allocation39_spill] sm:$0xff] %v6571_v58  ;;  %v948_v13 = vmul.f32 %v6558_v40, %v6558_v40  ;;  %8311 = vst [vmem:[#allocation41_spill] sm:$0xff] %v6585_v12  ;;  %v896_v41 = vadd.f32 %v6571_v58, %v6568_v49  ;;  %v951_v19 = vmul.f32 %v6571_v58, %v6571_v58 }
 0x1b6   : > { %v899_v48 = vadd.f32 %v6585_v12, %v6582_v8 }
 0x1b7   : > { %888 = vadd.xlane.f32.xlu0 %v887_v62  ;;  %v949_v62 = vmul.f32 %v6561_v30, %v6561_v30  ;;  %v993_v59 = vadd.f32 %v951_v19, %v950_v23  ;;  %v6616_v19 = vmax.f32 %v6450_v57, 0.0 }
 0x1b9   : > { %891 = vadd.xlane.f32.xlu1 %v890_v28  ;;  %v990_v28 = vadd.f32 %v949_v62, %v948_v13  ;;  %v954_v13 = vmul.f32 %v6592_v29, %v6592_v29  ;;  %8316 = vst [vmem:[#allocation46_spill] sm:$0xff] %v6616_v19 }
 0x1bb   : > { %985 = vadd.xlane.f32.xlu0 %v984_v34  ;;  %v6595_v34 = vmax.f32 %v6424_v60, 0.0  ;;  %v6609_v60 = vmax.f32 %v6447_v6, 0.0 }
 0x1bd   : > { %988 = vadd.xlane.f32.xlu1 %v987_v25  ;;  %8313 = vst [vmem:[#allocation43_spill] sm:$0xff] %v6595_v34  ;;  %v952_v25 = vmul.f32 %v6582_v8, %v6582_v8  ;;  %8315 = vst [vmem:[#allocation45_spill] sm:$0xff] %v6609_v60  ;;  %v902_v62 = vadd.f32 %v6595_v34, %v6592_v29  ;;  %v955_v23 = vmul.f32 %v6595_v34, %v6595_v34 }
 0x1be   : > { %v905_v6 = vadd.f32 %v6609_v60, %v6606_v1 }
 0x1bf   : > { %894 = vadd.xlane.f32.xlu0 %v893_v10  ;;  %v953_v10 = vmul.f32 %v6585_v12, %v6585_v12  ;;  %v999_v17 = vadd.f32 %v955_v23, %v954_v13 }
 0x1c1   : > { %897 = vadd.xlane.f32.xlu1 %v896_v41  ;;  %v996_v41 = vadd.f32 %v953_v10, %v952_v25 }
 0x1c3   : > { %991 = vadd.xlane.f32.xlu0 %v990_v28  ;;  %v6619_v28 = vmax.f32 %v6457_v44, 0.0  ;;  %v958_v44 = vmul.f32 %v6616_v19, %v6616_v19 }
 0x1c5   : > { %994 = vadd.xlane.f32.xlu1 %v993_v59  ;;  %8317 = vst [vmem:[#allocation47_spill] sm:$0xff] %v6619_v28  ;;  %v956_v59 = vmul.f32 %v6606_v1, %v6606_v1  ;;  %v908_v57 = vadd.f32 %v6619_v28, %v6616_v19  ;;  %v959_v25 = vmul.f32 %v6619_v28, %v6619_v28 }
 0x1c7   : > { %900 = vadd.xlane.f32.xlu0 %v899_v48  ;;  %v957_v48 = vmul.f32 %v6609_v60, %v6609_v60  ;;  %v1005_v13 = vadd.f32 %v959_v25, %v958_v44 }
 0x1c9   : > { %903 = vadd.xlane.f32.xlu1 %v902_v62  ;;  %v1002_v10 = vadd.f32 %v957_v48, %v956_v59 }
 0x1cb   : > { %997 = vadd.xlane.f32.xlu0 %v996_v41 }
 0x1cd   : > { %1000 = vadd.xlane.f32.xlu1 %v999_v17 }
 0x1cf   : > { %906 = vadd.xlane.f32.xlu0 %v905_v6 }
 0x1d1   : > { %909 = vadd.xlane.f32.xlu1 %v908_v57 }
 0x1d3   : > { %1003 = vadd.xlane.f32.xlu0 %v1002_v10 }
 0x1d5   : > { %1006 = vadd.xlane.f32.xlu1 %v1005_v13 }
 0x1e4   : > { %v1154_v62 = vpop.xlane.xlu0 %1153 }
 0x1e5   : > { %v1200_v23 = vmul.f32 0.00390625, %v1154_v62 }
 0x1e6   : > { %v1250_v41 = vpop.xlane.xlu1 %1249 }
 0x1e7   : > { %v1296_v17 = vmul.f32 0.00390625, %v1250_v41  ;;  %v1312_v1 = vmul.f32 %v1200_v23, %v1200_v23 }
 0x1e8   : > { %v1157_v6 = vpop.xlane.xlu0 %1156 }
 0x1e9   : > { %v1328_v60 = vsub.f32 %v1296_v17, %v1312_v1  ;;  %v1201_v8 = vmul.f32 0.00390625, %v1157_v6 }
 0x1ea   : > { %v1253_v34 = vpop.xlane.xlu1 %1252 }
 0x1eb   : > { %v1297_v29 = vmul.f32 0.00390625, %v1253_v34  ;;  %v1313_v12 = vmul.f32 %v1201_v8, %v1201_v8  ;;  %v1376_v40 = vadd.f32 1e-05, %v1328_v60 }
 0x1ec   : > { %v1160_v19 = vpop.xlane.xlu0 %1159 }
 0x1ed   : > { %v6633_v58 = vmul.f32 0.00390625, %v1160_v19  ;;  %v1329_v57 = vsub.f32 %v1297_v29, %v1313_v12  ;;  %5525 = vrsqrt.f32 %v1376_v40 }
 0x1ee   : > { %v1163_v59 = vpop.xlane.xlu1 %1162 }
 0x1ef   : > { %v6635_v48 = vmul.f32 0.00390625, %v1163_v59  ;;  %v1377_v44 = vadd.f32 1e-05, %v1329_v57  ;;  %v1314_v10 = vmul.f32 %v6633_v58, %v6633_v58 }
 0x1f0   : > { %v1256_v25 = vpop.xlane.xlu0 %1255 }
 0x1f1   : > { %v1298_v13 = vmul.f32 0.00390625, %v1256_v25  ;;  %5527 = vrsqrt.f32 %v1377_v44  ;;  %v1315_v34 = vmul.f32 %v6635_v48, %v6635_v48 }
 0x1f2   : > { %v1259_v1 = vpop.xlane.xlu1 %1258 }
 0x1f3   : > { %v1330_v62 = vsub.f32 %v1298_v13, %v1314_v10  ;;  %v1299_v60 = vmul.f32 0.00390625, %v1259_v1  ;;  %v1347_v13 = vsub.f32 %v6159_v22, %v1201_v8 }
 0x1f4   : > { %v1166_v19 = vpop.xlane.xlu0 %1165 }
 0x1f5   : > { %v1378_v41 = vadd.f32 1e-05, %v1330_v62  ;;  %v1331_v12 = vsub.f32 %v1299_v60, %v1315_v34  ;;  %v6641_v29 = vmul.f32 0.00390625, %v1166_v19  ;;  %v1344_v19 = vsub.f32 %v6143_v9, %v1200_v23 }
 0x1f6   : > { %v1169_v17 = vpop.xlane.xlu1 %1168 }
 0x1f7   : > { %5529 = vrsqrt.f32 %v1378_v41  ;;  %v1379_v6 = vadd.f32 1e-05, %v1331_v12  ;;  %v6643_v40 = vmul.f32 0.00390625, %v1169_v17  ;;  %v1316_v59 = vmul.f32 %v6641_v29, %v6641_v29  ;;  %v5526_v10 = vpop.eup %5525 }
 0x1f8   : > { %v1262_v57 = vpop.xlane.xlu0 %1261  ;;  %v1345_v41 = vsub.f32 %v6152_v14, %v1200_v23  ;;  %v1346_v12 = vsub.f32 %v6155_v18, %v1201_v8  ;;  %v5320_v23 = vld [vmem:[#allocation2 + $0x8] ss:$16 sps:$4 sm:$0xff]  }
 0x1f9   : > { %5531 = vrsqrt.f32 %v1379_v6  ;;  %v1300_v44 = vmul.f32 0.00390625, %v1262_v57  ;;  %v1317_v62 = vmul.f32 %v6643_v40, %v6643_v40 }
 0x1fa   : > { %v1265_v25 = vpop.xlane.xlu1 %1264  ;;  %v1409_v22 = vmul.f32 %v5526_v10, %v1345_v41  ;;  %v5323_v41 = vld [vmem:[#allocation2 + $0x20] ss:$16 sps:$4 sm:$0xff]  }
 0x1fb   : > { %v1332_v1 = vsub.f32 %v1300_v44, %v1316_v59  ;;  %v1301_v34 = vmul.f32 0.00390625, %v1265_v25  ;;  %v5528_v60 = vpop.eup %5527  ;;  %v1408_v59 = vmul.f32 %v5526_v10, %v1344_v19  ;;  %v1349_v10 = vsub.f32 %v6185_v50, %v6633_v58 }
 0x1fc   : > { %v1172_v17 = vpop.xlane.xlu0 %1171  ;;  %v1411_v49 = vmul.f32 %v5528_v60, %v1347_v13  ;;  %v1410_v44 = vmul.f32 %v5528_v60, %v1346_v12  ;;  %v5325_v13 = vld [vmem:[#allocation2 + $0x24] ss:$16 sps:$4 sm:$0xff]   ;;  %v5326_v12 = vld [vmem:[#allocation2 + $0x28] ss:$16 sps:$4 sm:$0xff]  }
 0x1fd   : > { %v1380_v6 = vadd.f32 1e-05, %v1332_v1  ;;  %v1333_v28 = vsub.f32 %v1301_v34, %v1317_v62  ;;  %v6653_v57 = vmul.f32 0.00390625, %v1172_v17  ;;  %v5328_v62 = vld [vmem:[#allocation2 + $0x2c] ss:$16 sps:$4 sm:$0xff]  }
 0x1fe   : > { %v1175_v30 = vpop.xlane.xlu1 %1174  ;;  %v1521_v5 = vpack.c.bf16 %v1411_v49, %v1409_v22  ;;  %v1520_v14 = vpack.c.bf16 %v1410_v44, %v1408_v59  ;;  %v1351_v49 = vsub.f32 %v6196_v0, %v6635_v48  ;;  %v5331_v44 = vld [vmem:[#allocation2 + $0x44] ss:$16 sps:$4 sm:$0xff]  }
 0x1ff   : > { %5533 = vrsqrt.f32 %v1380_v6  ;;  %v1381_v52 = vadd.f32 1e-05, %v1333_v28  ;;  %v6655_v25 = vmul.f32 0.00390625, %v1175_v30  ;;  %v1318_v8 = vmul.f32 %v6653_v57, %v6653_v57 }
 0x200   : > { %v1268_v9 = vpop.xlane.xlu0 %1267  ;;  %v1350_v30 = vsub.f32 %v6191_v56, %v6635_v48  ;;  %2065 = vmatprep.mubr.bf16.mxu1 %v1521_v5  ;;  %1952 = vmatprep.mubr.bf16.mxu0 %v1521_v5 }
 0x201   : > { %v5530_v18 = vpop.eup %5529  ;;  %5535 = vrsqrt.f32 %v1381_v52  ;;  %v1302_v1 = vmul.f32 0.00390625, %v1268_v9  ;;  %v1348_v52 = vsub.f32 %v6179_v43, %v6633_v58  ;;  %1953 = vmatmul.mubr.bf16.vlgmr.msra.gmra.mrb[32].mxu0 %v1520_v14  ;;  %2066 = vmatmul.mubr.bf16.vlgmr.msra.gmra.mrb[32].mxu1 %v1520_v14  ;;  %v1319_v19 = vmul.f32 %v6655_v25, %v6655_v25  ;;  %v5334_v9 = vld [vmem:[#allocation2 + $0x4c] ss:$16 sps:$4 sm:$0xff]  }
 0x202   : > { %v1271_v28 = vpop.xlane.xlu1 %1270  ;;  %2467 = vmatpush1.bf16.msra.mxu0 %v5317_v54  ;;  %2580 = vmatpush1.bf16.msra.mxu1 %v5320_v23  ;;  %v1413_v0 = vmul.f32 %v5530_v18, %v1349_v10  ;;  %v5332_v10 = vld [vmem:[#allocation2 + $0x48] ss:$16 sps:$4 sm:$0xff]  }
 0x203   : > { %v5532_v34 = vpop.eup %5531  ;;  %v1334_v60 = vsub.f32 %v1302_v1, %v1318_v8  ;;  %v1303_v50 = vmul.f32 0.00390625, %v1271_v28  ;;  %2468 = vmatprep.subr.bf16.mxu0 %v5325_v13  ;;  %2581 = vmatprep.subr.bf16.mxu1 %v5328_v62  ;;  %v1412_v43 = vmul.f32 %v5530_v18, %v1348_v52  ;;  %v5329_v1 = vld [vmem:[#allocation2 + $0x40] ss:$16 sps:$4 sm:$0xff]   ;;  %v5337_v62 = vld [vmem:[#allocation2 + $0x64] ss:$16 sps:$4 sm:$0xff]   ;;  %v1353_v28 = vsub.f32 %v6221_v31, %v6641_v29 }
 0x204   : > { %v1178_v56 = vpop.xlane.xlu0 %1177  ;;  %v1415_v48 = vmul.f32 %v5532_v34, %v1351_v49  ;;  %v1414_v5 = vmul.f32 %v5532_v34, %v1350_v30  ;;  %v5340_v49 = vld [vmem:[#allocation2 + $0x6c] ss:$16 sps:$4 sm:$0xff]   ;;  %v1354_v34 = vsub.f32 %v6227_v38, %v6643_v40  ;;  %v1355_v52 = vsub.f32 %v6232_v42, %v6643_v40 }
 0x205   : > { %v1382_v17 = vadd.f32 1e-05, %v1334_v60  ;;  %v1335_v6 = vsub.f32 %v1303_v50, %v1319_v19  ;;  %v6669_v22 = vmul.f32 0.00390625, %v1178_v56  ;;  %v1352_v50 = vsub.f32 %v6215_v24, %v6641_v29 }
 0x206   : > { %v1181_v58 = vpop.xlane.xlu1 %1180  ;;  %v1523_v59 = vpack.c.bf16 %v1415_v48, %v1413_v0  ;;  %v1522_v14 = vpack.c.bf16 %v1414_v5, %v1412_v43  ;;  %2469 = vmatpush1.bf16.msra.mxu0 %v5323_v41  ;;  %2582 = vmatpush1.bf16.msra.mxu1 %v5326_v12  ;;  %v5335_v12 = vld [vmem:[#allocation2 + $0x60] ss:$16 sps:$4 sm:$0xff]   ;;  %v5338_v0 = vld [vmem:[#allocation2 + $0x68] ss:$16 sps:$4 sm:$0xff]  }
 0x207   : > { %5537 = vrsqrt.f32 %v1382_v17  ;;  %v1383_v54 = vadd.f32 1e-05, %v1335_v6  ;;  %v6671_v23 = vmul.f32 0.00390625, %v1181_v58  ;;  %v1320_v18 = vmul.f32 %v6669_v22, %v6669_v22  ;;  %2470 = vmatprep.subr.bf16.mxu0 %v5331_v44  ;;  %2583 = vmatprep.subr.bf16.mxu1 %v5334_v9  ;;  %v5343_v58 = vld [vmem:[#allocation2 + $0x84] ss:$16 sps:$4 sm:$0xff]  }
 0x208   : > { %v1274_v8 = vpop.xlane.xlu0 %1273  ;;  %2075 = vmatprep.mubr.bf16.mxu1 %v1523_v59  ;;  %1962 = vmatprep.mubr.bf16.mxu0 %v1523_v59  ;;  %v5346_v59 = vld [vmem:[#allocation2 + $0x8c] ss:$16 sps:$4 sm:$0xff]  }
 0x209   : > { %v5534_v30 = vpop.eup %5533  ;;  %5539 = vrsqrt.f32 %v1383_v54  ;;  %v1304_v13 = vmul.f32 0.00390625, %v1274_v8  ;;  %1963 = vmatmul.mubr.bf16.gmra.mrb[36].mxu0 %v1522_v14  ;;  %2076 = vmatmul.mubr.bf16.gmra.mrb[36].mxu1 %v1522_v14  ;;  %v1321_v41 = vmul.f32 %v6671_v23, %v6671_v23  ;;  %v5341_v8 = vld [vmem:[#allocation2 + $0x80] ss:$16 sps:$4 sm:$0xff]  }
 0x20a   : > { %v1277_v60 = vpop.xlane.xlu1 %1276  ;;  %2471 = vmatpush1.bf16.msra.mxu0 %v5329_v1  ;;  %2584 = vmatpush1.bf16.msra.mxu1 %v5332_v10  ;;  %v1417_v42 = vmul.f32 %v5534_v30, %v1353_v28  ;;  %v1416_v24 = vmul.f32 %v5534_v30, %v1352_v50  ;;  %v5344_v1 = vld [vmem:[#allocation2 + $0x88] ss:$16 sps:$4 sm:$0xff]   ;;  %v1358_v28 = vsub.f32 %v6263_v32, %v6655_v25 }
 0x20b   : > { %v5536_v19 = vpop.eup %5535  ;;  %v1336_v56 = vsub.f32 %v1304_v13, %v1320_v18  ;;  %v1305_v31 = vmul.f32 0.00390625, %v1277_v60  ;;  %2472 = vmatprep.subr.bf16.mxu0 %v5337_v62  ;;  %2585 = vmatprep.subr.bf16.mxu1 %v5340_v49  ;;  %v5349_v13 = vld [vmem:[#allocation2 + $0xa4] ss:$16 sps:$4 sm:$0xff]   ;;  %v5352_v62 = vld [vmem:[#allocation2 + $0xac] ss:$16 sps:$4 sm:$0xff]   ;;  %v1357_v49 = vsub.f32 %v6257_v21, %v6653_v57 }
 0x20c   : > { %v1184_v38 = vpop.xlane.xlu0 %1183  ;;  %v1419_v40 = vmul.f32 %v5536_v19, %v1355_v52  ;;  %v1418_v48 = vmul.f32 %v5536_v19, %v1354_v34  ;;  %v1359_v34 = vsub.f32 %v6268_v37, %v6655_v25  ;;  %v1356_v19 = vsub.f32 %v6251_v15, %v6653_v57 }
 0x20d   : > { %v1384_v5 = vadd.f32 1e-05, %v1336_v56  ;;  %v1337_v17 = vsub.f32 %v1305_v31, %v1321_v41  ;;  %v6685_v6 = vmul.f32 0.00390625, %v1184_v38  ;;  %v5347_v41 = vld [vmem:[#allocation2 + $0xa0] ss:$16 sps:$4 sm:$0xff]  }
 0x20e   : > { %v1187_v29 = vpop.xlane.xlu1 %1186  ;;  %v1525_v43 = vpack.c.bf16 %v1419_v40, %v1417_v42  ;;  %v1524_v9 = vpack.c.bf16 %v1418_v48, %v1416_v24  ;;  %2473 = vmatpush1.bf16.msra.mxu0 %v5335_v12  ;;  %2586 = vmatpush1.bf16.msra.mxu1 %v5338_v0  ;;  %v5350_v31 = vld [vmem:[#allocation2 + $0xa8] ss:$16 sps:$4 sm:$0xff]   ;;  %v5355_v48 = vld [vmem:[#allocation2 + $0xc4] ss:$16 sps:$4 sm:$0xff]  }
 0x20f   : > { %5541 = vrsqrt.f32 %v1384_v5  ;;  %v1385_v44 = vadd.f32 1e-05, %v1337_v17  ;;  %v6687_v54 = vmul.f32 0.00390625, %v1187_v29  ;;  %v1322_v30 = vmul.f32 %v6685_v6, %v6685_v6  ;;  %2474 = vmatprep.subr.bf16.mxu0 %v5343_v58  ;;  %2587 = vmatprep.subr.bf16.mxu1 %v5346_v59  ;;  %v5358_v5 = vld [vmem:[#allocation2 + $0xcc] ss:$16 sps:$4 sm:$0xff]  }
 0x210   : > { %v1280_v14 = vpop.xlane.xlu0 %1279  ;;  %2085 = vmatprep.mubr.bf16.mxu1 %v1525_v43  ;;  %1972 = vmatprep.mubr.bf16.mxu0 %v1525_v43  ;;  %v5353_v58 = vld [vmem:[#allocation2 + $0xc0] ss:$16 sps:$4 sm:$0xff]   ;;  %v5356_v59 = vld [vmem:[#allocation2 + $0xc8] ss:$16 sps:$4 sm:$0xff]  }
 0x211   : > { %v5538_v10 = vpop.eup %5537  ;;  %5543 = vrsqrt.f32 %v1385_v44  ;;  %v1306_v18 = vmul.f32 0.00390625, %v1280_v14  ;;  %1973 = vmatmul.mubr.bf16.gmra.mrb[40].mxu0 %v1524_v9  ;;  %2086 = vmatmul.mubr.bf16.gmra.mrb[40].mxu1 %v1524_v9  ;;  %v1323_v56 = vmul.f32 %v6687_v54, %v6687_v54 }
 0x212   : > { %v1283_v52 = vpop.xlane.xlu1 %1282  ;;  %2475 = vmatpush1.bf16.msra.mxu0 %v5341_v8  ;;  %2588 = vmatpush1.bf16.msra.mxu1 %v5344_v1  ;;  %v1421_v37 = vmul.f32 %v5538_v10, %v1357_v49  ;;  %v1420_v15 = vmul.f32 %v5538_v10, %v1356_v19  ;;  %v5361_v8 = vld [vmem:[#allocation2 + $0xe4] ss:$16 sps:$4 sm:$0xff]   ;;  %v5364_v1 = vld [vmem:[#allocation2 + $0xec] ss:$16 sps:$4 sm:$0xff]   ;;  %v1361_v10 = vsub.f32 %v6293_v35, %v6669_v22 }
 0x213   : > { %v5540_v60 = vpop.eup %5539  ;;  %v1338_v50 = vsub.f32 %v1306_v18, %v1322_v30  ;;  %v1307_v21 = vmul.f32 0.00390625, %v1283_v52  ;;  %2476 = vmatprep.subr.bf16.mxu0 %v5349_v13  ;;  %2589 = vmatprep.subr.bf16.mxu1 %v5352_v62  ;;  %v8318_v30 = vld [vmem:[#allocation22_spill] sm:$0xff]  ;;  %v8319_v13 = vld [vmem:[#allocation23_spill] sm:$0xff] }
 0x214   : > { %v1190_v32 = vpop.xlane.xlu0 %1189  ;;  %v1423_v25 = vmul.f32 %v5540_v60, %v1359_v34  ;;  %v1422_v38 = vmul.f32 %v5540_v60, %v1358_v28  ;;  %v1362_v18 = vsub.f32 %v8318_v30, %v6671_v23  ;;  %v1363_v62 = vsub.f32 %v8319_v13, %v6671_v23  ;;  %v8320_v34 = vld [vmem:[#allocation21_spill] sm:$0xff]  ;;  %v8323_v30 = vld [vmem:[#allocation27_spill] sm:$0xff] }
 0x215   : > { %v1386_v12 = vadd.f32 1e-05, %v1338_v50  ;;  %v1339_v0 = vsub.f32 %v1307_v21, %v1323_v56  ;;  %v6701_v42 = vmul.f32 0.00390625, %v1190_v32  ;;  %v1360_v52 = vsub.f32 %v8320_v34, %v6669_v22  ;;  %v5359_v56 = vld [vmem:[#allocation2 + $0xe0] ss:$16 sps:$4 sm:$0xff]  }
 0x216   : > { %v1193_v57 = vpop.xlane.xlu1 %1192  ;;  %v1527_v40 = vpack.c.bf16 %v1423_v25, %v1421_v37  ;;  %v1526_v24 = vpack.c.bf16 %v1422_v38, %v1420_v15  ;;  %2477 = vmatpush1.bf16.msra.mxu0 %v5347_v41  ;;  %2590 = vmatpush1.bf16.msra.mxu1 %v5350_v31  ;;  %v5362_v21 = vld [vmem:[#allocation2 + $0xe8] ss:$16 sps:$4 sm:$0xff]   ;;  %v5370_v15 = vld [vmem:[#allocation2 + $0x10c] ss:$16 sps:$4 sm:$0xff]  }
 0x217   : > { %5545 = vrsqrt.f32 %v1386_v12  ;;  %v1387_v17 = vadd.f32 1e-05, %v1339_v0  ;;  %v6703_v29 = vmul.f32 0.00390625, %v1193_v57  ;;  %v1324_v9 = vmul.f32 %v6701_v42, %v6701_v42  ;;  %2478 = vmatprep.subr.bf16.mxu0 %v5355_v48  ;;  %2591 = vmatprep.subr.bf16.mxu1 %v5358_v5  ;;  %v5367_v0 = vld [vmem:[#allocation2 + $0x104] ss:$16 sps:$4 sm:$0xff]  }
 0x218   : > { %v1286_v43 = vpop.xlane.xlu0 %1285  ;;  %2095 = vmatprep.mubr.bf16.mxu1 %v1527_v40  ;;  %1982 = vmatprep.mubr.bf16.mxu0 %v1527_v40 }
 0x219   : > { %v5542_v44 = vpop.eup %5541  ;;  %5547 = vrsqrt.f32 %v1387_v17  ;;  %v1308_v14 = vmul.f32 0.00390625, %v1286_v43  ;;  %1983 = vmatmul.mubr.bf16.gmra.mrb[44].mxu0 %v1526_v24  ;;  %2096 = vmatmul.mubr.bf16.gmra.mrb[44].mxu1 %v1526_v24  ;;  %v1325_v19 = vmul.f32 %v6703_v29, %v6703_v29  ;;  %v5365_v17 = vld [vmem:[#allocation2 + $0x100] ss:$16 sps:$4 sm:$0xff]   ;;  %v5368_v24 = vld [vmem:[#allocation2 + $0x108] ss:$16 sps:$4 sm:$0xff]  }
 0x21a   : > { %v1289_v49 = vpop.xlane.xlu1 %1288  ;;  %2479 = vmatpush1.bf16.msra.mxu0 %v5353_v58  ;;  %2592 = vmatpush1.bf16.msra.mxu1 %v5356_v59  ;;  %v1425_v23 = vmul.f32 %v5542_v44, %v1361_v10  ;;  %v1424_v22 = vmul.f32 %v5542_v44, %v1360_v52  ;;  %v5373_v44 = vld [vmem:[#allocation2 + $0x124] ss:$16 sps:$4 sm:$0xff]  }
 0x21b   : > { %v5544_v28 = vpop.eup %5543  ;;  %v1340_v60 = vsub.f32 %v1308_v14, %v1324_v9  ;;  %v1309_v35 = vmul.f32 0.00390625, %v1289_v49  ;;  %2480 = vmatprep.subr.bf16.mxu0 %v5361_v8  ;;  %2593 = vmatprep.subr.bf16.mxu1 %v5364_v1  ;;  %v5376_v9 = vld [vmem:[#allocation2 + $0x12c] ss:$16 sps:$4 sm:$0xff]   ;;  %v8322_v1 = vld [vmem:[#allocation26_spill] sm:$0xff]  ;;  %v8324_v49 = vld [vmem:[#allocation24_spill] sm:$0xff] }
 0x21c   : > { %v1196_v50 = vpop.xlane.xlu0 %1195  ;;  %v1427_v32 = vmul.f32 %v5544_v28, %v1363_v62  ;;  %v1426_v41 = vmul.f32 %v5544_v28, %v1362_v18  ;;  %v8321_v14 = vld [vmem:[#allocation25_spill] sm:$0xff]  ;;  %v1366_v10 = vsub.f32 %v8322_v1, %v6687_v54  ;;  %v1367_v18 = vsub.f32 %v8323_v30, %v6687_v54  ;;  %v8327_v1 = vld [vmem:[#allocation31_spill] sm:$0xff] }
 0x21d   : > { %v1388_v31 = vadd.f32 1e-05, %v1340_v60  ;;  %v1341_v37 = vsub.f32 %v1309_v35, %v1325_v19  ;;  %v6717_v25 = vmul.f32 0.00390625, %v1196_v50  ;;  %v1365_v8 = vsub.f32 %v8321_v14, %v6685_v6  ;;  %v5371_v19 = vld [vmem:[#allocation2 + $0x120] ss:$16 sps:$4 sm:$0xff]  }
 0x21e   : > { %v1199_v38 = vpop.xlane.xlu1 %1198  ;;  %v1529_v12 = vpack.c.bf16 %v1427_v32, %v1425_v23  ;;  %v1528_v40 = vpack.c.bf16 %v1426_v41, %v1424_v22  ;;  %2481 = vmatpush1.bf16.msra.mxu0 %v5359_v56  ;;  %2594 = vmatpush1.bf16.msra.mxu1 %v5362_v21  ;;  %v1364_v28 = vsub.f32 %v8324_v49, %v6685_v6  ;;  %v5374_v50 = vld [vmem:[#allocation2 + $0x128] ss:$16 sps:$4 sm:$0xff]   ;;  %v5379_v22 = vld [vmem:[#allocation2 + $0x144] ss:$16 sps:$4 sm:$0xff]  }
 0x21f   : > { %5549 = vrsqrt.f32 %v1388_v31  ;;  %v1389_v57 = vadd.f32 1e-05, %v1341_v37  ;;  %v6719_v48 = vmul.f32 0.00390625, %v1199_v38  ;;  %v1326_v58 = vmul.f32 %v6717_v25, %v6717_v25  ;;  %2482 = vmatprep.subr.bf16.mxu0 %v5367_v0  ;;  %2595 = vmatprep.subr.bf16.mxu1 %v5370_v15  ;;  %v5382_v38 = vld [vmem:[#allocation2 + $0x14c] ss:$16 sps:$4 sm:$0xff]   ;;  %v8326_v14 = vld [vmem:[#allocation30_spill] sm:$0xff] }
 0x220   : > { %v1292_v5 = vpop.xlane.xlu0 %1291  ;;  %2105 = vmatprep.mubr.bf16.mxu1 %v1529_v12  ;;  %1992 = vmatprep.mubr.bf16.mxu0 %v1529_v12 }
 0x221   : > { %v5546_v43 = vpop.eup %5545  ;;  %5551 = vrsqrt.f32 %v1389_v57  ;;  %v1310_v59 = vmul.f32 0.00390625, %v1292_v5  ;;  %1993 = vmatmul.mubr.bf16.gmra.mrb[48].mxu0 %v1528_v40  ;;  %2106 = vmatmul.mubr.bf16.gmra.mrb[48].mxu1 %v1528_v40  ;;  %v1327_v52 = vmul.f32 %v6719_v48, %v6719_v48  ;;  %v5377_v57 = vld [vmem:[#allocation2 + $0x140] ss:$16 sps:$4 sm:$0xff]   ;;  %v5380_v5 = vld [vmem:[#allocation2 + $0x148] ss:$16 sps:$4 sm:$0xff]  }
 0x222   : > { %v1295_v13 = vpop.xlane.xlu1 %1294  ;;  %2483 = vmatpush1.bf16.msra.mxu0 %v5365_v17  ;;  %2596 = vmatpush1.bf16.msra.mxu1 %v5368_v24  ;;  %v1429_v54 = vmul.f32 %v5546_v43, %v1365_v8  ;;  %v1428_v6 = vmul.f32 %v5546_v43, %v1364_v28  ;;  %v1370_v8 = vsub.f32 %v8326_v14, %v6703_v29 }
 0x223   : > { %v5548_v62 = vpop.eup %5547  ;;  %v1342_v34 = vsub.f32 %v1310_v59, %v1326_v58  ;;  %v1311_v60 = vmul.f32 0.00390625, %v1295_v13  ;;  %2484 = vmatprep.subr.bf16.mxu0 %v5373_v44  ;;  %2597 = vmatprep.subr.bf16.mxu1 %v5376_v9  ;;  %v5385_v58 = vld [vmem:[#allocation2 + $0x164] ss:$16 sps:$4 sm:$0xff]   ;;  %v5388_v59 = vld [vmem:[#allocation2 + $0x16c] ss:$16 sps:$4 sm:$0xff]  }
 0x224   : > { %v865_v35 = vpop.xlane.xlu0 %864  ;;  %v1431_v56 = vmul.f32 %v5548_v62, %v1367_v18  ;;  %v1430_v21 = vmul.f32 %v5548_v62, %v1366_v10  ;;  %v8325_v44 = vld [vmem:[#allocation29_spill] sm:$0xff]  ;;  %v1371_v10 = vsub.f32 %v8327_v1, %v6703_v29  ;;  %v8328_v13 = vld [vmem:[#allocation28_spill] sm:$0xff] }
 0x225   : > { %v1390_v23 = vadd.f32 1e-05, %v1342_v34  ;;  %v1343_v32 = vsub.f32 %v1311_v60, %v1327_v52  ;;  %v6733_v41 = vmul.f32 0.00390625, %v865_v35  ;;  %v1369_v9 = vsub.f32 %v8325_v44, %v6701_v42  ;;  %v5383_v52 = vld [vmem:[#allocation2 + $0x160] ss:$16 sps:$4 sm:$0xff]  }
 0x226   : > { %v868_v31 = vpop.xlane.xlu1 %867  ;;  %v1531_v37 = vpack.c.bf16 %v1431_v56, %v1429_v54  ;;  %v1530_v0 = vpack.c.bf16 %v1430_v21, %v1428_v6  ;;  %2485 = vmatpush1.bf16.msra.mxu0 %v5371_v19  ;;  %2598 = vmatpush1.bf16.msra.mxu1 %v5374_v50  ;;  %v1368_v62 = vsub.f32 %v8328_v13, %v6701_v42  ;;  %v5386_v19 = vld [vmem:[#allocation2 + $0x168] ss:$16 sps:$4 sm:$0xff]   ;;  %v5391_v6 = vld [vmem:[#allocation2 + $0x184] ss:$16 sps:$4 sm:$0xff]  }
 0x227   : > { %5553 = vrsqrt.f32 %v1390_v23  ;;  %v1391_v12 = vadd.f32 1e-05, %v1343_v32  ;;  %v6735_v15 = vmul.f32 0.00390625, %v868_v31  ;;  %v1024_v24 = vmul.f32 %v6733_v41, %v6733_v41  ;;  %2486 = vmatprep.subr.bf16.mxu0 %v5379_v22  ;;  %2599 = vmatprep.subr.bf16.mxu1 %v5382_v38  ;;  %v5394_v31 = vld [vmem:[#allocation2 + $0x18c] ss:$16 sps:$4 sm:$0xff]  }
 0x228   : > { %v962_v40 = vpop.xlane.xlu0 %961  ;;  %2002 = vmatprep.mubr.bf16.mxu0 %v1531_v37  ;;  %2115 = vmatprep.mubr.bf16.mxu1 %v1531_v37  ;;  %v1375_v44 = vsub.f32 %v6412_v4, %v6719_v48  ;;  %v5398_v13 = vld [vmem:[#allocation2 + $0x1a8] ss:$16 sps:$4 sm:$0xff]  }
 0x229   : > { %v5550_v17 = vpop.eup %5549  ;;  %5555 = vrsqrt.f32 %v1391_v12  ;;  %v1008_v43 = vmul.f32 0.00390625, %v962_v40  ;;  %2003 = vmatmul.mubr.bf16.gmra.mrb[52].mxu0 %v1530_v0  ;;  %2116 = vmatmul.mubr.bf16.gmra.mrb[52].mxu1 %v1530_v0  ;;  %v1025_v28 = vmul.f32 %v6735_v15, %v6735_v15  ;;  %v5389_v12 = vld [vmem:[#allocation2 + $0x180] ss:$16 sps:$4 sm:$0xff]  }
 0x22a   : > { %v965_v30 = vpop.xlane.xlu1 %964  ;;  %2487 = vmatpush1.bf16.msra.mxu0 %v5377_v57  ;;  %2600 = vmatpush1.bf16.msra.mxu1 %v5380_v5  ;;  %v1433_v29 = vmul.f32 %v5550_v17, %v1369_v9  ;;  %v1432_v42 = vmul.f32 %v5550_v17, %v1368_v62  ;;  %v5392_v57 = vld [vmem:[#allocation2 + $0x188] ss:$16 sps:$4 sm:$0xff]  }
 0x22b   : > { %v5552_v18 = vpop.eup %5551  ;;  %v1040_v49 = vsub.f32 %v1008_v43, %v1024_v24  ;;  %v1009_v34 = vmul.f32 0.00390625, %v965_v30  ;;  %2488 = vmatprep.subr.bf16.mxu0 %v5385_v58  ;;  %2601 = vmatprep.subr.bf16.mxu1 %v5388_v59  ;;  %v5397_v24 = vld [vmem:[#allocation2 + $0x1a4] ss:$16 sps:$4 sm:$0xff]   ;;  %v5400_v43 = vld [vmem:[#allocation2 + $0x1ac] ss:$16 sps:$4 sm:$0xff]   ;;  %v1373_v58 = vsub.f32 %v6401_v45, %v6717_v25  ;;  %v1374_v59 = vsub.f32 %v6407_v20, %v6719_v48 }
 0x22c   : > { %v871_v60 = vpop.xlane.xlu0 %870  ;;  %v1435_v35 = vmul.f32 %v5552_v18, %v1371_v10  ;;  %v1434_v50 = vmul.f32 %v5552_v18, %v1370_v8  ;;  %v8329_v8 = vld [vmem:[#allocation32_spill] sm:$0xff] }
 0x22d   : > { %v1088_v54 = vadd.f32 1e-05, %v1040_v49  ;;  %v1041_v56 = vsub.f32 %v1009_v34, %v1025_v28  ;;  %v6749_v21 = vmul.f32 0.00390625, %v871_v60  ;;  %v1372_v1 = vsub.f32 %v8329_v8, %v6717_v25  ;;  %v5395_v20 = vld [vmem:[#allocation2 + $0x1a0] ss:$16 sps:$4 sm:$0xff]  }
 0x22e   : > { %v874_v23 = vpop.xlane.xlu1 %873  ;;  %v1533_v32 = vpack.c.bf16 %v1435_v35, %v1433_v29  ;;  %v1532_v22 = vpack.c.bf16 %v1434_v50, %v1432_v42  ;;  %2489 = vmatpush1.bf16.msra.mxu0 %v5383_v52  ;;  %2602 = vmatpush1.bf16.msra.mxu1 %v5386_v19  ;;  %v5403_v19 = vld [vmem:[#allocation2 + $0x1c4] ss:$16 sps:$4 sm:$0xff]   ;;  %v5406_v29 = vld [vmem:[#allocation2 + $0x1cc] ss:$16 sps:$4 sm:$0xff]  }
 0x22f   : > { %5557 = vrsqrt.f32 %v1088_v54  ;;  %v1089_v37 = vadd.f32 1e-05, %v1041_v56  ;;  %v6751_v38 = vmul.f32 0.00390625, %v874_v23  ;;  %v1026_v5 = vmul.f32 %v6749_v21, %v6749_v21  ;;  %2490 = vmatprep.subr.bf16.mxu0 %v5391_v6  ;;  %2603 = vmatprep.subr.bf16.mxu1 %v5394_v31  ;;  %v5401_v56 = vld [vmem:[#allocation2 + $0x1c0] ss:$16 sps:$4 sm:$0xff]  }
 0x230   : > { %v968_v0 = vpop.xlane.xlu0 %967  ;;  %2012 = vmatprep.mubr.bf16.mxu0 %v1533_v32  ;;  %2125 = vmatprep.mubr.bf16.mxu1 %v1533_v32  ;;  %v5404_v23 = vld [vmem:[#allocation2 + $0x1c8] ss:$16 sps:$4 sm:$0xff]  }
 0x231   : > { %v5554_v40 = vpop.eup %5553  ;;  %5559 = vrsqrt.f32 %v1089_v37  ;;  %v1010_v17 = vmul.f32 0.00390625, %v968_v0  ;;  %2013 = vmatmul.mubr.bf16.gmra.mrb[56].mxu0 %v1532_v22  ;;  %2126 = vmatmul.mubr.bf16.gmra.mrb[56].mxu1 %v1532_v22  ;;  %v1027_v30 = vmul.f32 %v6751_v38, %v6751_v38  ;;  %v5409_v37 = vld [vmem:[#allocation2 + $0x1e4] ss:$16 sps:$4 sm:$0xff]   ;;  %v5412_v22 = vld [vmem:[#allocation2 + $0x1ec] ss:$16 sps:$4 sm:$0xff]   ;;  %v1058_v0 = vsub.f32 %v6436_v16, %v6735_v15 }
 0x232   : > { %v971_v9 = vpop.xlane.xlu1 %970  ;;  %2491 = vmatpush1.bf16.msra.mxu0 %v5389_v12  ;;  %2604 = vmatpush1.bf16.msra.mxu1 %v5392_v57  ;;  %v1437_v4 = vmul.f32 %v5554_v40, %v1373_v58  ;;  %v1436_v25 = vmul.f32 %v5554_v40, %v1372_v1  ;;  %v1057_v12 = vsub.f32 %v6427_v2, %v6733_v41  ;;  %v5407_v16 = vld [vmem:[#allocation2 + $0x1e0] ss:$16 sps:$4 sm:$0xff]  }
 0x233   : > { %v5556_v14 = vpop.eup %5555  ;;  %v1042_v10 = vsub.f32 %v1010_v17, %v1026_v5  ;;  %v1011_v45 = vmul.f32 0.00390625, %v971_v9  ;;  %2492 = vmatprep.subr.bf16.mxu0 %v5397_v24  ;;  %2605 = vmatprep.subr.bf16.mxu1 %v5400_v43  ;;  %v1059_v57 = vsub.f32 %v6442_v36, %v6735_v15  ;;  %v1056_v17 = vsub.f32 %v6421_v7, %v6733_v41 }
 0x234   : > { %v877_v18 = vpop.xlane.xlu0 %876  ;;  %v1439_v48 = vmul.f32 %v5556_v14, %v1375_v44  ;;  %v1438_v62 = vmul.f32 %v5556_v14, %v1374_v59  ;;  %v5410_v59 = vld [vmem:[#allocation2 + $0x1e8] ss:$16 sps:$4 sm:$0xff]  }
 0x235   : > { %v1090_v49 = vadd.f32 1e-05, %v1042_v10  ;;  %v1043_v28 = vsub.f32 %v1011_v45, %v1027_v30  ;;  %v6765_v34 = vmul.f32 0.00390625, %v877_v18 }
 0x236   : > { %v880_v52 = vpop.xlane.xlu1 %879  ;;  %v1535_v60 = vpack.c.bf16 %v1439_v48, %v1437_v4  ;;  %v1534_v50 = vpack.c.bf16 %v1438_v62, %v1436_v25  ;;  %2493 = vmatpush1.bf16.msra.mxu0 %v5395_v20  ;;  %2606 = vmatpush1.bf16.msra.mxu1 %v5398_v13  ;;  %v1061_v48 = vsub.f32 %v6465_v26, %v6749_v21 }
 0x237   : > { %5561 = vrsqrt.f32 %v1090_v49  ;;  %v1091_v35 = vadd.f32 1e-05, %v1043_v28  ;;  %v6767_v54 = vmul.f32 0.00390625, %v880_v52  ;;  %v1028_v6 = vmul.f32 %v6765_v34, %v6765_v34  ;;  %2494 = vmatprep.subr.bf16.mxu0 %v5403_v19  ;;  %2607 = vmatprep.subr.bf16.mxu1 %v5406_v29 }
 0x238   : > { %v974_v42 = vpop.xlane.xlu0 %973  ;;  %2022 = vmatprep.mubr.bf16.mxu0 %v1535_v60  ;;  %2135 = vmatprep.mubr.bf16.mxu1 %v1535_v60  ;;  %v1062_v62 = vsub.f32 %v6472_v27, %v6751_v38  ;;  %v1063_v49 = vsub.f32 %v6475_v63, %v6751_v38  ;;  %v1060_v52 = vsub.f32 %v6462_v55, %v6749_v21 }
 0x239   : > { %v5558_v32 = vpop.eup %5557  ;;  %5563 = vrsqrt.f32 %v1091_v35  ;;  %v1012_v31 = vmul.f32 0.00390625, %v974_v42  ;;  %2023 = vmatmul.mubr.bf16.gmra.mrb[60].mxu0 %v1534_v50  ;;  %2136 = vmatmul.mubr.bf16.gmra.mrb[60].mxu1 %v1534_v50  ;;  %v1029_v43 = vmul.f32 %v6767_v54, %v6767_v54 }
 0x23a   : > { %v977_v40 = vpop.xlane.xlu1 %976  ;;  %2495 = vmatpush1.bf16.msra.mxu0 %v5401_v56  ;;  %2608 = vmatpush1.bf16.msra.mxu1 %v5404_v23  ;;  %v1121_v36 = vmul.f32 %v5558_v32, %v1057_v12  ;;  %v1120_v7 = vmul.f32 %v5558_v32, %v1056_v17 }
 0x23b   : > { %v5560_v5 = vpop.eup %5559  ;;  %v1044_v24 = vsub.f32 %v1012_v31, %v1028_v6  ;;  %v1013_v2 = vmul.f32 0.00390625, %v977_v40  ;;  %2496 = vmatprep.subr.bf16.mxu0 %v5409_v37  ;;  %2609 = vmatprep.subr.bf16.mxu1 %v5412_v22  ;;  %v1067_v40 = vsub.f32 %v6499_v61, %v6767_v54 }
 0x23c   : > { %v883_v58 = vpop.xlane.xlu0 %882  ;;  %v1123_v15 = vmul.f32 %v5560_v5, %v1059_v57  ;;  %v1122_v44 = vmul.f32 %v5560_v5, %v1058_v0  ;;  %v1065_v0 = vsub.f32 %v6489_v51, %v6765_v34  ;;  %v1066_v57 = vsub.f32 %v6496_v53, %v6767_v54 }
 0x23d   : > { %v1092_v9 = vadd.f32 1e-05, %v1044_v24  ;;  %v1045_v14 = vsub.f32 %v1013_v2, %v1029_v43  ;;  %v6781_v8 = vmul.f32 0.00390625, %v883_v58  ;;  %v1064_v24 = vsub.f32 %v6486_v39, %v6765_v34 }
 0x23e   : > { %v886_v41 = vpop.xlane.xlu1 %885  ;;  %v1441_v1 = vpack.c.bf16 %v1123_v15, %v1121_v36  ;;  %v1440_v30 = vpack.c.bf16 %v1122_v44, %v1120_v7  ;;  %2497 = vmatpush1.bf16.msra.mxu0 %v5407_v16  ;;  %2610 = vmatpush1.bf16.msra.mxu1 %v5410_v59 }
 0x23f   : > { %5565 = vrsqrt.f32 %v1092_v9  ;;  %v1093_v10 = vadd.f32 1e-05, %v1045_v14  ;;  %v6783_v45 = vmul.f32 0.00390625, %v886_v41  ;;  %v1030_v13 = vmul.f32 %v6781_v8, %v6781_v8 }
 0x240   : > { %v980_v20 = vpop.xlane.xlu0 %979  ;;  %2498 = vmatprep.mubr.bf16.mxu0 %v1441_v1  ;;  %2611 = vmatprep.mubr.bf16.mxu1 %v1441_v1 }
 0x241   : > { %v5562_v18 = vpop.eup %5561  ;;  %5567 = vrsqrt.f32 %v1093_v10  ;;  %v1014_v4 = vmul.f32 0.00390625, %v980_v20  ;;  %2499 = vmatmul.mubr.bf16.vlgmr.msra.gmra.mrb[32].mxu0 %v1440_v30  ;;  %2612 = vmatmul.mubr.bf16.vlgmr.msra.gmra.mrb[32].mxu1 %v1440_v30  ;;  %v1031_v19 = vmul.f32 %v6783_v45, %v6783_v45  ;;  %v1069_v30 = vsub.f32 %v6513_v47, %v6781_v8 }
 0x242   : > { %v983_v28 = vpop.xlane.xlu1 %982  ;;  %v1125_v26 = vmul.f32 %v5562_v18, %v1061_v48  ;;  %v1124_v63 = vmul.f32 %v5562_v18, %v1060_v52  ;;  %v1070_v20 = vsub.f32 %v6520_v11, %v6783_v45  ;;  %v1071_v18 = vsub.f32 %v6523_v46, %v6783_v45 }
 0x243   : > { %v5564_v25 = vpop.eup %5563  ;;  %v1046_v60 = vsub.f32 %v1014_v4, %v1030_v13  ;;  %v1015_v29 = vmul.f32 0.00390625, %v983_v28  ;;  %v1068_v48 = vsub.f32 %v6510_v33, %v6781_v8 }
 0x244   : > { %v889_v35 = vpop.xlane.xlu0 %888  ;;  %v1127_v50 = vmul.f32 %v5564_v25, %v1063_v49  ;;  %v1126_v56 = vmul.f32 %v5564_v25, %v1062_v62 }
 0x245   : > { %v1094_v27 = vadd.f32 1e-05, %v1046_v60  ;;  %v1047_v42 = vsub.f32 %v1015_v29, %v1031_v19  ;;  %v6797_v23 = vmul.f32 0.00390625, %v889_v35 }
 0x246   : > { %v892_v38 = vpop.xlane.xlu1 %891  ;;  %v1443_v32 = vpack.c.bf16 %v1127_v50, %v1125_v26  ;;  %v1442_v21 = vpack.c.bf16 %v1126_v56, %v1124_v63 }
 0x247   : > { %5569 = vrsqrt.f32 %v1094_v27  ;;  %v1095_v55 = vadd.f32 1e-05, %v1047_v42  ;;  %v6799_v6 = vmul.f32 0.00390625, %v892_v38  ;;  %v1032_v22 = vmul.f32 %v6797_v23, %v6797_v23  ;;  %v8330_v38 = vld [vmem:[#allocation34_spill] sm:$0xff] }
 0x248   : > { %2508 = vmatprep.mubr.bf16.mxu0 %v1443_v32  ;;  %2621 = vmatprep.mubr.bf16.mxu1 %v1443_v32  ;;  %v986_v31 = vpop.xlane.xlu0 %985  ;;  %v1073_v63 = vsub.f32 %v6537_v3, %v6797_v23 }
 0x249   : > { %v5566_v37 = vpop.eup %5565  ;;  %5571 = vrsqrt.f32 %v1095_v55  ;;  %v1016_v12 = vmul.f32 0.00390625, %v986_v31  ;;  %2509 = vmatmul.mubr.bf16.gmra.mrb[36].mxu0 %v1442_v21  ;;  %2622 = vmatmul.mubr.bf16.gmra.mrb[36].mxu1 %v1442_v21  ;;  %v1033_v2 = vmul.f32 %v6799_v6, %v6799_v6  ;;  %v1074_v32 = vsub.f32 %v8330_v38, %v6799_v6  ;;  %v8331_v55 = vld [vmem:[#allocation35_spill] sm:$0xff] }
 0x24a   : > { %v989_v5 = vpop.xlane.xlu1 %988  ;;  %v1129_v51 = vmul.f32 %v5566_v37, %v1065_v0  ;;  %v1128_v61 = vmul.f32 %v5566_v37, %v1064_v24  ;;  %v1075_v21 = vsub.f32 %v8331_v55, %v6799_v6 }
 0x24b   : > { %v5568_v17 = vpop.eup %5567  ;;  %v1048_v43 = vsub.f32 %v1016_v12, %v1032_v22  ;;  %v1017_v16 = vmul.f32 0.00390625, %v989_v5  ;;  %v8332_v22 = vld [vmem:[#allocation33_spill] sm:$0xff] }
 0x24c   : > { %v895_v58 = vpop.xlane.xlu0 %894  ;;  %v1131_v59 = vmul.f32 %v5568_v17, %v1067_v40  ;;  %v1130_v36 = vmul.f32 %v5568_v17, %v1066_v57  ;;  %v1072_v12 = vsub.f32 %v8332_v22, %v6797_v23 }
 0x24d   : > { %v1096_v53 = vadd.f32 1e-05, %v1048_v43  ;;  %v1049_v15 = vsub.f32 %v1017_v16, %v1033_v2  ;;  %v6813_v44 = vmul.f32 0.00390625, %v895_v58 }
 0x24e   : > { %v898_v54 = vpop.xlane.xlu1 %897  ;;  %v1445_v9 = vpack.c.bf16 %v1131_v59, %v1129_v51  ;;  %v1444_v34 = vpack.c.bf16 %v1130_v36, %v1128_v61 }
 0x24f   : > { %5573 = vrsqrt.f32 %v1096_v53  ;;  %v1097_v39 = vadd.f32 1e-05, %v1049_v15  ;;  %v6815_v14 = vmul.f32 0.00390625, %v898_v54  ;;  %v1034_v1 = vmul.f32 %v6813_v44, %v6813_v44 }
 0x250   : > { %2518 = vmatprep.mubr.bf16.mxu0 %v1445_v9  ;;  %2631 = vmatprep.mubr.bf16.mxu1 %v1445_v9  ;;  %v992_v7 = vpop.xlane.xlu0 %991  ;;  %v8333_v9 = vld [vmem:[#allocation37_spill] sm:$0xff] }
 0x251   : > { %v5570_v41 = vpop.eup %5569  ;;  %5575 = vrsqrt.f32 %v1097_v39  ;;  %v1018_v10 = vmul.f32 0.00390625, %v992_v7  ;;  %2519 = vmatmul.mubr.bf16.gmra.mrb[40].mxu0 %v1444_v34  ;;  %2632 = vmatmul.mubr.bf16.gmra.mrb[40].mxu1 %v1444_v34  ;;  %v1035_v49 = vmul.f32 %v6815_v14, %v6815_v14  ;;  %v1077_v39 = vsub.f32 %v8333_v9, %v6813_v44  ;;  %v8334_v34 = vld [vmem:[#allocation38_spill] sm:$0xff] }
 0x252   : > { %v995_v13 = vpop.xlane.xlu1 %994  ;;  %v1133_v47 = vmul.f32 %v5570_v41, %v1069_v30  ;;  %v1132_v46 = vmul.f32 %v5570_v41, %v1068_v48  ;;  %v1078_v7 = vsub.f32 %v8334_v34, %v6815_v14  ;;  %v8335_v41 = vld [vmem:[#allocation39_spill] sm:$0xff]  ;;  %v5430_v34 = vld [vmem:[#allocation7 + $0x54] ss:$8 sps:$4 sm:$0xff]  }
 0x253   : > { %v5572_v4 = vpop.eup %5571  ;;  %v1050_v62 = vsub.f32 %v1018_v10, %v1034_v1  ;;  %v1019_v28 = vmul.f32 0.00390625, %v995_v13  ;;  %v1079_v1 = vsub.f32 %v8335_v41, %v6815_v14  ;;  %v5427_v9 = vld [vmem:[#allocation7 + $0x44] ss:$8 sps:$4 sm:$0xff]  }
 0x254   : > { %v901_v25 = vpop.xlane.xlu0 %900  ;;  %v1135_v52 = vmul.f32 %v5572_v4, %v1071_v18  ;;  %v1134_v60 = vmul.f32 %v5572_v4, %v1070_v20  ;;  %v8336_v20 = vld [vmem:[#allocation36_spill] sm:$0xff]  ;;  %v5433_v41 = vld [vmem:[#allocation7 + $0x64] ss:$8 sps:$4 sm:$0xff]  }
 0x255   : > { %v1098_v11 = vadd.f32 1e-05, %v1050_v62  ;;  %v1051_v19 = vsub.f32 %v1019_v28, %v1035_v49  ;;  %v6829_v29 = vmul.f32 0.00390625, %v901_v25  ;;  %v1076_v18 = vsub.f32 %v8336_v20, %v6813_v44  ;;  %v8337_v44 = vld [vmem:[#allocation41_spill] sm:$0xff]  ;;  %v5439_v20 = vld [vmem:[#allocation7 + $0x84] ss:$8 sps:$4 sm:$0xff]  }
 0x256   : > { %v904_v45 = vpop.xlane.xlu1 %903  ;;  %v1447_v35 = vpack.c.bf16 %v1135_v52, %v1133_v47  ;;  %v1446_v8 = vpack.c.bf16 %v1134_v60, %v1132_v46 }
 0x257   : > { %5577 = vrsqrt.f32 %v1098_v11  ;;  %v1099_v33 = vadd.f32 1e-05, %v1051_v19  ;;  %v6831_v26 = vmul.f32 0.00390625, %v904_v45  ;;  %v1036_v27 = vmul.f32 %v6829_v29, %v6829_v29  ;;  %v8338_v45 = vld [vmem:[#allocation42_spill] sm:$0xff] }
 0x258   : > { %2528 = vmatprep.mubr.bf16.mxu0 %v1447_v35  ;;  %2641 = vmatprep.mubr.bf16.mxu1 %v1447_v35  ;;  %v998_v50 = vpop.xlane.xlu0 %997  ;;  %v1081_v46 = vsub.f32 %v8337_v44, %v6829_v29 }
 0x259   : > { %v5574_v56 = vpop.eup %5573  ;;  %5579 = vrsqrt.f32 %v1099_v33  ;;  %v1020_v42 = vmul.f32 0.00390625, %v998_v50  ;;  %2529 = vmatmul.mubr.bf16.gmra.mrb[44].mxu0 %v1446_v8  ;;  %2642 = vmatmul.mubr.bf16.gmra.mrb[44].mxu1 %v1446_v8  ;;  %v1037_v57 = vmul.f32 %v6831_v26, %v6831_v26  ;;  %v1082_v35 = vsub.f32 %v8338_v45, %v6831_v26  ;;  %v8339_v33 = vld [vmem:[#allocation43_spill] sm:$0xff] }
 0x25a   : > { %v1001_v31 = vpop.xlane.xlu1 %1000  ;;  %v1137_v3 = vmul.f32 %v5574_v56, %v1073_v63  ;;  %v1136_v6 = vmul.f32 %v5574_v56, %v1072_v12  ;;  %v1083_v8 = vsub.f32 %v8339_v33, %v6831_v26  ;;  %v8340_v56 = vld [vmem:[#allocation40_spill] sm:$0xff]  ;;  %v8342_v12 = vld [vmem:[#allocation46_spill] sm:$0xff] }
 0x25b   : > { %v5576_v37 = vpop.eup %5575  ;;  %v1052_v0 = vsub.f32 %v1020_v42, %v1036_v27  ;;  %v1021_v40 = vmul.f32 0.00390625, %v1001_v31  ;;  %v1080_v27 = vsub.f32 %v8340_v56, %v6829_v29  ;;  %v8344_v29 = vld [vmem:[#allocation44_spill] sm:$0xff] }
 0x25c   : > { %v907_v5 = vpop.xlane.xlu0 %906  ;;  %v1139_v17 = vmul.f32 %v5576_v37, %v1075_v21  ;;  %v1138_v24 = vmul.f32 %v5576_v37, %v1074_v32  ;;  %v8341_v37 = vld [vmem:[#allocation45_spill] sm:$0xff] }
 0x25d   : > { %v1100_v43 = vadd.f32 1e-05, %v1052_v0  ;;  %v1053_v2 = vsub.f32 %v1021_v40, %v1037_v57  ;;  %v6845_v16 = vmul.f32 0.00390625, %v907_v5  ;;  %v8343_v0 = vld [vmem:[#allocation47_spill] sm:$0xff] }
 0x25e   : > { %v910_v58 = vpop.xlane.xlu1 %909  ;;  %v1449_v51 = vpack.c.bf16 %v1139_v17, %v1137_v3  ;;  %v1448_v59 = vpack.c.bf16 %v1138_v24, %v1136_v6 }
 0x25f   : > { %5581 = vrsqrt.f32 %v1100_v43  ;;  %v1101_v23 = vadd.f32 1e-05, %v1053_v2  ;;  %v927_v36 = vmul.f32 0.00390625, %v910_v58  ;;  %v1038_v61 = vmul.f32 %v6845_v16, %v6845_v16  ;;  %v5413_v58 = vld [vmem:[#allocation7] ss:$8 sps:$4 sm:$0xff]  }
 0x260   : > { %2538 = vmatprep.mubr.bf16.mxu0 %v1449_v51  ;;  %2651 = vmatprep.mubr.bf16.mxu1 %v1449_v51  ;;  %v1004_v53 = vpop.xlane.xlu0 %1003  ;;  %v1085_v22 = vsub.f32 %v8341_v37, %v6845_v16  ;;  %v1084_v5 = vsub.f32 %v8344_v29, %v6845_v16  ;;  %v5415_v51 = vld [vmem:[#allocation7 + $0x4] ss:$8 sps:$4 sm:$0xff]  }
 0x261   : > { %v5578_v15 = vpop.eup %5577  ;;  %5583 = vrsqrt.f32 %v1101_v23  ;;  %v1022_v54 = vmul.f32 0.00390625, %v1004_v53  ;;  %2539 = vmatmul.mubr.bf16.gmra.mrb[48].mxu0 %v1448_v59  ;;  %2652 = vmatmul.mubr.bf16.gmra.mrb[48].mxu1 %v1448_v59  ;;  %v1039_v4 = vmul.f32 %v927_v36, %v927_v36  ;;  %v1086_v26 = vsub.f32 %v8342_v12, %v927_v36  ;;  %v5418_v23 = vld [vmem:[#allocation7 + $0x14] ss:$8 sps:$4 sm:$0xff]   ;;  %v5416_v59 = vld [vmem:[#allocation7 + $0x10] ss:$8 sps:$4 sm:$0xff]  }
 0x262   : > { %v1007_v10 = vpop.xlane.xlu1 %1006  ;;  %v1141_v62 = vmul.f32 %v5578_v15, %v1077_v39  ;;  %v1140_v52 = vmul.f32 %v5578_v15, %v1076_v18  ;;  %v1087_v57 = vsub.f32 %v8343_v0, %v927_v36  ;;  %3719 = vmatprep.subr.bf16.mxu0 %v5415_v51  ;;  %v5421_v16 = vld [vmem:[#allocation7 + $0x24] ss:$8 sps:$4 sm:$0xff]   ;;  %v5440_v36 = vld [vmem:[#allocation7 + $0x100] ss:$8 sps:$4 sm:$0xff]  }
 0x263   : > { %v5580_v30 = vpop.eup %5579  ;;  %v1054_v13 = vsub.f32 %v1022_v54, %v1038_v61  ;;  %v1023_v48 = vmul.f32 0.00390625, %v1007_v10  ;;  %3720 = vmatpush1.bf16.msra.mxu0 %v5413_v58  ;;  %v6871_v53 = vld [vmem:[#allocation7 + $0x104] ss:$8 sps:$4 sm:$0xff]   ;;  %v5419_v15 = vld [vmem:[#allocation7 + $0x20] ss:$8 sps:$4 sm:$0xff]  }
 0x264   : > { %v1143_v49 = vmul.f32 %v5580_v30, %v1079_v1  ;;  %v1142_v28 = vmul.f32 %v5580_v30, %v1078_v7  ;;  %3721 = vmatprep.subr.bf16.mxu0 %v5418_v23  ;;  %v5424_v61 = vld [vmem:[#allocation7 + $0x34] ss:$8 sps:$4 sm:$0xff]   ;;  %4960 = vmatprep.subr.bf16.mxu1 %v6871_v53  ;;  %v5422_v54 = vld [vmem:[#allocation7 + $0x30] ss:$8 sps:$4 sm:$0xff]   ;;  %v5425_v39 = vld [vmem:[#allocation7 + $0x40] ss:$8 sps:$4 sm:$0xff]  }
 0x265   : > { %v1102_v25 = vadd.f32 1e-05, %v1054_v13  ;;  %v1055_v47 = vsub.f32 %v1023_v48, %v1039_v4  ;;  %4976 = vmatpush1.bf16.msra.mxu1 %v5440_v36  ;;  %v5428_v7 = vld [vmem:[#allocation7 + $0x50] ss:$8 sps:$4 sm:$0xff]   ;;  %v5431_v1 = vld [vmem:[#allocation7 + $0x60] ss:$8 sps:$4 sm:$0xff]  }
 0x266   : > { %v1451_v60 = vpack.c.bf16 %v1143_v49, %v1141_v62  ;;  %v1450_v14 = vpack.c.bf16 %v1142_v28, %v1140_v52  ;;  %v5436_v10 = vld [vmem:[#allocation7 + $0x74] ss:$8 sps:$4 sm:$0xff]   ;;  %v5434_v30 = vld [vmem:[#allocation7 + $0x70] ss:$8 sps:$4 sm:$0xff]   ;;  %v5437_v18 = vld [vmem:[#allocation7 + $0x80] ss:$8 sps:$4 sm:$0xff]  }
 0x267   : > { %5585 = vrsqrt.f32 %v1102_v25  ;;  %v1103_v11 = vadd.f32 1e-05, %v1055_v47  ;;  %3722 = vmatpush1.bf16.msra.mxu0 %v5416_v59  ;;  %v5445_v13 = vld [vmem:[#allocation7 + $0x94] ss:$8 sps:$4 sm:$0xff]   ;;  %v5443_v4 = vld [vmem:[#allocation7 + $0x90] ss:$8 sps:$4 sm:$0xff]  }
 0x268   : > { %2548 = vmatprep.mubr.bf16.mxu0 %v1451_v60  ;;  %2661 = vmatprep.mubr.bf16.mxu1 %v1451_v60  ;;  %v2692_v48 = vld [vmem:[%s8165_s5] sm:$0xf]  ;;  %v8345_v62 = vld [vmem:[#allocation19_spill] sm:$0xff]  ;;  %v8348_v52 = vld [vmem:[#allocation20_spill] sm:$0xff] }
 0x269   : > { %v5582_v19 = vpop.eup %5581  ;;  %5587 = vrsqrt.f32 %v1103_v11  ;;  %2549 = vmatmul.mubr.bf16.gmra.mrb[52].mxu0 %v1450_v14  ;;  %2662 = vmatmul.mubr.bf16.gmra.mrb[52].mxu1 %v1450_v14  ;;  %v6878_v49 = vrot.slane %v2692_v48, %v8345_v62  ;;  %v8346_v28 = vld [vmem:[#allocation18_spill] sm:$0xff]  ;;  %v6885_v60 = vrot.slane %v2692_v48, %v8348_v52 }
 0x26a   : > { %v1145_v42 = vmul.f32 %v5582_v19, %v1081_v46  ;;  %v1144_v32 = vmul.f32 %v5582_v19, %v1080_v27  ;;  %3723 = vmatprep.subr.bf16.mxu0 %v5421_v16  ;;  %v8347_v25 = vsub.s32 2, %v8346_v28  ;;  %v8349_v11 = vsub.s32 3, %v8346_v28 }
 0x26b   : > { %v5584_v50 = vpop.eup %5583  ;;  %3724 = vmatpush1.bf16.msra.mxu0 %v5419_v15 }
 0x26c   : > { %v1147_v63 = vmul.f32 %v5584_v50, %v1083_v8  ;;  %v1146_v38 = vmul.f32 %v5584_v50, %v1082_v35  ;;  %3725 = vmatprep.subr.bf16.mxu0 %v5424_v61  ;;  %v6882_v47 = vrot.slane %v2692_v48, %v8347_v25  ;;  %v6889_v14 = vrot.slane %v2692_v48, %v8349_v11 }
 0x26e   : > { %v1453_v55 = vpack.c.bf16 %v1147_v63, %v1145_v42  ;;  %v1452_v21 = vpack.c.bf16 %v1146_v38, %v1144_v32 }
 0x26f   : > { %3726 = vmatpush1.bf16.msra.mxu0 %v5422_v54 }
 0x270   : > { %2558 = vmatprep.mubr.bf16.mxu0 %v1453_v55  ;;  %2671 = vmatprep.mubr.bf16.mxu1 %v1453_v55 }
 0x271   : > { %v5586_v31 = vpop.eup %5585  ;;  %2559 = vmatmul.mubr.bf16.gmra.mrb[56].mxu0 %v1452_v21  ;;  %2672 = vmatmul.mubr.bf16.gmra.mrb[56].mxu1 %v1452_v21 }
 0x272   : > { %v1149_v3 = vmul.f32 %v5586_v31, %v1085_v22  ;;  %v1148_v43 = vmul.f32 %v5586_v31, %v1084_v5  ;;  %3727 = vmatprep.subr.bf16.mxu0 %v5427_v9 }
 0x273   : > { %v5588_v40 = vpop.eup %5587  ;;  %3728 = vmatpush1.bf16.msra.mxu0 %v5425_v39 }
 0x274   : > { %v1151_v17 = vmul.f32 %v5588_v40, %v1087_v57  ;;  %v1150_v24 = vmul.f32 %v5588_v40, %v1086_v26  ;;  %3729 = vmatprep.subr.bf16.mxu0 %v5430_v34 }
 0x276   : > { %v1455_v2 = vpack.c.bf16 %v1151_v17, %v1149_v3  ;;  %v1454_v6 = vpack.c.bf16 %v1150_v24, %v1148_v43 }
 0x277   : > { %3730 = vmatpush1.bf16.msra.mxu0 %v5428_v7 }
 0x278   : > { %2568 = vmatprep.mubr.bf16.mxu0 %v1455_v2  ;;  %2681 = vmatprep.mubr.bf16.mxu1 %v1455_v2 }
 0x279   : > { %2569 = vmatmul.mubr.bf16.gmra.mrb[60].mxu0 %v1454_v6  ;;  %2682 = vmatmul.mubr.bf16.gmra.mrb[60].mxu1 %v1454_v6 }
 0x27a   : > { %3731 = vmatprep.subr.bf16.mxu0 %v5433_v41 }
 0x27b   : > { %3732 = vmatpush1.bf16.msra.mxu0 %v5431_v1 }
 0x27c   : > { %3733 = vmatprep.subr.bf16.mxu0 %v5436_v10 }
 0x27f   : > { %3734 = vmatpush1.bf16.msra.mxu0 %v5434_v30 }
 0x280   : > { %3735 = vmatprep.subr.bf16.mxu0 %v5439_v20 }
 0x283   : > { %3736 = vmatpush1.bf16.msra.mxu0 %v5437_v18 }
 0x284   : > { %3737 = vmatprep.subr.bf16.mxu0 %v5445_v13 }
 0x287   : > { %3738 = vmatpush1.bf16.msra.mxu0 %v5443_v4 }
 0x314   : > { %v2500_v19 = vpop.f32.mrb[32].mxu0  ;;  %v2613_v44 = vpop.f32.mrb[32].mxu1 }
 0x315   : > { %v2714_v46 = vadd.f32 %v6878_v49, %v2500_v19  ;;  %v2716_v45 = vadd.f32 %v6882_v47, %v2613_v44  ;;  %v2502_v35 = vpop.f32.mrb[33].mxu0  ;;  %v2615_v33 = vpop.f32.mrb[33].mxu1 }
 0x316   : > { %v2715_v8 = vadd.f32 %v6885_v60, %v2502_v35  ;;  %v2504_v50 = vpop.f32.mrb[34].mxu0  ;;  %v2617_v56 = vpop.f32.mrb[34].mxu1  ;;  %v2717_v42 = vadd.f32 %v6889_v14, %v2615_v33 }
 0x317   : > { %v6894_v27 = vmax.f32 %v2714_v46, 0.0  ;;  %v2718_v63 = vadd.f32 %v6878_v49, %v2504_v50  ;;  %v2506_v38 = vpop.f32.mrb[35].mxu0  ;;  %v2619_v32 = vpop.f32.mrb[35].mxu1  ;;  %v6898_v55 = vmax.f32 %v2716_v45, 0.0  ;;  %v2720_v31 = vadd.f32 %v6882_v47, %v2617_v56 }
 0x318   : > { %v6900_v21 = vmax.f32 %v2715_v8, 0.0  ;;  %v2719_v37 = vadd.f32 %v6885_v60, %v2506_v38  ;;  %v2721_v26 = vadd.f32 %v6889_v14, %v2619_v32  ;;  %v6915_v29 = vmax.f32 %v2717_v42, 0.0 }
 0x319   : > { %v2939_v22 = vmul.f32 %v6894_v27, %v6894_v27  ;;  %v6906_v12 = vmax.f32 %v2718_v63, 0.0  ;;  %v6917_v5 = vmax.f32 %v2720_v31, 0.0  ;;  %v2941_v2 = vmul.f32 %v6898_v55, %v6898_v55 }
 0x31a   : > { %v2940_v0 = vmul.f32 %v6900_v21, %v6900_v21  ;;  %v6911_v57 = vmax.f32 %v2719_v37, 0.0  ;;  %v2842_v40 = vadd.f32 %v6900_v21, %v6894_v27  ;;  %v6926_v58 = vmax.f32 %v2721_v26, 0.0 }
 0x31b   : > { %v2943_v6 = vmul.f32 %v6906_v12, %v6906_v12  ;;  %v2942_v30 = vmul.f32 %v6915_v29, %v6915_v29  ;;  %v2945_v11 = vmul.f32 %v6917_v5, %v6917_v5 }
 0x31c   : > { %v2510_v3 = vpop.f32.mrb[36].mxu0  ;;  %v2623_v17 = vpop.f32.mrb[36].mxu1  ;;  %v2843_v24 = vadd.f32 %v2842_v40, %v6898_v55  ;;  %v2847_v43 = vadd.f32 %v6911_v57, %v6906_v12  ;;  %v3003_v16 = vadd.f32 %v2940_v0, %v2939_v22  ;;  %v2944_v34 = vmul.f32 %v6911_v57, %v6911_v57 }
 0x31d   : > { %v2722_v51 = vadd.f32 %v6878_v49, %v2510_v3  ;;  %v2512_v23 = vpop.f32.mrb[37].mxu0  ;;  %v2625_v59 = vpop.f32.mrb[37].mxu1  ;;  %v2724_v36 = vadd.f32 %v6882_v47, %v2623_v17  ;;  %v2946_v45 = vmul.f32 %v6926_v58, %v6926_v58 }
 0x31e   : > { %v2723_v15 = vadd.f32 %v6885_v60, %v2512_v23  ;;  %v2514_v61 = vpop.f32.mrb[38].mxu0  ;;  %v2627_v54 = vpop.f32.mrb[38].mxu1  ;;  %v2844_v9 = vadd.f32 %v2843_v24, %v6915_v29  ;;  %v2848_v39 = vadd.f32 %v2847_v43, %v6917_v5  ;;  %v2725_v18 = vadd.f32 %v6889_v14, %v2625_v59 }
 0x31f   : > { %v6935_v7 = vmax.f32 %v2722_v51, 0.0  ;;  %v2726_v41 = vadd.f32 %v6878_v49, %v2514_v61  ;;  %v2516_v1 = vpop.f32.mrb[39].mxu0  ;;  %v2629_v10 = vpop.f32.mrb[39].mxu1  ;;  %v2728_v13 = vadd.f32 %v6882_v47, %v2627_v54  ;;  %v6951_v19 = vmax.f32 %v2724_v36, 0.0 }
 0x320   : > { %v6940_v20 = vmax.f32 %v2723_v15, 0.0  ;;  %v2727_v4 = vadd.f32 %v6885_v60, %v2516_v1  ;;  %2845 = vadd.xlane.f32.xlu0 %v2844_v9  ;;  %v2729_v28 = vadd.f32 %v6889_v14, %v2629_v10  ;;  %v2849_v25 = vadd.f32 %v2848_v39, %v6926_v58 }
 0x321   : > { %v6945_v48 = vmax.f32 %v2726_v41, 0.0  ;;  %v3004_v46 = vadd.f32 %v3003_v16, %v2941_v2  ;;  %v2947_v35 = vmul.f32 %v6935_v7, %v6935_v7  ;;  %v3008_v8 = vadd.f32 %v2944_v34, %v2943_v6 }
 0x322   : > { %v6953_v44 = vmax.f32 %v2727_v4, 0.0  ;;  %v2948_v33 = vmul.f32 %v6940_v20, %v6940_v20  ;;  %2850 = vadd.xlane.f32.xlu1 %v2849_v25  ;;  %v2852_v50 = vadd.f32 %v6940_v20, %v6935_v7  ;;  %v6963_v56 = vmax.f32 %v2725_v18, 0.0 }
 0x323   : > { %v6965_v42 = vmax.f32 %v2728_v13, 0.0  ;;  %v3005_v63 = vadd.f32 %v3004_v46, %v2942_v30  ;;  %v6969_v37 = vmax.f32 %v2729_v28, 0.0  ;;  %v3009_v40 = vadd.f32 %v3008_v8, %v2945_v11 }
 0x324   : > { %v2520_v38 = vpop.f32.mrb[40].mxu0  ;;  %v2633_v32 = vpop.f32.mrb[40].mxu1  ;;  %v2857_v31 = vadd.f32 %v6953_v44, %v6945_v48  ;;  %v2853_v3 = vadd.f32 %v2852_v50, %v6951_v19  ;;  %v2951_v17 = vmul.f32 %v6945_v48, %v6945_v48  ;;  %v3013_v61 = vadd.f32 %v2948_v33, %v2947_v35 }
 0x325   : > { %v2730_v22 = vadd.f32 %v6878_v49, %v2520_v38  ;;  %v2522_v26 = vpop.f32.mrb[41].mxu0  ;;  %v2635_v0 = vpop.f32.mrb[41].mxu1  ;;  %3006 = vadd.xlane.f32.xlu0 %v3005_v63  ;;  %v2732_v24 = vadd.f32 %v6882_v47, %v2633_v32  ;;  %v3010_v59 = vadd.f32 %v3009_v40, %v2946_v45  ;;  %v2952_v54 = vmul.f32 %v6953_v44, %v6953_v44 }
 0x326   : > { %v2731_v43 = vadd.f32 %v6885_v60, %v2522_v26  ;;  %v2524_v2 = vpop.f32.mrb[42].mxu0  ;;  %v2637_v6 = vpop.f32.mrb[42].mxu1  ;;  %v2858_v51 = vadd.f32 %v2857_v31, %v6965_v42  ;;  %v2733_v23 = vadd.f32 %v6889_v14, %v2635_v0  ;;  %v2854_v1 = vadd.f32 %v2853_v3, %v6963_v56 }
 0x327   : > { %v2734_v16 = vadd.f32 %v6878_v49, %v2524_v2  ;;  %v2526_v36 = vpop.f32.mrb[43].mxu0  ;;  %v2639_v15 = vpop.f32.mrb[43].mxu1  ;;  %v6982_v9 = vmax.f32 %v2730_v22, 0.0  ;;  %3011 = vadd.xlane.f32.xlu1 %v3010_v59  ;;  %v2949_v10 = vmul.f32 %v6951_v19, %v6951_v19  ;;  %v6992_v30 = vmax.f32 %v2732_v24, 0.0 }
 0x328   : > { %v6984_v39 = vmax.f32 %v2731_v43, 0.0  ;;  %v2735_v34 = vadd.f32 %v6885_v60, %v2526_v36  ;;  %v2859_v13 = vadd.f32 %v2858_v51, %v6969_v37  ;;  %v2950_v4 = vmul.f32 %v6963_v56, %v6963_v56 }
 0x329   : > { %8350 = vst [vmem:[#allocation22_spill] sm:$0xff] %v6982_v9  ;;  %v6987_v41 = vmax.f32 %v2734_v16, 0.0  ;;  %8353 = vst [vmem:[#allocation25_spill] sm:$0xff] %v6992_v30  ;;  %v6999_v28 = vmax.f32 %v2733_v23, 0.0  ;;  %v2736_v25 = vadd.f32 %v6882_v47, %v2637_v6  ;;  %v2737_v11 = vadd.f32 %v6889_v14, %v2639_v15  ;;  %2855 = vadd.xlane.f32.xlu0 %v2854_v1  ;;  %v7028_v1 = vld [vmem:[#allocation7 + $0x110] ss:$8 sps:$4 sm:$0xff]  }
 0x32a   : > { %8351 = vst [vmem:[#allocation23_spill] sm:$0xff] %v6984_v39  ;;  %v6994_v18 = vmax.f32 %v2735_v34, 0.0  ;;  %v3014_v46 = vadd.f32 %v3013_v61, %v2949_v10  ;;  %v2953_v33 = vmul.f32 %v6965_v42, %v6965_v42  ;;  %v2954_v8 = vmul.f32 %v6969_v37, %v6969_v37  ;;  %v7030_v10 = vld [vmem:[#allocation7 + $0x114] ss:$8 sps:$4 sm:$0xff]  }
 0x32b   : > { %8352 = vst [vmem:[#allocation21_spill] sm:$0xff] %v6987_v41  ;;  %8355 = vst [vmem:[#allocation27_spill] sm:$0xff] %v6999_v28  ;;  %v3018_v50 = vadd.f32 %v2952_v54, %v2951_v17  ;;  %v2862_v63 = vadd.f32 %v6984_v39, %v6982_v9  ;;  %2860 = vadd.xlane.f32.xlu1 %v2859_v13  ;;  %v2955_v6 = vmul.f32 %v6982_v9, %v6982_v9 }
 0x32c   : > { %8354 = vst [vmem:[#allocation26_spill] sm:$0xff] %v6994_v18  ;;  %v2530_v45 = vpop.f32.mrb[44].mxu0  ;;  %v2643_v35 = vpop.f32.mrb[44].mxu1  ;;  %v3015_v38 = vadd.f32 %v3014_v46, %v2950_v4  ;;  %v2867_v0 = vadd.f32 %v6994_v18, %v6987_v41  ;;  %v2956_v51 = vmul.f32 %v6984_v39, %v6984_v39  ;;  %v2959_v15 = vmul.f32 %v6987_v41, %v6987_v41 }
 0x32d   : > { %v2738_v32 = vadd.f32 %v6878_v49, %v2530_v45  ;;  %v2740_v31 = vadd.f32 %v6882_v47, %v2643_v35  ;;  %v2532_v22 = vpop.f32.mrb[45].mxu0  ;;  %v2645_v26 = vpop.f32.mrb[45].mxu1  ;;  %v3019_v24 = vadd.f32 %v3018_v50, %v2953_v33  ;;  %v2863_v2 = vadd.f32 %v2862_v63, %v6992_v30  ;;  %4961 = vmatprep.subr.bf16.mxu1 %v7030_v10 }
 0x32e   : > { %v2739_v40 = vadd.f32 %v6885_v60, %v2532_v22  ;;  %v2741_v3 = vadd.f32 %v6889_v14, %v2645_v26  ;;  %v2534_v17 = vpop.f32.mrb[46].mxu0  ;;  %v2647_v43 = vpop.f32.mrb[46].mxu1  ;;  %3016 = vadd.xlane.f32.xlu0 %v3015_v38  ;;  %v7025_v61 = vmax.f32 %v2736_v25, 0.0  ;;  %v2960_v13 = vmul.f32 %v6994_v18, %v6994_v18  ;;  %4977 = vmatpush1.bf16.msra.mxu1 %v7028_v1 }
 0x32f   : > { %v7020_v23 = vmax.f32 %v2738_v32, 0.0  ;;  %v2742_v59 = vadd.f32 %v6878_v49, %v2534_v17  ;;  %v2536_v16 = vpop.f32.mrb[47].mxu0  ;;  %v2649_v36 = vpop.f32.mrb[47].mxu1  ;;  %v3020_v54 = vadd.f32 %v3019_v24, %v2954_v8  ;;  %v7034_v4 = vmax.f32 %v2737_v11, 0.0  ;;  %v5449_v32 = vld [vmem:[#allocation7 + $0xa0] ss:$8 sps:$4 sm:$0xff]  }
 0x330   : > { %8357 = vst [vmem:[#allocation29_spill] sm:$0xff] %v7025_v61  ;;  %v2743_v34 = vadd.f32 %v6885_v60, %v2536_v16  ;;  %v7036_v46 = vmax.f32 %v2740_v31, 0.0  ;;  %v2744_v45 = vadd.f32 %v6882_v47, %v2647_v43  ;;  %v7039_v35 = vmax.f32 %v2739_v40, 0.0  ;;  %v5451_v31 = vld [vmem:[#allocation7 + $0xa4] ss:$8 sps:$4 sm:$0xff]  }
 0x331   : > { %8356 = vst [vmem:[#allocation24_spill] sm:$0xff] %v7020_v23  ;;  %8358 = vst [vmem:[#allocation30_spill] sm:$0xff] %v7034_v4  ;;  %v7041_v25 = vmax.f32 %v2741_v3, 0.0  ;;  %3021 = vadd.xlane.f32.xlu1 %v3020_v54  ;;  %v2864_v33 = vadd.f32 %v2863_v2, %v6999_v28  ;;  %v2868_v8 = vadd.f32 %v2867_v0, %v7025_v61  ;;  %v7048_v11 = vmax.f32 %v2742_v59, 0.0 }
 0x332   : > { %8359 = vst [vmem:[#allocation31_spill] sm:$0xff] %v7036_v46  ;;  %8360 = vst [vmem:[#allocation28_spill] sm:$0xff] %v7039_v35  ;;  %v2963_v50 = vmul.f32 %v7020_v23, %v7020_v23  ;;  %v7050_v63 = vmax.f32 %v2743_v34, 0.0  ;;  %v2745_v38 = vadd.f32 %v6889_v14, %v2649_v36  ;;  %v2957_v26 = vmul.f32 %v6992_v30, %v6992_v30 }
 0x333   : > { %8361 = vst [vmem:[#allocation32_spill] sm:$0xff] %v7041_v25  ;;  %8362 = vst [vmem:[#allocation34_spill] sm:$0xff] %v7048_v11  ;;  %2865 = vadd.xlane.f32.xlu0 %v2864_v33  ;;  %v2869_v22 = vadd.f32 %v2868_v8, %v7034_v4  ;;  %v2958_v0 = vmul.f32 %v6999_v28, %v6999_v28  ;;  %v3023_v40 = vadd.f32 %v2956_v51, %v2955_v6 }
 0x334   : > { %8363 = vst [vmem:[#allocation35_spill] sm:$0xff] %v7050_v63  ;;  %v2540_v3 = vpop.f32.mrb[48].mxu0  ;;  %v2653_v24 = vpop.f32.mrb[48].mxu1  ;;  %v2961_v16 = vmul.f32 %v7025_v61, %v7025_v61  ;;  %v3028_v36 = vadd.f32 %v2960_v13, %v2959_v15  ;;  %3739 = vmatprep.subr.bf16.mxu0 %v5451_v31  ;;  %v2962_v6 = vmul.f32 %v7034_v4, %v7034_v4  ;;  %v7079_v62 = vmax.f32 %v2745_v38, 0.0 }
 0x335   : > { %v2746_v17 = vadd.f32 %v6878_v49, %v2540_v3  ;;  %v2748_v43 = vadd.f32 %v6882_v47, %v2653_v24  ;;  %v2542_v2 = vpop.f32.mrb[49].mxu0  ;;  %v2655_v59 = vpop.f32.mrb[49].mxu1  ;;  %2870 = vadd.xlane.f32.xlu1 %v2869_v22  ;;  %v3024_v54 = vadd.f32 %v3023_v40, %v2957_v26  ;;  %v2872_v8 = vadd.f32 %v7039_v35, %v7020_v23 }
 0x336   : > { %v2747_v34 = vadd.f32 %v6885_v60, %v2542_v2  ;;  %v2544_v51 = vpop.f32.mrb[50].mxu0  ;;  %v2657_v33 = vpop.f32.mrb[50].mxu1  ;;  %v2749_v24 = vadd.f32 %v6889_v14, %v2655_v59  ;;  %v3029_v52 = vadd.f32 %v3028_v36, %v2961_v16  ;;  %3740 = vmatpush1.bf16.msra.mxu0 %v5449_v32  ;;  %v2964_v22 = vmul.f32 %v7039_v35, %v7039_v35 }
 0x337   : > { %v7068_v3 = vmax.f32 %v2746_v17, 0.0  ;;  %v2750_v15 = vadd.f32 %v6878_v49, %v2544_v51  ;;  %v2546_v13 = vpop.f32.mrb[51].mxu0  ;;  %v2659_v31 = vpop.f32.mrb[51].mxu1  ;;  %v7074_v26 = vmax.f32 %v2744_v45, 0.0  ;;  %v3025_v40 = vadd.f32 %v3024_v54, %v2958_v0  ;;  %8366 = vst [vmem:[#allocation38_spill] sm:$0xff] %v7079_v62 }
 0x338   : > { %v2752_v2 = vadd.f32 %v6882_v47, %v2657_v33  ;;  %v2967_v17 = vmul.f32 %v7048_v11, %v7048_v11  ;;  %v7081_v59 = vmax.f32 %v2747_v34, 0.0  ;;  %v3030_v16 = vadd.f32 %v3029_v52, %v2962_v6  ;;  %v7089_v54 = vld [vmem:[#allocation7 + $0x120] ss:$8 sps:$4 sm:$0xff]   ;;  %v7091_v51 = vld [vmem:[#allocation7 + $0x124] ss:$8 sps:$4 sm:$0xff]  }
 0x339   : > { %8364 = vst [vmem:[#allocation33_spill] sm:$0xff] %v7068_v3  ;;  %8365 = vst [vmem:[#allocation37_spill] sm:$0xff] %v7074_v26  ;;  %v2968_v36 = vmul.f32 %v7050_v63, %v7050_v63  ;;  %3026 = vadd.xlane.f32.xlu0 %v3025_v40  ;;  %v7085_v32 = vmax.f32 %v2750_v15, 0.0  ;;  %v2751_v45 = vadd.f32 %v6885_v60, %v2546_v13  ;;  %v7097_v34 = vmax.f32 %v2748_v43, 0.0 }
 0x33a   : > { %8367 = vst [vmem:[#allocation39_spill] sm:$0xff] %v7081_v59  ;;  %v2873_v0 = vadd.f32 %v2872_v8, %v7036_v46  ;;  %8369 = vst [vmem:[#allocation41_spill] sm:$0xff] %v7089_v54  ;;  %v7095_v38 = vmul.f32 %v7068_v3, %v7068_v3  ;;  %v7099_v52 = vmax.f32 %v2749_v24, 0.0  ;;  %3031 = vadd.xlane.f32.xlu1 %v3030_v16  ;;  %v7103_v33 = vmax.f32 %v2752_v2, 0.0 }
 0x33b   : > { %8368 = vst [vmem:[#allocation36_spill] sm:$0xff] %v7085_v32  ;;  %8370 = vst [vmem:[#allocation42_spill] sm:$0xff] %v7091_v51  ;;  %v2877_v6 = vadd.f32 %v7050_v63, %v7048_v11  ;;  %v2965_v15 = vmul.f32 %v7036_v46, %v7036_v46  ;;  %v3033_v13 = vadd.f32 %v2964_v22, %v2963_v50  ;;  %4962 = vmatprep.subr.bf16.mxu1 %v7091_v51  ;;  %v5455_v46 = vld [vmem:[#allocation7 + $0xb0] ss:$8 sps:$4 sm:$0xff]   ;;  %v5457_v50 = vld [vmem:[#allocation7 + $0xb4] ss:$8 sps:$4 sm:$0xff]  }
 0x33c   : > { %8371 = vst [vmem:[#allocation43_spill] sm:$0xff] %v7097_v34  ;;  %8372 = vst [vmem:[#allocation40_spill] sm:$0xff] %v7099_v52  ;;  %v2874_v8 = vadd.f32 %v2873_v0, %v7041_v25  ;;  %v2550_v40 = vpop.f32.mrb[52].mxu0  ;;  %v2663_v23 = vpop.f32.mrb[52].mxu1  ;;  %v7111_v43 = vmul.f32 %v7081_v59, %v7081_v59  ;;  %v2753_v24 = vadd.f32 %v6889_v14, %v2659_v31  ;;  %4978 = vmatpush1.bf16.msra.mxu1 %v7089_v54 }
 0x33d   : > { %8373 = vst [vmem:[#allocation45_spill] sm:$0xff] %v7103_v33  ;;  %v2878_v16 = vadd.f32 %v2877_v6, %v7074_v26  ;;  %v2754_v2 = vadd.f32 %v6878_v49, %v2550_v40  ;;  %v2552_v11 = vpop.f32.mrb[53].mxu0  ;;  %v2665_v0 = vpop.f32.mrb[53].mxu1  ;;  %v7119_v22 = vmul.f32 %v7085_v32, %v7085_v32  ;;  %v7121_v63 = vmax.f32 %v2751_v45, 0.0  ;;  %v7125_v40 = vld [vmem:[#allocation7 + $0x134] ss:$8 sps:$4 sm:$0xff]   ;;  %3741 = vmatprep.subr.bf16.mxu0 %v5457_v50 }
 0x33e   : > { %2875 = vadd.xlane.f32.xlu0 %v2874_v8  ;;  %v2966_v31 = vmul.f32 %v7041_v25, %v7041_v25  ;;  %v3034_v35 = vadd.f32 %v3033_v13, %v2965_v15  ;;  %v2554_v6 = vpop.f32.mrb[54].mxu0  ;;  %v2667_v61 = vpop.f32.mrb[54].mxu1  ;;  %8375 = vst [vmem:[#allocation47_spill] sm:$0xff] %v7125_v40  ;;  %v2756_v4 = vadd.f32 %v6882_v47, %v2663_v23  ;;  %v7131_v8 = vld [vmem:[#allocation7 + $0x130] ss:$8 sps:$4 sm:$0xff]  }
 0x33f   : > { %8374 = vst [vmem:[#allocation46_spill] sm:$0xff] %v7121_v63  ;;  %v2879_v30 = vadd.f32 %v2878_v16, %v7079_v62  ;;  %v2755_v28 = vadd.f32 %v6885_v60, %v2552_v11  ;;  %v2757_v41 = vadd.f32 %v6889_v14, %v2665_v0  ;;  %v2556_v18 = vpop.f32.mrb[55].mxu0  ;;  %v2669_v45 = vpop.f32.mrb[55].mxu1  ;;  %8376 = vst [vmem:[#allocation44_spill] sm:$0xff] %v7131_v8  ;;  %v7133_v25 = vmax.f32 %v2754_v2, 0.0 }
 0x340   : > { %v3035_v9 = vadd.f32 %v3034_v35, %v2966_v31  ;;  %v2969_v15 = vmul.f32 %v7074_v26, %v7074_v26  ;;  %v3038_v13 = vadd.f32 %v2968_v36, %v2967_v17  ;;  %3742 = vmatpush1.bf16.msra.mxu0 %v5455_v46  ;;  %4963 = vmatprep.subr.bf16.mxu1 %v7125_v40  ;;  %v5461_v23 = vld [vmem:[#allocation7 + $0xc0] ss:$8 sps:$4 sm:$0xff]   ;;  %v5463_v16 = vld [vmem:[#allocation7 + $0xc4] ss:$8 sps:$4 sm:$0xff]   ;;  %v7138_v11 = vmax.f32 %v2753_v24, 0.0 }
 0x341   : > { %8377 = vst [vmem:[#allocation18_spill] sm:$0xff] %v7133_v25  ;;  %2880 = vadd.xlane.f32.xlu1 %v2879_v30  ;;  %v2758_v0 = vadd.f32 %v6878_v49, %v2554_v6  ;;  %v2760_v50 = vadd.f32 %v6882_v47, %v2667_v61  ;;  %v2759_v35 = vadd.f32 %v6885_v60, %v2556_v18  ;;  %v7149_v24 = vmax.f32 %v2756_v4, 0.0  ;;  %v5469_v26 = vld [vmem:[#allocation7 + $0xd4] ss:$8 sps:$4 sm:$0xff]  }
 0x342   : > { %8378 = vst [vmem:[#allocation48_spill] sm:$0xff] %v7138_v11  ;;  %v2976_v2 = vmul.f32 %v7121_v63, %v7121_v63  ;;  %3036 = vadd.xlane.f32.xlu0 %v3035_v9  ;;  %v2970_v46 = vmul.f32 %v7079_v62, %v7079_v62  ;;  %v3039_v17 = vadd.f32 %v3038_v13, %v2969_v15  ;;  %v7151_v30 = vmax.f32 %v2755_v28, 0.0  ;;  %v7166_v13 = vld [vmem:[#allocation7 + $0x144] ss:$8 sps:$4 sm:$0xff]  }
 0x343   : > { %v2882_v36 = vadd.f32 %v7081_v59, %v7068_v3  ;;  %8379 = vst [vmem:[#allocation49_spill] sm:$0xff] %v7149_v24  ;;  %v7153_v31 = vmax.f32 %v2757_v41, 0.0  ;;  %v2887_v18 = vadd.f32 %v7121_v63, %v7085_v32  ;;  %4979 = vmatpush1.bf16.msra.mxu1 %v7131_v8  ;;  %3743 = vmatprep.subr.bf16.mxu0 %v5463_v16  ;;  %v7164_v41 = vld [vmem:[#allocation7 + $0x140] ss:$8 sps:$4 sm:$0xff]   ;;  %8382 = vst [vmem:[#allocation52_spill] sm:$0xff] %v7166_v13 }
 0x344   : > { %8380 = vst [vmem:[#allocation50_spill] sm:$0xff] %v7151_v30  ;;  %v7160_v9 = vmul.f32 %v7133_v25, %v7133_v25  ;;  %v3040_v61 = vadd.f32 %v3039_v17, %v2970_v46  ;;  %v2761_v6 = vadd.f32 %v6889_v14, %v2669_v45  ;;  %v2560_v15 = vpop.f32.mrb[56].mxu0  ;;  %v2673_v28 = vpop.f32.mrb[56].mxu1  ;;  %3744 = vmatpush1.bf16.msra.mxu0 %v5461_v23  ;;  %8381 = vst [vmem:[#allocation51_spill] sm:$0xff] %v7164_v41 }
 0x345   : > { %v2883_v4 = vadd.f32 %v2882_v36, %v7097_v34  ;;  %v7168_v32 = vmax.f32 %v2758_v0, 0.0  ;;  %v7170_v3 = vmax.f32 %v2760_v50, 0.0  ;;  %v7172_v16 = vmax.f32 %v2759_v35, 0.0  ;;  %v2562_v46 = vpop.f32.mrb[57].mxu0  ;;  %v2675_v17 = vpop.f32.mrb[57].mxu1  ;;  %4964 = vmatprep.subr.bf16.mxu1 %v7166_v13  ;;  %3745 = vmatprep.subr.bf16.mxu0 %v5469_v26 }
 0x346   : > { %v2888_v63 = vadd.f32 %v2887_v18, %v7103_v33  ;;  %3041 = vadd.xlane.f32.xlu1 %v3040_v61  ;;  %v2973_v23 = vmul.f32 %v7097_v34, %v7097_v34  ;;  %v3043_v36 = vadd.f32 %v7111_v43, %v7095_v38  ;;  %v2762_v0 = vadd.f32 %v6878_v49, %v2560_v15  ;;  %v2564_v59 = vpop.f32.mrb[58].mxu0  ;;  %v2677_v50 = vpop.f32.mrb[58].mxu1  ;;  %v5467_v34 = vld [vmem:[#allocation7 + $0xd0] ss:$8 sps:$4 sm:$0xff]   ;;  %v7187_v38 = vld [vmem:[#allocation7 + $0x154] ss:$8 sps:$4 sm:$0xff]  }
 0x347   : > { %8383 = vst [vmem:[#allocation53_spill] sm:$0xff] %v7168_v32  ;;  %8384 = vst [vmem:[#allocation54_spill] sm:$0xff] %v7172_v16  ;;  %v2884_v45 = vadd.f32 %v2883_v4, %v7099_v52  ;;  %v2980_v35 = vmul.f32 %v7151_v30, %v7151_v30  ;;  %v2764_v61 = vadd.f32 %v6882_v47, %v2673_v28  ;;  %v2566_v62 = vpop.f32.mrb[59].mxu0  ;;  %v2679_v8 = vpop.f32.mrb[59].mxu1  ;;  %4980 = vmatpush1.bf16.msra.mxu1 %v7164_v41  ;;  %v7195_v28 = vld [vmem:[#allocation7 + $0x150] ss:$8 sps:$4 sm:$0xff]  }
 0x348   : > { %v2889_v18 = vadd.f32 %v2888_v63, %v7138_v11  ;;  %v2763_v4 = vadd.f32 %v6885_v60, %v2562_v46  ;;  %8385 = vst [vmem:[#allocation55_spill] sm:$0xff] %v7187_v38  ;;  %v2974_v43 = vmul.f32 %v7099_v52, %v7099_v52  ;;  %v3044_v15 = vadd.f32 %v3043_v36, %v2973_v23  ;;  %v5475_v23 = vld [vmem:[#allocation7 + $0xe4] ss:$8 sps:$4 sm:$0xff]  }
 0x349   : > { %2885 = vadd.xlane.f32.xlu0 %v2884_v45  ;;  %v7191_v39 = vmax.f32 %v2762_v0, 0.0  ;;  %v2765_v63 = vadd.f32 %v6889_v14, %v2675_v17  ;;  %8386 = vst [vmem:[#allocation56_spill] sm:$0xff] %v7195_v28  ;;  %v7197_v46 = vmax.f32 %v2761_v6, 0.0  ;;  %v2977_v13 = vmul.f32 %v7103_v33, %v7103_v33  ;;  %4965 = vmatprep.subr.bf16.mxu1 %v7187_v38  ;;  %v5481_v38 = vld [vmem:[#allocation7 + $0xf4] ss:$8 sps:$4 sm:$0xff]  }
 0x34a   : > { %v3048_v40 = vadd.f32 %v2976_v2, %v7119_v22  ;;  %v2766_v45 = vadd.f32 %v6878_v49, %v2564_v59  ;;  %v2983_v17 = vmul.f32 %v7168_v32, %v7168_v32  ;;  %2890 = vadd.xlane.f32.xlu1 %v2889_v18  ;;  %v3045_v36 = vadd.f32 %v3044_v15, %v2974_v43  ;;  %v5473_v43 = vld [vmem:[#allocation7 + $0xe0] ss:$8 sps:$4 sm:$0xff]  }
 0x34b   : > { %v7206_v0 = vmax.f32 %v2763_v4, 0.0  ;;  %v2767_v6 = vadd.f32 %v6885_v60, %v2566_v62  ;;  %v2984_v33 = vmul.f32 %v7172_v16, %v7172_v16  ;;  %v7211_v52 = vmax.f32 %v2764_v61, 0.0  ;;  %3746 = vmatpush1.bf16.msra.mxu0 %v5467_v34  ;;  %4981 = vmatpush1.bf16.msra.mxu1 %v7195_v28 }
 0x34c   : > { %v2978_v26 = vmul.f32 %v7138_v11, %v7138_v11  ;;  %v3049_v59 = vadd.f32 %v3048_v40, %v2977_v13  ;;  %v7217_v22 = vmul.f32 %v7191_v39, %v7191_v39  ;;  %v7219_v2 = vmax.f32 %v2765_v63, 0.0  ;;  %v2570_v61 = vpop.f32.mrb[60].mxu0  ;;  %v2683_v4 = vpop.f32.mrb[60].mxu1  ;;  %3747 = vmatprep.subr.bf16.mxu0 %v5475_v23 }
 0x34d   : > { %3046 = vadd.xlane.f32.xlu0 %v3045_v36  ;;  %v2892_v62 = vadd.f32 %v7151_v30, %v7133_v25  ;;  %v2897_v18 = vadd.f32 %v7172_v16, %v7168_v32  ;;  %v7226_v34 = vmax.f32 %v2766_v45, 0.0  ;;  %v2768_v13 = vadd.f32 %v6882_v47, %v2677_v50  ;;  %v2572_v63 = vpop.f32.mrb[61].mxu0  ;;  %v2685_v36 = vpop.f32.mrb[61].mxu1  ;;  %v7239_v30 = vld [vmem:[#allocation7 + $0x160] ss:$8 sps:$4 sm:$0xff]  }
 0x34e   : > { %v3050_v40 = vadd.f32 %v3049_v59, %v2978_v26  ;;  %v7229_v15 = vmax.f32 %v2767_v6, 0.0  ;;  %v7233_v25 = vmul.f32 %v7206_v0, %v7206_v0  ;;  %v2981_v26 = vmul.f32 %v7149_v24, %v7149_v24  ;;  %v2574_v45 = vpop.f32.mrb[62].mxu0  ;;  %v2687_v59 = vpop.f32.mrb[62].mxu1  ;;  %v7241_v50 = vld [vmem:[#allocation7 + $0x164] ss:$8 sps:$4 sm:$0xff]  }
 0x34f   : > { %v2893_v32 = vadd.f32 %v2892_v62, %v7149_v24  ;;  %v2898_v16 = vadd.f32 %v2897_v18, %v7170_v3  ;;  %v3053_v23 = vadd.f32 %v2980_v35, %v7160_v9  ;;  %v2770_v6 = vadd.f32 %v6878_v49, %v2570_v61  ;;  %v2576_v28 = vpop.f32.mrb[63].mxu0  ;;  %v2689_v18 = vpop.f32.mrb[63].mxu1  ;;  %3748 = vmatpush1.bf16.msra.mxu0 %v5473_v43  ;;  %v5479_v9 = vld [vmem:[#allocation7 + $0xf0] ss:$8 sps:$4 sm:$0xff]   ;;  %v7253_v35 = vld [vmem:[#allocation7 + $0x174] ss:$8 sps:$4 sm:$0xff]  }
 0x350   : > { %3051 = vadd.xlane.f32.xlu1 %v3050_v40  ;;  %v2772_v11 = vadd.f32 %v6882_v47, %v2683_v4  ;;  %v2771_v62 = vadd.f32 %v6885_v60, %v2572_v63  ;;  %v2769_v24 = vadd.f32 %v6889_v14, %v2679_v8  ;;  %v7251_v51 = vadd.f32 %v6889_v14, %v2685_v36 }
 0x351   : > { %v2894_v41 = vadd.f32 %v2893_v32, %v7153_v31  ;;  %v2899_v54 = vadd.f32 %v2898_v16, %v7197_v46  ;;  %v2991_v61 = vmul.f32 %v7226_v34, %v7226_v34  ;;  %v7257_v4 = vmax.f32 %v2768_v13, 0.0  ;;  %4966 = vmatprep.subr.bf16.mxu1 %v7241_v50  ;;  %3749 = vmatprep.subr.bf16.mxu0 %v5481_v38  ;;  %v7268_v13 = vld [vmem:[#allocation7 + $0x170] ss:$8 sps:$4 sm:$0xff]  }
 0x352   : > { %v2982_v40 = vmul.f32 %v7153_v31, %v7153_v31  ;;  %v3054_v8 = vadd.f32 %v3053_v23, %v2981_v26  ;;  %v7262_v32 = vmax.f32 %v2770_v6, 0.0  ;;  %v2985_v16 = vmul.f32 %v7170_v3, %v7170_v3  ;;  %4982 = vmatpush1.bf16.msra.mxu1 %v7239_v30 }
 0x353   : > { %2895 = vadd.xlane.f32.xlu0 %v2894_v41  ;;  %v3058_v43 = vadd.f32 %v2984_v33, %v2983_v17  ;;  %v2774_v63 = vadd.f32 %v6878_v49, %v2574_v45  ;;  %v2992_v36 = vmul.f32 %v7229_v15, %v7229_v15  ;;  %v2986_v41 = vmul.f32 %v7197_v46, %v7197_v46 }
 0x354   : > { %8387 = vst [vmem:[#allocation57_spill] sm:$0xff] %v7262_v32  ;;  %2900 = vadd.xlane.f32.xlu1 %v2899_v54  ;;  %v3055_v26 = vadd.f32 %v3054_v8, %v2982_v40  ;;  %v2776_v38 = vadd.f32 %v6882_v47, %v2687_v59  ;;  %v7275_v23 = vmax.f32 %v2771_v62, 0.0  ;;  %v2775_v33 = vadd.f32 %v6885_v60, %v2576_v28 }
 0x355   : > { %v3059_v6 = vadd.f32 %v3058_v43, %v2985_v16  ;;  %v2777_v49 = vadd.f32 %v6889_v14, %v2689_v18  ;;  %3750 = vmatpush1.bf16.msra.mxu0 %v5479_v9  ;;  %4967 = vmatprep.subr.bf16.mxu1 %v7253_v35  ;;  %v7280_v17 = vmax.f32 %v2769_v24, 0.0  ;;  %v7282_v45 = vmax.f32 %v2772_v11, 0.0  ;;  %v7296_v11 = vld [vmem:[#allocation7 + $0x180] ss:$8 sps:$4 sm:$0xff]   ;;  %v7298_v24 = vld [vmem:[#allocation7 + $0x184] ss:$8 sps:$4 sm:$0xff]  }
 0x356   : > { %8388 = vst [vmem:[#allocation58_spill] sm:$0xff] %v7275_v23  ;;  %v2902_v54 = vadd.f32 %v7206_v0, %v7191_v39  ;;  %v2907_v47 = vadd.f32 %v7229_v15, %v7226_v34  ;;  %3832 = vmatprep.subr.bf16.mxu0 %v6871_v53  ;;  %v2995_v60 = vmul.f32 %v7262_v32, %v7262_v32  ;;  %v7291_v28 = vmax.f32 %v2774_v63, 0.0 }
 0x357   : > { %8389 = vst [vmem:[#allocation59_spill] sm:$0xff] %v7282_v45  ;;  %3056 = vadd.xlane.f32.xlu0 %v3055_v26  ;;  %v3060_v14 = vadd.f32 %v3059_v6, %v2986_v41  ;;  %v7293_v59 = vmax.f32 %v2775_v33, 0.0  ;;  %4983 = vmatpush1.bf16.msra.mxu1 %v7268_v13  ;;  %v2989_v53 = vmul.f32 %v7211_v52, %v7211_v52  ;;  %v7308_v8 = vmax.f32 %v2776_v38, 0.0  ;;  %v7326_v33 = vld [vmem:[#allocation7 + $0x194] ss:$8 sps:$4 sm:$0xff]  }
 0x358   : > { %8390 = vst [vmem:[#allocation60_spill] sm:$0xff] %v7291_v28  ;;  %v2903_v62 = vadd.f32 %v2902_v54, %v7211_v52  ;;  %v2908_v18 = vadd.f32 %v2907_v47, %v7257_v4  ;;  %v3063_v9 = vadd.f32 %v7233_v25, %v7217_v22  ;;  %v2996_v40 = vmul.f32 %v7275_v23, %v7275_v23 }
 0x359   : > { %8391 = vst [vmem:[#allocation61_spill] sm:$0xff] %v7293_v59  ;;  %3061 = vadd.xlane.f32.xlu1 %v3060_v14  ;;  %8392 = vst [vmem:[#allocation62_spill] sm:$0xff] %v7308_v8  ;;  %v2993_v16 = vmul.f32 %v7257_v4, %v7257_v4  ;;  %v3068_v43 = vadd.f32 %v2992_v36, %v2991_v61  ;;  %v2912_v6 = vadd.f32 %v7275_v23, %v7262_v32  ;;  %v7324_v36 = vld [vmem:[#allocation7 + $0x190] ss:$8 sps:$4 sm:$0xff]  }
 0x35a   : > { %v2904_v63 = vadd.f32 %v2903_v62, %v7219_v2  ;;  %v2909_v26 = vadd.f32 %v2908_v18, %v7280_v17  ;;  %v3064_v41 = vadd.f32 %v3063_v9, %v2989_v53  ;;  %4968 = vmatprep.subr.bf16.mxu1 %v7298_v24  ;;  %v2999_v25 = vmul.f32 %v7291_v28, %v7291_v28 }
 0x35b   : > { %v3000_v22 = vmul.f32 %v7293_v59, %v7293_v59  ;;  %v3069_v38 = vadd.f32 %v3068_v43, %v2993_v16  ;;  %v2917_v61 = vadd.f32 %v7293_v59, %v7291_v28  ;;  %4984 = vmatpush1.bf16.msra.mxu1 %v7296_v11  ;;  %v2990_v54 = vmul.f32 %v7219_v2, %v7219_v2 }
 0x35c   : > { %2905 = vadd.xlane.f32.xlu0 %v2904_v63  ;;  %v2913_v47 = vadd.f32 %v2912_v6, %v7282_v45  ;;  %v2994_v14 = vmul.f32 %v7280_v17, %v7280_v17  ;;  %v7335_v18 = vmax.f32 %v7251_v51, 0.0  ;;  %v3073_v9 = vadd.f32 %v2996_v40, %v2995_v60  ;;  %4969 = vmatprep.subr.bf16.mxu1 %v7326_v33  ;;  %v7341_v6 = vld [vmem:[#allocation7 + $0x1a4] ss:$8 sps:$4 sm:$0xff]   ;;  %v7346_v51 = vld [vmem:[#allocation7 + $0x1a0] ss:$8 sps:$4 sm:$0xff]  }
 0x35d   : > { %2910 = vadd.xlane.f32.xlu1 %v2909_v26  ;;  %v2918_v62 = vadd.f32 %v2917_v61, %v7308_v8  ;;  %v3065_v53 = vadd.f32 %v3064_v41, %v2990_v54  ;;  %v7338_v16 = vmax.f32 %v2777_v49, 0.0  ;;  %v3078_v63 = vadd.f32 %v3000_v22, %v2999_v25  ;;  %v7353_v25 = vld [vmem:[#allocation7 + $0x1b4] ss:$8 sps:$4 sm:$0xff]  }
 0x35e   : > { %8393 = vst [vmem:[#allocation63_spill] sm:$0xff] %v7335_v18  ;;  %v3070_v43 = vadd.f32 %v3069_v38, %v2994_v14  ;;  %v2914_v26 = vadd.f32 %v2913_v47, %v7335_v18  ;;  %v2997_v61 = vmul.f32 %v7282_v45, %v7282_v45  ;;  %v3001_v49 = vmul.f32 %v7308_v8, %v7308_v8  ;;  %v7357_v38 = vld [vmem:[#allocation7 + $0x1b0] ss:$8 sps:$4 sm:$0xff]  }
 0x35f   : > { %8394 = vst [vmem:[#allocation64_spill] sm:$0xff] %v7338_v16  ;;  %4985 = vmatpush1.bf16.msra.mxu1 %v7324_v36  ;;  %v2919_v60 = vadd.f32 %v2918_v62, %v7338_v16  ;;  %v2998_v22 = vmul.f32 %v7335_v18, %v7335_v18  ;;  %v3002_v54 = vmul.f32 %v7338_v16, %v7338_v16  ;;  %v7363_v62 = vld [vmem:[#allocation7 + $0x1c4] ss:$8 sps:$4 sm:$0xff]  }
 0x360   : > { %3066 = vadd.xlane.f32.xlu0 %v3065_v53  ;;  %4970 = vmatprep.subr.bf16.mxu1 %v7341_v6  ;;  %v3074_v40 = vadd.f32 %v3073_v9, %v2997_v61  ;;  %v3079_v41 = vadd.f32 %v3078_v63, %v3001_v49  ;;  %v7365_v53 = vld [vmem:[#allocation7 + $0x1c0] ss:$8 sps:$4 sm:$0xff]   ;;  %v7369_v9 = vld [vmem:[#allocation7 + $0x1d4] ss:$8 sps:$4 sm:$0xff]   ;;  %v7375_v63 = vld [vmem:[#allocation7 + $0x1e4] ss:$8 sps:$4 sm:$0xff]  }
 0x361   : > { %3071 = vadd.xlane.f32.xlu1 %v3070_v43  ;;  %8395 = vst [vmem:[#allocation65_spill] sm:$0xff] %v7365_v53  ;;  %8396 = vst [vmem:[#allocation66_spill] sm:$0xff] %v7369_v9  ;;  %v7371_v43 = vld [vmem:[#allocation7 + $0x1d0] ss:$8 sps:$4 sm:$0xff]   ;;  %v7381_v61 = vld [vmem:[#allocation7 + $0x1f4] ss:$8 sps:$4 sm:$0xff]  }
 0x362   : > { %v3075_v47 = vadd.f32 %v3074_v40, %v2998_v22  ;;  %v3080_v14 = vadd.f32 %v3079_v41, %v3002_v54  ;;  %8397 = vst [vmem:[#allocation67_spill] sm:$0xff] %v7371_v43  ;;  %8398 = vst [vmem:[#allocation68_spill] sm:$0xff] %v7375_v63 }
 0x363   : > { %4986 = vmatpush1.bf16.msra.mxu1 %v7346_v51  ;;  %8400 = vst [vmem:[#allocation70_spill] sm:$0xff] %v7381_v61 }
 0x364   : > { %2915 = vadd.xlane.f32.xlu0 %v2914_v26  ;;  %4971 = vmatprep.subr.bf16.mxu1 %v7353_v25  ;;  %v7377_v26 = vld [vmem:[#allocation7 + $0x1e0] ss:$8 sps:$4 sm:$0xff]  }
 0x365   : > { %2920 = vadd.xlane.f32.xlu1 %v2919_v60  ;;  %8399 = vst [vmem:[#allocation69_spill] sm:$0xff] %v7377_v26  ;;  %v7383_v60 = vld [vmem:[#allocation7 + $0x1f0] ss:$8 sps:$4 sm:$0xff]  }
 0x366   : > { %8401 = vst [vmem:[#allocation71_spill] sm:$0xff] %v7383_v60 }
 0x367   : > { %4987 = vmatpush1.bf16.msra.mxu1 %v7357_v38 }
 0x368   : > { %3076 = vadd.xlane.f32.xlu0 %v3075_v47  ;;  %4972 = vmatprep.subr.bf16.mxu1 %v7363_v62 }
 0x369   : > { %3081 = vadd.xlane.f32.xlu1 %v3080_v14 }
 0x36b   : > { %4988 = vmatpush1.bf16.msra.mxu1 %v7365_v53 }
 0x36c   : > { %4973 = vmatprep.subr.bf16.mxu1 %v7369_v9 }
 0x36f   : > { %4989 = vmatpush1.bf16.msra.mxu1 %v7371_v43 }
 0x370   : > { %4974 = vmatprep.subr.bf16.mxu1 %v7375_v63 }
 0x373   : > { %4990 = vmatpush1.bf16.msra.mxu1 %v7377_v26 }
 0x374   : > { %4975 = vmatprep.subr.bf16.mxu1 %v7381_v61 }
 0x377   : > { %4991 = vmatpush1.bf16.msra.mxu1 %v7383_v60 }
 0x3ad   : > { %v2846_v49 = vpop.xlane.xlu0 %2845 }
 0x3ae   : > { %v2923_v40 = vmul.f32 0.001953125, %v2846_v49 }
 0x3af   : > { %v2851_v41 = vpop.xlane.xlu1 %2850 }
 0x3b0   : > { %v2924_v22 = vmul.f32 0.001953125, %v2851_v41  ;;  %v3099_v47 = vmul.f32 %v2923_v40, %v2923_v40  ;;  %v3131_v18 = vsub.f32 %v6894_v27, %v2923_v40 }
 0x3b2   : > { %v3007_v54 = vpop.xlane.xlu0 %3006  ;;  %v3100_v63 = vmul.f32 %v2924_v22, %v2924_v22 }
 0x3b3   : > { %v3083_v14 = vmul.f32 0.001953125, %v3007_v54 }
 0x3b4   : > { %v3012_v28 = vpop.xlane.xlu1 %3011 }
 0x3b5   : > { %v3115_v8 = vsub.f32 %v3083_v14, %v3099_v47  ;;  %v3084_v16 = vmul.f32 0.001953125, %v3012_v28 }
 0x3b6   : > { %v2856_v59 = vpop.xlane.xlu0 %2855 }
 0x3b7   : > { %v3195_v26 = vadd.f32 1e-05, %v3115_v8  ;;  %v3116_v43 = vsub.f32 %v3084_v16, %v3100_v63  ;;  %v7387_v45 = vmul.f32 0.001953125, %v2856_v59 }
 0x3b8   : > { %v2861_v61 = vpop.xlane.xlu1 %2860 }
 0x3b9   : > { %5589 = vrsqrt.f32 %v3195_v26  ;;  %v3196_v32 = vadd.f32 1e-05, %v3116_v43  ;;  %v7389_v60 = vmul.f32 0.001953125, %v2861_v61  ;;  %v3101_v41 = vmul.f32 %v7387_v45, %v7387_v45 }
 0x3ba   : > { %v3134_v61 = vsub.f32 %v6915_v29, %v2923_v40  ;;  %v3138_v29 = vsub.f32 %v6926_v58, %v2924_v22 }
 0x3bb   : > { %v3017_v49 = vpop.xlane.xlu0 %3016  ;;  %5591 = vrsqrt.f32 %v3196_v32  ;;  %v3102_v28 = vmul.f32 %v7389_v60, %v7389_v60 }
 0x3bc   : > { %v3085_v54 = vmul.f32 0.001953125, %v3017_v49  ;;  %v3133_v49 = vsub.f32 %v6898_v55, %v2923_v40 }
 0x3be   : > { %v3117_v47 = vsub.f32 %v3085_v54, %v3101_v41  ;;  %v3022_v14 = vpop.xlane.xlu1 %3021  ;;  %v3135_v54 = vsub.f32 %v6906_v12, %v2924_v22 }
 0x3bf   : > { %v3086_v8 = vmul.f32 0.001953125, %v3022_v14 }
 0x3c0   : > { %v3197_v16 = vadd.f32 1e-05, %v3117_v47  ;;  %v2866_v59 = vpop.xlane.xlu0 %2865  ;;  %v3132_v47 = vsub.f32 %v6900_v21, %v2923_v40 }
 0x3c1   : > { %v3118_v63 = vsub.f32 %v3086_v8, %v3102_v28  ;;  %v7395_v26 = vmul.f32 0.001953125, %v2866_v59  ;;  %v3137_v28 = vsub.f32 %v6917_v5, %v2924_v22  ;;  %v3136_v8 = vsub.f32 %v6911_v57, %v2924_v22 }
 0x3c2   : > { %5593 = vrsqrt.f32 %v3197_v16  ;;  %v2871_v43 = vpop.xlane.xlu1 %2870 }
 0x3c3   : > { %v5590_v32 = vpop.eup %5589  ;;  %v3198_v41 = vadd.f32 1e-05, %v3118_v63  ;;  %v7401_v23 = vmul.f32 0.001953125, %v2871_v43  ;;  %v3103_v27 = vmul.f32 %v7395_v26, %v7395_v26 }
 0x3c4   : > { %v7404_v14 = vmul.f32 %v5590_v32, %v3134_v61  ;;  %v3228_v59 = vmul.f32 %v5590_v32, %v3132_v47  ;;  %v3227_v12 = vmul.f32 %v5590_v32, %v3131_v18  ;;  %v7411_v63 = vmul.f32 %v5590_v32, %v3133_v49 }
 0x3c5   : > { %5595 = vrsqrt.f32 %v3198_v41  ;;  %v5592_v16 = vpop.eup %5591  ;;  %v3104_v57 = vmul.f32 %v7401_v23, %v7401_v23 }
 0x3c6   : > { %v3027_v55 = vpop.xlane.xlu0 %3026  ;;  %v3232_v40 = vmul.f32 %v5592_v16, %v3136_v8  ;;  %v3231_v61 = vmul.f32 %v5592_v16, %v3135_v54  ;;  %v7413_v9 = vmul.f32 %v5592_v16, %v3138_v29  ;;  %v7417_v58 = vmul.f32 %v5592_v16, %v3137_v28 }
 0x3c7   : > { %v3087_v43 = vmul.f32 0.001953125, %v3027_v55  ;;  %v3032_v21 = vpop.xlane.xlu1 %3031  ;;  %v3140_v28 = vsub.f32 %v6940_v20, %v7387_v45  ;;  %v3139_v16 = vsub.f32 %v6935_v7, %v7387_v45 }
 0x3c8   : > { %v3088_v5 = vmul.f32 0.001953125, %v3032_v21  ;;  %v3292_v41 = vpack.c.bf16 %v3232_v40, %v3228_v59  ;;  %v3291_v53 = vpack.c.bf16 %v3231_v61, %v3227_v12  ;;  %v5653_v12 = vld [vmem:[#allocation7 + $0x100] ss:$8 sps:$4 sm:$0xff]   ;;  %v3143_v21 = vsub.f32 %v6945_v48, %v7389_v60 }
 0x3c9   : > { %v3119_v22 = vsub.f32 %v3087_v43, %v3103_v27  ;;  %v3142_v27 = vsub.f32 %v6963_v56, %v7387_v45  ;;  %v3144_v43 = vsub.f32 %v6953_v44, %v7389_v60  ;;  %v3146_v56 = vsub.f32 %v6969_v37, %v7389_v60 }
 0x3ca   : > { %v3120_v32 = vsub.f32 %v3088_v5, %v3104_v57  ;;  %3751 = vmatprep.mubr.bf16.mxu0 %v3292_v41  ;;  %v3145_v40 = vsub.f32 %v6965_v42, %v7389_v60 }
 0x3cb   : > { %v2876_v49 = vpop.xlane.xlu0 %2875  ;;  %v3199_v54 = vadd.f32 1e-05, %v3119_v22  ;;  %3752 = vmatmul.mubr.bf16.vlgmr.msra.gmra.mrb[64].mxu0 %v3291_v53  ;;  %v3141_v53 = vsub.f32 %v6951_v19, %v7387_v45 }
 0x3cc   : > { %v7423_v8 = vmul.f32 0.001953125, %v2876_v49  ;;  %v5594_v29 = vpop.eup %5593  ;;  %v3200_v55 = vadd.f32 1e-05, %v3120_v32  ;;  %3833 = vmatpush1.bf16.msra.mxu0 %v5653_v12 }
 0x3cd   : > { %5597 = vrsqrt.f32 %v3199_v54  ;;  %3834 = vmatprep.subr.bf16.mxu0 %v7030_v10  ;;  %v7446_v57 = vmul.f32 %v5594_v29, %v3142_v27  ;;  %v7448_v19 = vmul.f32 %v5594_v29, %v3141_v53  ;;  %v3236_v45 = vmul.f32 %v5594_v29, %v3140_v28  ;;  %v8402_v54 = vld [vmem:[#allocation42_spill] sm:$0xff] }
 0x3ce   : > { %v2881_v59 = vpop.xlane.xlu1 %2880  ;;  %5599 = vrsqrt.f32 %v3200_v55  ;;  %v3105_v44 = vmul.f32 %v7423_v8, %v7423_v8  ;;  %v3235_v22 = vmul.f32 %v5594_v29, %v3139_v16 }
 0x3cf   : > { %v7437_v20 = vmul.f32 0.001953125, %v2881_v59  ;;  %v3037_v7 = vpop.xlane.xlu0 %3036  ;;  %v5596_v61 = vpop.eup %5595 }
 0x3d0   : > { %v3089_v48 = vmul.f32 0.001953125, %v3037_v7  ;;  %v3240_v5 = vmul.f32 %v5596_v61, %v3144_v43  ;;  %v3239_v41 = vmul.f32 %v5596_v61, %v3143_v21  ;;  %3835 = vmatpush1.bf16.msra.mxu0 %v7028_v1  ;;  %v7451_v37 = vmul.f32 %v5596_v61, %v3146_v56  ;;  %v8403_v21 = vld [vmem:[#allocation41_spill] sm:$0xff] }
 0x3d1   : > { %v7453_v32 = vmul.f32 %v5596_v61, %v3145_v40  ;;  %v3106_v42 = vmul.f32 %v7437_v20, %v7437_v20  ;;  %3836 = vmatprep.subr.bf16.mxu0 %v8402_v54  ;;  %v8404_v40 = vld [vmem:[#allocation47_spill] sm:$0xff] }
 0x3d2   : > { %v3121_v10 = vsub.f32 %v3089_v48, %v3105_v44  ;;  %v3296_v49 = vpack.c.bf16 %v3240_v5, %v3236_v45  ;;  %v3295_v55 = vpack.c.bf16 %v3239_v41, %v3235_v22  ;;  %v8405_v61 = vld [vmem:[#allocation23_spill] sm:$0xff]  ;;  %v8406_v48 = vld [vmem:[#allocation22_spill] sm:$0xff] }
 0x3d3   : > { %v3042_v60 = vpop.xlane.xlu1 %3041  ;;  %v3148_v44 = vsub.f32 %v8405_v61, %v7395_v26  ;;  %v3147_v45 = vsub.f32 %v8406_v48, %v7395_v26  ;;  %v8407_v41 = vld [vmem:[#allocation26_spill] sm:$0xff] }
 0x3d4   : > { %v3201_v27 = vadd.f32 1e-05, %v3121_v10  ;;  %v3090_v28 = vmul.f32 0.001953125, %v3042_v60  ;;  %3761 = vmatprep.mubr.bf16.mxu0 %v3296_v49  ;;  %3837 = vmatpush1.bf16.msra.mxu0 %v8403_v21  ;;  %v3152_v10 = vsub.f32 %v8407_v41, %v7401_v23  ;;  %v8409_v49 = vld [vmem:[#allocation27_spill] sm:$0xff]  ;;  %v8412_v21 = vld [vmem:[#allocation44_spill] sm:$0xff] }
 0x3d5   : > { %3762 = vmatmul.mubr.bf16.gmra.mrb[68].mxu0 %v3295_v55  ;;  %3838 = vmatprep.subr.bf16.mxu0 %v8404_v40  ;;  %v3150_v54 = vsub.f32 %v8409_v49, %v7395_v26  ;;  %v8410_v55 = vld [vmem:[#allocation30_spill] sm:$0xff] }
 0x3d6   : > { %v2886_v16 = vpop.xlane.xlu0 %2885  ;;  %5601 = vrsqrt.f32 %v3201_v27  ;;  %v3122_v59 = vsub.f32 %v3090_v28, %v3106_v42  ;;  %v8408_v42 = vld [vmem:[#allocation21_spill] sm:$0xff]  ;;  %v3154_v27 = vsub.f32 %v8410_v55, %v7401_v23  ;;  %v8413_v55 = vld [vmem:[#allocation52_spill] sm:$0xff] }
 0x3d7   : > { %v7462_v12 = vmul.f32 0.001953125, %v2886_v16  ;;  %v2891_v43 = vpop.xlane.xlu1 %2890  ;;  %v5598_v53 = vpop.eup %5597  ;;  %v3151_v60 = vsub.f32 %v8408_v42, %v7401_v23 }
 0x3d8   : > { %v3202_v7 = vadd.f32 1e-05, %v3122_v59  ;;  %v7465_v56 = vmul.f32 0.001953125, %v2891_v43  ;;  %v5600_v5 = vpop.eup %5599  ;;  %v8411_v59 = vld [vmem:[#allocation25_spill] sm:$0xff]  ;;  %3839 = vmatpush1.bf16.msra.mxu0 %v8412_v21  ;;  %v3244_v40 = vmul.f32 %v5598_v53, %v3148_v44  ;;  %v3243_v48 = vmul.f32 %v5598_v53, %v3147_v45 }
 0x3d9   : > { %v3107_v28 = vmul.f32 %v7462_v12, %v7462_v12  ;;  %v3149_v43 = vsub.f32 %v8411_v59, %v7395_v26  ;;  %v3248_v61 = vmul.f32 %v5600_v5, %v3152_v10  ;;  %v3247_v41 = vmul.f32 %v5600_v5, %v3151_v60  ;;  %3840 = vmatprep.subr.bf16.mxu0 %v8413_v55 }
 0x3da   : > { %v3047_v22 = vpop.xlane.xlu0 %3046  ;;  %5603 = vrsqrt.f32 %v3202_v7  ;;  %v3108_v49 = vmul.f32 %v7465_v56, %v7465_v56  ;;  %v7488_v7 = vmul.f32 %v5598_v53, %v3150_v54  ;;  %v7492_v21 = vmul.f32 %v5600_v5, %v3154_v27  ;;  %v8417_v27 = vld [vmem:[#allocation55_spill] sm:$0xff] }
 0x3db   : > { %v3091_v16 = vmul.f32 0.001953125, %v3047_v22  ;;  %v8414_v22 = vld [vmem:[#allocation29_spill] sm:$0xff]  ;;  %v3300_v26 = vpack.c.bf16 %v3248_v61, %v3244_v40  ;;  %v3299_v59 = vpack.c.bf16 %v3247_v41, %v3243_v48  ;;  %v7494_v45 = vmul.f32 %v5598_v53, %v3149_v43  ;;  %v8419_v40 = vld [vmem:[#allocation24_spill] sm:$0xff]  ;;  %v8420_v48 = vld [vmem:[#allocation35_spill] sm:$0xff] }
 0x3dc   : > { %v3153_v29 = vsub.f32 %v8414_v22, %v7401_v23  ;;  %v3155_v61 = vsub.f32 %v8419_v40, %v7423_v8  ;;  %v3160_v41 = vsub.f32 %v8420_v48, %v7437_v20  ;;  %v8422_v22 = vld [vmem:[#allocation32_spill] sm:$0xff] }
 0x3dd   : > { %v3123_v42 = vsub.f32 %v3091_v16, %v3107_v28  ;;  %v3052_v1 = vpop.xlane.xlu1 %3051  ;;  %8415 = vst [vmem:[#allocation42_spill] sm:$0xff] %v7494_v45  ;;  %3771 = vmatprep.mubr.bf16.mxu0 %v3300_v26  ;;  %v8416_v16 = vld [vmem:[#allocation51_spill] sm:$0xff]  ;;  %v3158_v26 = vsub.f32 %v8422_v22, %v7423_v8 }
 0x3de   : > { %v3092_v47 = vmul.f32 0.001953125, %v3052_v1  ;;  %v7496_v10 = vmul.f32 %v5600_v5, %v3153_v29  ;;  %3841 = vmatpush1.bf16.msra.mxu0 %v8416_v16  ;;  %v8418_v5 = vld [vmem:[#allocation28_spill] sm:$0xff] }
 0x3df   : > { %v3203_v44 = vadd.f32 1e-05, %v3123_v42  ;;  %3772 = vmatmul.mubr.bf16.gmra.mrb[72].mxu0 %v3299_v59  ;;  %3842 = vmatprep.subr.bf16.mxu0 %v8417_v27  ;;  %v3156_v43 = vsub.f32 %v8418_v5, %v7423_v8  ;;  %v8421_v42 = vld [vmem:[#allocation34_spill] sm:$0xff]  ;;  %v8426_v5 = vld [vmem:[#allocation37_spill] sm:$0xff] }
 0x3e0   : > { %v3124_v60 = vsub.f32 %v3092_v47, %v3108_v49  ;;  %v2896_v28 = vpop.xlane.xlu0 %2895  ;;  %v5602_v55 = vpop.eup %5601  ;;  %v3159_v49 = vsub.f32 %v8421_v42, %v7437_v20  ;;  %v8423_v59 = vld [vmem:[#allocation38_spill] sm:$0xff]  ;;  %v3161_v40 = vsub.f32 %v8426_v5, %v7437_v20 }
 0x3e1   : > { %5605 = vrsqrt.f32 %v3203_v44  ;;  %v7501_v23 = vmul.f32 0.001953125, %v2896_v28  ;;  %v2901_v1 = vpop.xlane.xlu1 %2900  ;;  %v3162_v44 = vsub.f32 %v8423_v59, %v7437_v20  ;;  %v8424_v28 = vld [vmem:[#allocation56_spill] sm:$0xff]  ;;  %v3252_v16 = vmul.f32 %v5602_v55, %v3156_v43 }
 0x3e2   : > { %v3204_v53 = vadd.f32 1e-05, %v3124_v60  ;;  %v7506_v47 = vmul.f32 0.001953125, %v2901_v1  ;;  %3843 = vmatpush1.bf16.msra.mxu0 %v8424_v28  ;;  %v8425_v1 = vld [vmem:[#allocation31_spill] sm:$0xff]  ;;  %v7530_v54 = vmul.f32 %v5602_v55, %v3158_v26 }
 0x3e3   : > { %v3157_v27 = vsub.f32 %v8425_v1, %v7423_v8  ;;  %v3109_v42 = vmul.f32 %v7501_v23, %v7501_v23  ;;  %3844 = vmatprep.subr.bf16.mxu0 %v7241_v50 }
 0x3e4   : > { %5607 = vrsqrt.f32 %v3204_v53  ;;  %v3057_v60 = vpop.xlane.xlu0 %3056  ;;  %v5604_v48 = vpop.eup %5603  ;;  %v3110_v22 = vmul.f32 %v7506_v47, %v7506_v47  ;;  %v3251_v53 = vmul.f32 %v5602_v55, %v3155_v61  ;;  %8427 = vst [vmem:[#allocation41_spill] sm:$0xff] %v7530_v54 }
 0x3e5   : > { %v3093_v29 = vmul.f32 0.001953125, %v3057_v60  ;;  %v3256_v28 = vmul.f32 %v5604_v48, %v3160_v41  ;;  %v3255_v43 = vmul.f32 %v5604_v48, %v3159_v49  ;;  %v7532_v8 = vmul.f32 %v5604_v48, %v3162_v44 }
 0x3e6   : > { %v3062_v59 = vpop.xlane.xlu1 %3061  ;;  %v7534_v5 = vmul.f32 %v5602_v55, %v3157_v27  ;;  %v7536_v18 = vmul.f32 %v5604_v48, %v3161_v40  ;;  %3845 = vmatpush1.bf16.msra.mxu0 %v7239_v30  ;;  %v8431_v55 = vld [vmem:[#allocation43_spill] sm:$0xff] }
 0x3e7   : > { %8428 = vst [vmem:[#allocation47_spill] sm:$0xff] %v7532_v8  ;;  %v3125_v1 = vsub.f32 %v3093_v29, %v3109_v42  ;;  %v3094_v20 = vmul.f32 0.001953125, %v3062_v59  ;;  %v3304_v60 = vpack.c.bf16 %v3256_v28, %v3252_v16  ;;  %v3303_v45 = vpack.c.bf16 %v3255_v43, %v3251_v53  ;;  %3846 = vmatprep.subr.bf16.mxu0 %v7253_v35  ;;  %v8432_v30 = vld [vmem:[#allocation39_spill] sm:$0xff]  ;;  %v8433_v35 = vld [vmem:[#allocation40_spill] sm:$0xff]  ;;  %v8434_v53 = vld [vmem:[#allocation45_spill] sm:$0xff] }
 0x3e8   : > { %8429 = vst [vmem:[#allocation23_spill] sm:$0xff] %v7534_v5  ;;  %8430 = vst [vmem:[#allocation22_spill] sm:$0xff] %v7536_v18  ;;  %v3165_v26 = vsub.f32 %v8431_v55, %v7462_v12  ;;  %v3164_v27 = vsub.f32 %v8432_v30, %v7462_v12  ;;  %v3169_v59 = vsub.f32 %v8434_v53, %v7465_v56  ;;  %v8435_v28 = vld [vmem:[#allocation46_spill] sm:$0xff]  ;;  %v8438_v55 = vld [vmem:[#allocation36_spill] sm:$0xff] }
 0x3e9   : > { %v3205_v61 = vadd.f32 1e-05, %v3125_v1  ;;  %v3126_v41 = vsub.f32 %v3094_v20, %v3110_v22  ;;  %v2906_v49 = vpop.xlane.xlu0 %2905  ;;  %3781 = vmatprep.mubr.bf16.mxu0 %v3304_v60  ;;  %v3166_v22 = vsub.f32 %v8433_v35, %v7462_v12  ;;  %v3168_v43 = vsub.f32 %v8435_v28, %v7465_v56  ;;  %v8436_v1 = vld [vmem:[#allocation48_spill] sm:$0xff]  ;;  %v8437_v60 = vld [vmem:[#allocation33_spill] sm:$0xff] }
 0x3ea   : > { %v7546_v44 = vmul.f32 0.001953125, %v2906_v49  ;;  %v2911_v16 = vpop.xlane.xlu1 %2910  ;;  %3782 = vmatmul.mubr.bf16.gmra.mrb[76].mxu0 %v3303_v45  ;;  %v3170_v20 = vsub.f32 %v8436_v1, %v7465_v56 }
 0x3eb   : > { %v5606_v40 = vpop.eup %5605  ;;  %5609 = vrsqrt.f32 %v3205_v61  ;;  %v3206_v48 = vadd.f32 1e-05, %v3126_v41  ;;  %v7550_v42 = vmul.f32 0.001953125, %v2911_v16  ;;  %3847 = vmatpush1.bf16.msra.mxu0 %v7268_v13  ;;  %v3163_v61 = vsub.f32 %v8437_v60, %v7462_v12 }
 0x3ec   : > { %v3111_v45 = vmul.f32 %v7546_v44, %v7546_v44  ;;  %v3260_v49 = vmul.f32 %v5606_v40, %v3164_v27  ;;  %3848 = vmatprep.subr.bf16.mxu0 %v7298_v24  ;;  %v3167_v13 = vsub.f32 %v8438_v55, %v7465_v56  ;;  %v3262_v28 = vmul.f32 %v5606_v40, %v3166_v22 }
 0x3ed   : > { %5611 = vrsqrt.f32 %v3206_v48  ;;  %v3067_v41 = vpop.xlane.xlu0 %3066  ;;  %v3112_v35 = vmul.f32 %v7550_v42, %v7550_v42  ;;  %v3259_v1 = vmul.f32 %v5606_v40, %v3163_v61  ;;  %v3261_v27 = vmul.f32 %v5606_v40, %v3165_v26 }
 0x3ee   : > { %v5608_v16 = vpop.eup %5607  ;;  %v3095_v30 = vmul.f32 0.001953125, %v3067_v41  ;;  %v3072_v53 = vpop.xlane.xlu1 %3071 }
 0x3ef   : > { %v3096_v12 = vmul.f32 0.001953125, %v3072_v53  ;;  %v3264_v48 = vmul.f32 %v5608_v16, %v3168_v43  ;;  %v3266_v60 = vmul.f32 %v5608_v16, %v3170_v20  ;;  %v3263_v29 = vmul.f32 %v5608_v16, %v3167_v13  ;;  %3849 = vmatpush1.bf16.msra.mxu0 %v7296_v11  ;;  %v8439_v11 = vld [vmem:[#allocation50_spill] sm:$0xff]  ;;  %v8443_v13 = vld [vmem:[#allocation49_spill] sm:$0xff] }
 0x3f0   : > { %v3127_v50 = vsub.f32 %v3095_v30, %v3111_v45  ;;  %v3265_v24 = vmul.f32 %v5608_v16, %v3169_v59  ;;  %3850 = vmatprep.subr.bf16.mxu0 %v7326_v33  ;;  %v3172_v26 = vsub.f32 %v8439_v11, %v7501_v23  ;;  %v3174_v33 = vsub.f32 %v7153_v31, %v7501_v23 }
 0x3f1   : > { %v3128_v5 = vsub.f32 %v3096_v12, %v3112_v35  ;;  %v2916_v18 = vpop.xlane.xlu0 %2915  ;;  %v3308_v56 = vpack.c.bf16 %v3264_v48, %v3260_v49  ;;  %v3310_v55 = vpack.c.bf16 %v3266_v60, %v3262_v28  ;;  %v3307_v41 = vpack.c.bf16 %v3263_v29, %v3259_v1  ;;  %v8440_v29 = vld [vmem:[#allocation54_spill] sm:$0xff] }
 0x3f2   : > { %v3207_v54 = vadd.f32 1e-05, %v3127_v50  ;;  %v7572_v8 = vmul.f32 0.001953125, %v2916_v18  ;;  %v2921_v22 = vpop.xlane.xlu1 %2920  ;;  %v3309_v61 = vpack.c.bf16 %v3265_v24, %v3261_v27  ;;  %v3176_v40 = vsub.f32 %v8440_v29, %v7506_v47  ;;  %v8441_v18 = vld [vmem:[#allocation18_spill] sm:$0xff] }
 0x3f3   : > { %v3208_v43 = vadd.f32 1e-05, %v3128_v5  ;;  %v7574_v20 = vmul.f32 0.001953125, %v2921_v22  ;;  %3791 = vmatprep.mubr.bf16.mxu0 %v3308_v56  ;;  %3904 = vmatprep.mubr.bf16.mxu1 %v3310_v55  ;;  %v3171_v50 = vsub.f32 %v8441_v18, %v7501_v23  ;;  %v3178_v45 = vsub.f32 %v7197_v46, %v7506_v47 }
 0x3f4   : > { %5613 = vrsqrt.f32 %v3207_v54  ;;  %3792 = vmatmul.mubr.bf16.gmra.mrb[80].mxu0 %v3307_v41  ;;  %3905 = vmatmul.mubr.bf16.vlgmr.msra.gmra.mrb[64].mxu1 %v3309_v61  ;;  %v8442_v54 = vld [vmem:[#allocation53_spill] sm:$0xff]  ;;  %v3173_v16 = vsub.f32 %v8443_v13, %v7501_v23  ;;  %v3113_v31 = vmul.f32 %v7572_v8, %v7572_v8  ;;  %v3180_v11 = vsub.f32 %v7206_v0, %v7546_v44  ;;  %v8445_v13 = vld [vmem:[#allocation66_spill] sm:$0xff] }
 0x3f5   : > { %v5610_v5 = vpop.eup %5609  ;;  %5615 = vrsqrt.f32 %v3208_v43  ;;  %v3077_v59 = vpop.xlane.xlu0 %3076  ;;  %3851 = vmatpush1.bf16.msra.mxu0 %v7324_v36  ;;  %v3175_v49 = vsub.f32 %v8442_v54, %v7506_v47  ;;  %v3114_v35 = vmul.f32 %v7574_v20, %v7574_v20  ;;  %v3177_v36 = vsub.f32 %v7170_v3, %v7506_v47 }
 0x3f6   : > { %v3097_v30 = vmul.f32 0.001953125, %v3077_v59  ;;  %v3082_v53 = vpop.xlane.xlu1 %3081  ;;  %3852 = vmatprep.subr.bf16.mxu0 %v7341_v6  ;;  %v3268_v1 = vmul.f32 %v5610_v5, %v3172_v26  ;;  %v3270_v12 = vmul.f32 %v5610_v5, %v3174_v33  ;;  %v3267_v48 = vmul.f32 %v5610_v5, %v3171_v50 }
 0x3f7   : > { %v5612_v46 = vpop.eup %5611  ;;  %v3098_v28 = vmul.f32 0.001953125, %v3082_v53  ;;  %v3269_v55 = vmul.f32 %v5610_v5, %v3173_v16  ;;  %v3179_v26 = vsub.f32 %v7191_v39, %v7546_v44  ;;  %v3186_v0 = vsub.f32 %v7280_v17, %v7550_v42 }
 0x3f8   : > { %v3129_v60 = vsub.f32 %v3097_v30, %v3113_v31  ;;  %v3272_v23 = vmul.f32 %v5612_v46, %v3176_v40  ;;  %v3274_v27 = vmul.f32 %v5612_v46, %v3178_v45  ;;  %v3271_v24 = vmul.f32 %v5612_v46, %v3175_v49  ;;  %v8444_v49 = vld [vmem:[#allocation65_spill] sm:$0xff] }
 0x3f9   : > { %v3130_v56 = vsub.f32 %v3098_v28, %v3114_v35  ;;  %3853 = vmatpush1.bf16.msra.mxu0 %v7346_v51  ;;  %v3273_v41 = vmul.f32 %v5612_v46, %v3177_v36  ;;  %v3182_v51 = vsub.f32 %v7219_v2, %v7546_v44  ;;  %v3184_v40 = vsub.f32 %v7229_v15, %v7550_v42  ;;  %v8448_v31 = vld [vmem:[#allocation57_spill] sm:$0xff]  ;;  %v8449_v35 = vld [vmem:[#allocation59_spill] sm:$0xff] }
 0x3fa   : > { %v3209_v22 = vadd.f32 1e-05, %v3129_v60  ;;  %v3312_v61 = vpack.c.bf16 %v3272_v23, %v3268_v1  ;;  %v3314_v6 = vpack.c.bf16 %v3274_v27, %v3270_v12  ;;  %v3311_v43 = vpack.c.bf16 %v3271_v24, %v3267_v48  ;;  %3854 = vmatprep.subr.bf16.mxu0 %v7353_v25  ;;  %v8450_v46 = vld [vmem:[#allocation67_spill] sm:$0xff]  ;;  %v8451_v28 = vld [vmem:[#allocation61_spill] sm:$0xff]  ;;  %v8452_v12 = vld [vmem:[#allocation64_spill] sm:$0xff] }
 0x3fb   : > { %v3210_v3 = vadd.f32 1e-05, %v3130_v56  ;;  %v3313_v47 = vpack.c.bf16 %v3273_v41, %v3269_v55  ;;  %v3181_v25 = vsub.f32 %v7211_v52, %v7546_v44  ;;  %v3183_v33 = vsub.f32 %v7226_v34, %v7550_v42  ;;  %v8453_v60 = vld [vmem:[#allocation60_spill] sm:$0xff]  ;;  %v8454_v27 = vld [vmem:[#allocation62_spill] sm:$0xff] }
 0x3fc   : > { %5617 = vrsqrt.f32 %v3209_v22  ;;  %3801 = vmatprep.mubr.bf16.mxu0 %v3312_v61  ;;  %3914 = vmatprep.mubr.bf16.mxu1 %v3314_v6  ;;  %v3185_v2 = vsub.f32 %v7257_v4, %v7550_v42  ;;  %v8446_v4 = vld [vmem:[#allocation58_spill] sm:$0xff]  ;;  %v8447_v42 = vld [vmem:[#allocation63_spill] sm:$0xff]  ;;  %v3187_v30 = vsub.f32 %v8448_v31, %v7572_v8  ;;  %v3189_v53 = vsub.f32 %v8449_v35, %v7572_v8  ;;  %v8455_v41 = vld [vmem:[#allocation68_spill] sm:$0xff] }
 0x3fd   : > { %5619 = vrsqrt.f32 %v3210_v3  ;;  %3802 = vmatmul.mubr.bf16.gmra.mrb[84].mxu0 %v3311_v43  ;;  %3915 = vmatmul.mubr.bf16.gmra.mrb[68].mxu1 %v3313_v47  ;;  %v3190_v16 = vsub.f32 %v8447_v42, %v7572_v8  ;;  %v3192_v1 = vsub.f32 %v8451_v28, %v7574_v20  ;;  %v3194_v48 = vsub.f32 %v8452_v12, %v7574_v20 }
 0x3fe   : > { %v5614_v29 = vpop.eup %5613  ;;  %3855 = vmatpush1.bf16.msra.mxu0 %v7357_v38  ;;  %v3191_v23 = vsub.f32 %v8453_v60, %v7574_v20  ;;  %v3193_v24 = vsub.f32 %v8454_v27, %v7574_v20  ;;  %v8458_v20 = vpack.c.bf16 %v7413_v9, %v7404_v14  ;;  %v8464_v9 = vld [vmem:[#allocation42_spill] sm:$0xff] }
 0x3ff   : > { %v5616_v18 = vpop.eup %5615  ;;  %v3276_v39 = vmul.f32 %v5614_v29, %v3180_v11  ;;  %3856 = vmatprep.subr.bf16.mxu0 %v7363_v62  ;;  %v3278_v52 = vmul.f32 %v5614_v29, %v3182_v51  ;;  %v3275_v44 = vmul.f32 %v5614_v29, %v3179_v26  ;;  %v3277_v50 = vmul.f32 %v5614_v29, %v3181_v25  ;;  %v8456_v25 = vld [vmem:[#allocation69_spill] sm:$0xff] }
 0x400   : > { %v3280_v38 = vmul.f32 %v5616_v18, %v3184_v40  ;;  %v3282_v5 = vmul.f32 %v5616_v18, %v3186_v0  ;;  %v3279_v59 = vmul.f32 %v5616_v18, %v3183_v33  ;;  %v3281_v15 = vmul.f32 %v5616_v18, %v3185_v2  ;;  %v8457_v40 = vld [vmem:[#allocation70_spill] sm:$0xff]  ;;  %v8459_v0 = vld [vmem:[#allocation71_spill] sm:$0xff] }
 0x401   : > { %v3188_v62 = vsub.f32 %v8446_v4, %v7572_v8  ;;  %v8460_v33 = vpack.c.bf16 %v7417_v58, %v7411_v63  ;;  %v8461_v2 = vpack.c.bf16 %v7451_v37, %v7446_v57  ;;  %v8462_v18 = vpack.c.bf16 %v7453_v32, %v7448_v19  ;;  %v8469_v58 = vld [vmem:[#allocation22_spill] sm:$0xff]  ;;  %v5511_v32 = vld [vmem:[%s8168_s8 + $0x48] sm:$0xff]  }
 0x402   : > { %v3316_v45 = vpack.c.bf16 %v3280_v38, %v3276_v39  ;;  %v3318_v54 = vpack.c.bf16 %v3282_v5, %v3278_v52  ;;  %v3315_v17 = vpack.c.bf16 %v3279_v59, %v3275_v44  ;;  %3857 = vmatpush1.bf16.msra.mxu0 %v8444_v49  ;;  %v3317_v34 = vpack.c.bf16 %v3281_v15, %v3277_v50  ;;  %v8466_v52 = vld [vmem:[#allocation47_spill] sm:$0xff]  ;;  %v8467_v44 = vld [vmem:[#allocation41_spill] sm:$0xff]  ;;  %v5509_v19 = vld [vmem:[%s8168_s8 + $0x40] sm:$0xff]  }
 0x403   : > { %3858 = vmatprep.subr.bf16.mxu0 %v8445_v13  ;;  %v8463_v39 = vpack.c.bf16 %v7492_v21, %v7488_v7  ;;  %v8465_v14 = vpack.c.bf16 %v7496_v10, %v8464_v9  ;;  %v8468_v63 = vpack.c.bf16 %v8466_v52, %v8467_v44  ;;  %v8470_v50 = vld [vmem:[#allocation23_spill] sm:$0xff]  ;;  %v5510_v37 = vld [vmem:[%s8168_s8] sm:$0xff]   ;;  %4896 = vmatprep.subr.bf16.mxu1 %v5509_v19  ;;  %v8473_v38 = vld [vmem:[#allocation20_spill] sm:$0xff] }
 0x404   : > { %3811 = vmatprep.mubr.bf16.mxu0 %v3316_v45  ;;  %3924 = vmatprep.mubr.bf16.mxu1 %v3318_v54  ;;  %v8471_v57 = vpack.c.bf16 %v8469_v58, %v8470_v50  ;;  %v3387_v7 = vld [vmem:[%s8167_s7] sm:$0x3]  ;;  %v8472_v21 = vld [vmem:[#allocation19_spill] sm:$0xff] }
 0x405   : > { %3812 = vmatmul.mubr.bf16.gmra.mrb[88].mxu0 %v3315_v17  ;;  %3925 = vmatmul.mubr.bf16.gmra.mrb[72].mxu1 %v3317_v34  ;;  %v7678_v10 = vrot.slane %v3387_v7, %v8472_v21  ;;  %v7681_v5 = vrot.slane %v3387_v7, %v8473_v38 }
 0x406   : > { %v5618_v36 = vpop.eup %5617  ;;  %3859 = vmatpush1.bf16.msra.mxu0 %v8450_v46  ;;  %4897 = vmatpush3.bf16.msra.mxu1 %v5510_v37 }
 0x407   : > { %v5620_v56 = vpop.eup %5619  ;;  %v3284_v55 = vmul.f32 %v5618_v36, %v3188_v62  ;;  %3860 = vmatprep.subr.bf16.mxu0 %v8455_v41  ;;  %v3286_v8 = vmul.f32 %v5618_v36, %v3190_v16  ;;  %v3283_v22 = vmul.f32 %v5618_v36, %v3187_v30  ;;  %v3285_v61 = vmul.f32 %v5618_v36, %v3189_v53 }
 0x408   : > { %v3288_v6 = vmul.f32 %v5620_v56, %v3192_v1  ;;  %v3290_v43 = vmul.f32 %v5620_v56, %v3194_v48  ;;  %v3287_v3 = vmul.f32 %v5620_v56, %v3191_v23  ;;  %v3289_v47 = vmul.f32 %v5620_v56, %v3193_v24  ;;  %4898 = vmatprep.subr.bf16.mxu1 %v5511_v32 }
 0x40a   : > { %v3320_v11 = vpack.c.bf16 %v3288_v6, %v3284_v55  ;;  %v3322_v51 = vpack.c.bf16 %v3290_v43, %v3286_v8  ;;  %v3319_v26 = vpack.c.bf16 %v3287_v3, %v3283_v22  ;;  %3861 = vmatpush1.bf16.msra.mxu0 %v8456_v25  ;;  %v3321_v29 = vpack.c.bf16 %v3289_v47, %v3285_v61 }
 0x40b   : > { %3862 = vmatprep.subr.bf16.mxu0 %v8457_v40 }
 0x40c   : > { %3821 = vmatprep.mubr.bf16.mxu0 %v3320_v11  ;;  %3934 = vmatprep.mubr.bf16.mxu1 %v3322_v51 }
 0x40d   : > { %3822 = vmatmul.mubr.bf16.gmra.mrb[92].mxu0 %v3319_v26  ;;  %3935 = vmatmul.mubr.bf16.gmra.mrb[76].mxu1 %v3321_v29 }
 0x40e   : > { %3864 = vmatprep.mubr.bf16.mxu0 %v8458_v20  ;;  %3863 = vmatpush1.bf16.msra.mxu0 %v8459_v0 }
 0x415   : > { %3865 = vmatmul.mubr.bf16.vlgmr.msra.gmra.mrb[64].mxu0 %v8460_v33 }
 0x416   : > { %3874 = vmatprep.mubr.bf16.mxu0 %v8461_v2 }
 0x41d   : > { %3875 = vmatmul.mubr.bf16.gmra.mrb[68].mxu0 %v8462_v18 }
 0x41e   : > { %3884 = vmatprep.mubr.bf16.mxu0 %v8463_v39 }
 0x425   : > { %3885 = vmatmul.mubr.bf16.gmra.mrb[72].mxu0 %v8465_v14 }
 0x426   : > { %3894 = vmatprep.mubr.bf16.mxu0 %v8468_v63 }
 0x42d   : > { %3895 = vmatmul.mubr.bf16.gmra.mrb[76].mxu0 %v8471_v57 }
 0x4c7   : > { %v3793_v59 = vpop.f32.mrb[80].mxu0  ;;  %v3906_v15 = vpop.f32.mrb[64].mxu1 }
 0x4c8   : > { %v3794_v45 = vadd.f32 %v3793_v59, %v7678_v10  ;;  %v3795_v54 = vpop.f32.mrb[81].mxu0  ;;  %v3908_v17 = vpop.f32.mrb[65].mxu1 }
 0x4c9   : > { %v3796_v49 = vadd.f32 %v3795_v54, %v7681_v5  ;;  %v3797_v34 = vpop.f32.mrb[82].mxu0  ;;  %v3910_v13 = vpop.f32.mrb[66].mxu1 }
 0x4ca   : > { %v7685_v4 = vadd.f32 %v3906_v15, %v3794_v45  ;;  %v3798_v62 = vadd.f32 %v3797_v34, %v7678_v10  ;;  %v3799_v42 = vpop.f32.mrb[83].mxu0  ;;  %v3912_v16 = vpop.f32.mrb[67].mxu1 }
 0x4cb   : > { %v7688_v31 = vadd.f32 %v3908_v17, %v3796_v49  ;;  %v3800_v30 = vadd.f32 %v3799_v42, %v7681_v5 }
 0x4cc   : > { %v7691_v35 = vadd.f32 %v3910_v13, %v3798_v62 }
 0x4cd   : > { %v7693_v53 = vadd.f32 %v3912_v16, %v3800_v30 }
 0x4d0   : > { %v3803_v36 = vpop.f32.mrb[84].mxu0  ;;  %v3916_v46 = vpop.f32.mrb[68].mxu1 }
 0x4d1   : > { %v3804_v28 = vadd.f32 %v3803_v36, %v7678_v10  ;;  %v3805_v1 = vpop.f32.mrb[85].mxu0  ;;  %v3918_v12 = vpop.f32.mrb[69].mxu1 }
 0x4d2   : > { %v3806_v48 = vadd.f32 %v3805_v1, %v7681_v5  ;;  %v3807_v60 = vpop.f32.mrb[86].mxu0  ;;  %v3920_v23 = vpop.f32.mrb[70].mxu1 }
 0x4d3   : > { %v7697_v27 = vadd.f32 %v3916_v46, %v3804_v28  ;;  %v3808_v24 = vadd.f32 %v3807_v60, %v7678_v10  ;;  %v3809_v56 = vpop.f32.mrb[87].mxu0  ;;  %v3922_v55 = vpop.f32.mrb[71].mxu1 }
 0x4d4   : > { %v7700_v41 = vadd.f32 %v3918_v12, %v3806_v48  ;;  %v3810_v8 = vadd.f32 %v3809_v56, %v7681_v5 }
 0x4d5   : > { %v7703_v22 = vadd.f32 %v3920_v23, %v3808_v24 }
 0x4d6   : > { %v7705_v61 = vadd.f32 %v3922_v55, %v3810_v8 }
 0x4d8   : > { %v3813_v6 = vpop.f32.mrb[88].mxu0  ;;  %v3926_v43 = vpop.f32.mrb[72].mxu1 }
 0x4d9   : > { %v3814_v3 = vadd.f32 %v3813_v6, %v7678_v10  ;;  %v3815_v47 = vpop.f32.mrb[89].mxu0  ;;  %v3928_v11 = vpop.f32.mrb[73].mxu1 }
 0x4da   : > { %v3816_v51 = vadd.f32 %v3815_v47, %v7681_v5  ;;  %v3817_v26 = vpop.f32.mrb[90].mxu0  ;;  %v3930_v25 = vpop.f32.mrb[74].mxu1 }
 0x4db   : > { %v7709_v29 = vadd.f32 %v3926_v43, %v3814_v3  ;;  %v3818_v40 = vadd.f32 %v3817_v26, %v7678_v10  ;;  %v3819_v20 = vpop.f32.mrb[91].mxu0  ;;  %v3932_v0 = vpop.f32.mrb[75].mxu1 }
 0x4dc   : > { %v7712_v33 = vadd.f32 %v3928_v11, %v3816_v51  ;;  %v3820_v2 = vadd.f32 %v3819_v20, %v7681_v5 }
 0x4dd   : > { %v7715_v18 = vadd.f32 %v3930_v25, %v3818_v40 }
 0x4de   : > { %v7717_v39 = vadd.f32 %v3932_v0, %v3820_v2 }
 0x4e0   : > { %v3823_v9 = vpop.f32.mrb[92].mxu0  ;;  %v3936_v14 = vpop.f32.mrb[76].mxu1 }
 0x4e1   : > { %v3824_v52 = vadd.f32 %v3823_v9, %v7678_v10  ;;  %v3825_v44 = vpop.f32.mrb[93].mxu0  ;;  %v3938_v63 = vpop.f32.mrb[77].mxu1 }
 0x4e2   : > { %v3826_v58 = vadd.f32 %v3825_v44, %v7681_v5  ;;  %v3827_v50 = vpop.f32.mrb[94].mxu0  ;;  %v3940_v57 = vpop.f32.mrb[78].mxu1 }
 0x4e3   : > { %v7721_v19 = vadd.f32 %v3936_v14, %v3824_v52  ;;  %v3828_v37 = vadd.f32 %v3827_v50, %v7678_v10  ;;  %v3829_v32 = vpop.f32.mrb[95].mxu0  ;;  %v3942_v7 = vpop.f32.mrb[79].mxu1 }
 0x4e4   : > { %v7724_v21 = vadd.f32 %v3938_v63, %v3826_v58  ;;  %v3830_v38 = vadd.f32 %v3829_v32, %v7681_v5 }
 0x4e5   : > { %v7727_v59 = vadd.f32 %v3940_v57, %v3828_v37 }
 0x4e6   : > { %v7729_v15 = vadd.f32 %v3942_v7, %v3830_v38 }
 0x4e8   : > { %v3866_v45 = vpop.f32.mrb[64].mxu0 }
 0x4e9   : > { %v4992_v54 = vadd.f32 %v3866_v45, %v7678_v10  ;;  %v3868_v17 = vpop.f32.mrb[65].mxu0 }
 0x4ea   : > { %v4993_v49 = vadd.f32 %v3868_v17, %v7681_v5  ;;  %v3870_v34 = vpop.f32.mrb[66].mxu0 }
 0x4eb   : > { %v7733_v13 = vmax.f32 %v4992_v54, 0.0  ;;  %v4994_v62 = vadd.f32 %v3870_v34, %v7678_v10  ;;  %v3872_v42 = vpop.f32.mrb[67].mxu0 }
 0x4ec   : > { %v7736_v16 = vmax.f32 %v4993_v49, 0.0  ;;  %v4995_v30 = vadd.f32 %v3872_v42, %v7681_v5 }
 0x4ed   : > { %v7739_v36 = vmax.f32 %v4994_v62, 0.0  ;;  %v4041_v46 = vmul.f32 %v7733_v13, %v7733_v13 }
 0x4ee   : > { %v4042_v28 = vmul.f32 %v7736_v16, %v7736_v16  ;;  %v7745_v1 = vmax.f32 %v4995_v30, 0.0  ;;  %v3977_v12 = vadd.f32 %v7736_v16, %v7733_v13 }
 0x4ef   : > { %v4043_v48 = vmul.f32 %v7739_v36, %v7739_v36 }
 0x4f0   : > { %v4044_v60 = vmul.f32 %v7745_v1, %v7745_v1  ;;  %v3876_v23 = vpop.f32.mrb[68].mxu0  ;;  %3978 = vadd.xlane.f32.xlu0 %v3977_v12  ;;  %v3980_v24 = vadd.f32 %v7745_v1, %v7739_v36  ;;  %v4073_v43 = vadd.f32 %v4042_v28, %v4041_v46 }
 0x4f1   : > { %v4996_v56 = vadd.f32 %v3876_v23, %v7678_v10  ;;  %v3878_v55 = vpop.f32.mrb[69].mxu0  ;;  %v5512_v23 = vld [vmem:[%s8168_s8 + $0x8] sm:$0xff]  }
 0x4f2   : > { %v4997_v8 = vadd.f32 %v3878_v55, %v7681_v5  ;;  %v3880_v6 = vpop.f32.mrb[70].mxu0  ;;  %3981 = vadd.xlane.f32.xlu1 %v3980_v24  ;;  %v4076_v25 = vadd.f32 %v4044_v60, %v4043_v48  ;;  %4899 = vmatpush3.bf16.msra.mxu1 %v5512_v23 }
 0x4f3   : > { %v7757_v3 = vmax.f32 %v4996_v56, 0.0  ;;  %v4998_v47 = vadd.f32 %v3880_v6, %v7678_v10  ;;  %v3882_v11 = vpop.f32.mrb[71].mxu0 }
 0x4f4   : > { %v7760_v51 = vmax.f32 %v4997_v8, 0.0  ;;  %v4999_v26 = vadd.f32 %v3882_v11, %v7681_v5  ;;  %4074 = vadd.xlane.f32.xlu0 %v4073_v43  ;;  %v5513_v43 = vld [vmem:[%s8168_s8 + $0x50] sm:$0xff]  }
 0x4f5   : > { %v7763_v40 = vmax.f32 %v4998_v47, 0.0  ;;  %v4045_v20 = vmul.f32 %v7757_v3, %v7757_v3  ;;  %4900 = vmatprep.subr.bf16.mxu1 %v5513_v43 }
 0x4f6   : > { %v4046_v0 = vmul.f32 %v7760_v51, %v7760_v51  ;;  %v7769_v2 = vmax.f32 %v4999_v26, 0.0  ;;  %4077 = vadd.xlane.f32.xlu1 %v4076_v25  ;;  %v3983_v9 = vadd.f32 %v7760_v51, %v7757_v3 }
 0x4f7   : > { %v4047_v14 = vmul.f32 %v7763_v40, %v7763_v40 }
 0x4f8   : > { %v4048_v52 = vmul.f32 %v7769_v2, %v7769_v2  ;;  %v3886_v44 = vpop.f32.mrb[72].mxu0  ;;  %3984 = vadd.xlane.f32.xlu0 %v3983_v9  ;;  %v3986_v63 = vadd.f32 %v7769_v2, %v7763_v40  ;;  %v4079_v32 = vadd.f32 %v4046_v0, %v4045_v20 }
 0x4f9   : > { %v5000_v58 = vadd.f32 %v3886_v44, %v7678_v10  ;;  %v3888_v50 = vpop.f32.mrb[73].mxu0 }
 0x4fa   : > { %v5001_v57 = vadd.f32 %v3888_v50, %v7681_v5  ;;  %v3890_v37 = vpop.f32.mrb[74].mxu0  ;;  %3987 = vadd.xlane.f32.xlu1 %v3986_v63  ;;  %v4082_v49 = vadd.f32 %v4048_v52, %v4047_v14  ;;  %v5514_v50 = vld [vmem:[%s8168_s8 + $0x10] sm:$0xff]  }
 0x4fb   : > { %v7781_v7 = vmax.f32 %v5000_v58, 0.0  ;;  %v5002_v38 = vadd.f32 %v3890_v37, %v7678_v10  ;;  %v3892_v45 = vpop.f32.mrb[75].mxu0  ;;  %v7840_v37 = vmax.f32 %v7688_v31, 0.0  ;;  %4901 = vmatpush3.bf16.msra.mxu1 %v5514_v50  ;;  %v7855_v31 = vmax.f32 %v7693_v53, 0.0 }
 0x4fc   : > { %v7784_v54 = vmax.f32 %v5001_v57, 0.0  ;;  %v5003_v17 = vadd.f32 %v3892_v45, %v7681_v5  ;;  %4080 = vadd.xlane.f32.xlu0 %v4079_v32  ;;  %v7837_v57 = vmax.f32 %v7685_v4, 0.0  ;;  %v5516_v45 = vld [vmem:[%s8168_s8 + $0x18] sm:$0xff]   ;;  %v7852_v4 = vmax.f32 %v7691_v35, 0.0 }
 0x4fd   : > { %v7787_v34 = vmax.f32 %v5002_v38, 0.0  ;;  %v4049_v62 = vmul.f32 %v7781_v7, %v7781_v7  ;;  %v5515_v38 = vld [vmem:[%s8168_s8 + $0x58] sm:$0xff]   ;;  %v4060_v53 = vmul.f32 %v7855_v31, %v7855_v31 }
 0x4fe   : > { %v4050_v42 = vmul.f32 %v7784_v54, %v7784_v54  ;;  %v7793_v30 = vmax.f32 %v5003_v17, 0.0  ;;  %4083 = vadd.xlane.f32.xlu1 %v4082_v49  ;;  %v3989_v46 = vadd.f32 %v7784_v54, %v7781_v7  ;;  %v5517_v17 = vld [vmem:[%s8168_s8 + $0x60] sm:$0xff]   ;;  %4902 = vmatprep.subr.bf16.mxu1 %v5515_v38  ;;  %v4059_v35 = vmul.f32 %v7852_v4, %v7852_v4 }
 0x4ff   : > { %v4051_v28 = vmul.f32 %v7787_v34, %v7787_v34  ;;  %4903 = vmatpush3.bf16.msra.mxu1 %v5516_v45  ;;  %v7939_v45 = vmax.f32 %v7721_v19, 0.0 }
 0x500   : > { %v4052_v12 = vmul.f32 %v7793_v30, %v7793_v30  ;;  %v3896_v48 = vpop.f32.mrb[76].mxu0  ;;  %3990 = vadd.xlane.f32.xlu0 %v3989_v46  ;;  %v3992_v60 = vadd.f32 %v7793_v30, %v7787_v34  ;;  %v4085_v6 = vadd.f32 %v4050_v42, %v4049_v62  ;;  %v4057_v62 = vmul.f32 %v7837_v57, %v7837_v57 }
 0x501   : > { %v5004_v24 = vadd.f32 %v3896_v48, %v7678_v10  ;;  %v3898_v56 = vpop.f32.mrb[77].mxu0  ;;  %v4058_v42 = vmul.f32 %v7840_v37, %v7840_v37  ;;  %v4001_v46 = vadd.f32 %v7840_v37, %v7837_v57  ;;  %4904 = vmatprep.subr.bf16.mxu1 %v5517_v17  ;;  %v7873_v48 = vmax.f32 %v7697_v27, 0.0 }
 0x502   : > { %v5005_v55 = vadd.f32 %v3898_v56, %v7681_v5  ;;  %v3900_v8 = vpop.f32.mrb[78].mxu0  ;;  %3993 = vadd.xlane.f32.xlu1 %v3992_v60  ;;  %v4088_v0 = vadd.f32 %v4052_v12, %v4051_v28  ;;  %v4004_v28 = vadd.f32 %v7855_v31, %v7852_v4  ;;  %v5518_v12 = vld [vmem:[%s8168_s8 + $0x20] sm:$0xff]   ;;  %v7876_v60 = vmax.f32 %v7700_v41, 0.0  ;;  %v5520_v56 = vld [vmem:[%s8168_s8 + $0x28] sm:$0xff]  }
 0x503   : > { %v7811_v47 = vmax.f32 %v5004_v24, 0.0  ;;  %v5006_v11 = vadd.f32 %v3900_v8, %v7678_v10  ;;  %v3902_v26 = vpop.f32.mrb[79].mxu0  ;;  %v4097_v23 = vadd.f32 %v4058_v42, %v4057_v62  ;;  %4905 = vmatpush3.bf16.msra.mxu1 %v5518_v12  ;;  %v5519_v24 = vld [vmem:[%s8168_s8 + $0x68] sm:$0xff]   ;;  %v7888_v27 = vmax.f32 %v7703_v22, 0.0 }
 0x504   : > { %v7814_v25 = vmax.f32 %v5005_v55, 0.0  ;;  %v5007_v20 = vadd.f32 %v3902_v26, %v7681_v5  ;;  %4086 = vadd.xlane.f32.xlu0 %v4085_v6  ;;  %v5521_v55 = vld [vmem:[%s8168_s8 + $0x70] sm:$0xff]   ;;  %v7891_v41 = vmax.f32 %v7705_v61, 0.0  ;;  %v4100_v8 = vadd.f32 %v4060_v53, %v4059_v35  ;;  %4906 = vmatprep.subr.bf16.mxu1 %v5519_v24 }
 0x505   : > { %v7817_v9 = vmax.f32 %v5006_v11, 0.0  ;;  %v4053_v14 = vmul.f32 %v7811_v47, %v7811_v47  ;;  %v4061_v6 = vmul.f32 %v7873_v48, %v7873_v48  ;;  %v4062_v43 = vmul.f32 %v7876_v60, %v7876_v60 }
 0x506   : > { %v4054_v52 = vmul.f32 %v7814_v25, %v7814_v25  ;;  %v7823_v44 = vmax.f32 %v5007_v20, 0.0  ;;  %4089 = vadd.xlane.f32.xlu1 %v4088_v0  ;;  %v3995_v10 = vadd.f32 %v7814_v25, %v7811_v47  ;;  %v4007_v11 = vadd.f32 %v7876_v60, %v7873_v48  ;;  %v5522_v20 = vld [vmem:[%s8168_s8 + $0x30] sm:$0xff]  }
 0x507   : > { %v4055_v5 = vmul.f32 %v7817_v9, %v7817_v9  ;;  %4907 = vmatpush3.bf16.msra.mxu1 %v5520_v56  ;;  %v4063_v22 = vmul.f32 %v7888_v27, %v7888_v27  ;;  %v4064_v61 = vmul.f32 %v7891_v41, %v7891_v41  ;;  %v4010_v26 = vadd.f32 %v7891_v41, %v7888_v27 }
 0x508   : > { %v4056_v63 = vmul.f32 %v7823_v44, %v7823_v44  ;;  %3996 = vadd.xlane.f32.xlu0 %v3995_v10  ;;  %v3998_v58 = vadd.f32 %v7823_v44, %v7817_v9  ;;  %v4091_v32 = vadd.f32 %v4054_v52, %v4053_v14  ;;  %4908 = vmatprep.subr.bf16.mxu1 %v5521_v55  ;;  %v7909_v0 = vmax.f32 %v7709_v29, 0.0  ;;  %v5523_v10 = vld [vmem:[%s8168_s8 + $0x78] sm:$0xff]  }
 0x509   : > { %v7912_v14 = vmax.f32 %v7712_v33, 0.0  ;;  %v4103_v52 = vadd.f32 %v4062_v43, %v4061_v6  ;;  %v7924_v29 = vmax.f32 %v7717_v39, 0.0  ;;  %v4106_v33 = vadd.f32 %v4064_v61, %v4063_v22 }
 0x50a   : > { %3999 = vadd.xlane.f32.xlu1 %v3998_v58  ;;  %v4094_v49 = vadd.f32 %v4056_v63, %v4055_v5  ;;  %v5524_v5 = vld [vmem:[%s8168_s8 + $0x38] sm:$0xff]   ;;  %v7921_v63 = vmax.f32 %v7715_v18, 0.0  ;;  %v4065_v58 = vmul.f32 %v7909_v0, %v7909_v0  ;;  %v7942_v17 = vmax.f32 %v7724_v21, 0.0 }
 0x50b   : > { %4909 = vmatpush3.bf16.msra.mxu1 %v5522_v20  ;;  %v4066_v50 = vmul.f32 %v7912_v14, %v7912_v14  ;;  %v4068_v39 = vmul.f32 %v7924_v29, %v7924_v29  ;;  %v7945_v62 = vmax.f32 %v7727_v59, 0.0  ;;  %v7948_v42 = vmax.f32 %v7729_v15, 0.0 }
 0x50c   : > { %4092 = vadd.xlane.f32.xlu0 %v4091_v32  ;;  %4910 = vmatprep.subr.bf16.mxu1 %v5523_v10  ;;  %v4013_v32 = vadd.f32 %v7912_v14, %v7909_v0  ;;  %v4067_v18 = vmul.f32 %v7921_v63, %v7921_v63  ;;  %v4016_v38 = vadd.f32 %v7924_v29, %v7921_v63 }
 0x50d   : > { %v4069_v35 = vmul.f32 %v7939_v45, %v7939_v45  ;;  %v4070_v19 = vmul.f32 %v7942_v17, %v7942_v17  ;;  %v4019_v21 = vadd.f32 %v7942_v17, %v7939_v45  ;;  %v4071_v53 = vmul.f32 %v7945_v62, %v7945_v62 }
 0x50e   : > { %4095 = vadd.xlane.f32.xlu1 %v4094_v49  ;;  %v4109_v49 = vadd.f32 %v4066_v50, %v4065_v58  ;;  %v4072_v59 = vmul.f32 %v7948_v42, %v7948_v42  ;;  %v4022_v15 = vadd.f32 %v7948_v42, %v7945_v62 }
 0x50f   : > { %4911 = vmatpush3.bf16.msra.mxu1 %v5524_v5 }
 0x510   : > { %4002 = vadd.xlane.f32.xlu0 %v4001_v46  ;;  %v4112_v46 = vadd.f32 %v4068_v39, %v4067_v18  ;;  %v4118_v12 = vadd.f32 %v4072_v59, %v4071_v53 }
 0x512   : > { %4005 = vadd.xlane.f32.xlu1 %v4004_v28  ;;  %v4115_v28 = vadd.f32 %v4070_v19, %v4069_v35 }
 0x514   : > { %4098 = vadd.xlane.f32.xlu0 %v4097_v23 }
 0x516   : > { %4101 = vadd.xlane.f32.xlu1 %v4100_v8 }
 0x518   : > { %4008 = vadd.xlane.f32.xlu0 %v4007_v11 }
 0x51a   : > { %4011 = vadd.xlane.f32.xlu1 %v4010_v26 }
 0x51c   : > { %4104 = vadd.xlane.f32.xlu0 %v4103_v52 }
 0x51e   : > { %4107 = vadd.xlane.f32.xlu1 %v4106_v33 }
 0x520   : > { %4014 = vadd.xlane.f32.xlu0 %v4013_v32 }
 0x522   : > { %4017 = vadd.xlane.f32.xlu1 %v4016_v38 }
 0x524   : > { %4110 = vadd.xlane.f32.xlu0 %v4109_v49 }
 0x526   : > { %4113 = vadd.xlane.f32.xlu1 %v4112_v46 }
 0x528   : > { %4020 = vadd.xlane.f32.xlu0 %v4019_v21 }
 0x52a   : > { %4023 = vadd.xlane.f32.xlu1 %v4022_v15 }
 0x52c   : > { %4116 = vadd.xlane.f32.xlu0 %v4115_v28 }
 0x52e   : > { %4119 = vadd.xlane.f32.xlu1 %v4118_v12 }
 0x57d   : > { %v3979_v23 = vpop.xlane.xlu0 %3978 }
 0x57e   : > { %v4025_v24 = vmul.f32 0.00390625, %v3979_v23 }
 0x57f   : > { %v3982_v56 = vpop.xlane.xlu1 %3981 }
 0x580   : > { %v4026_v55 = vmul.f32 0.00390625, %v3982_v56  ;;  %v4137_v6 = vmul.f32 %v4025_v24, %v4025_v24 }
 0x581   : > { %v4075_v8 = vpop.xlane.xlu0 %4074 }
 0x582   : > { %v4121_v43 = vmul.f32 0.00390625, %v4075_v8  ;;  %v4138_v61 = vmul.f32 %v4026_v55, %v4026_v55 }
 0x583   : > { %v4078_v11 = vpop.xlane.xlu1 %4077 }
 0x584   : > { %v4153_v22 = vsub.f32 %v4121_v43, %v4137_v6  ;;  %v4122_v26 = vmul.f32 0.00390625, %v4078_v11  ;;  %v4169_v43 = vsub.f32 %v7733_v13, %v4025_v24  ;;  %v4170_v11 = vsub.f32 %v7736_v16, %v4025_v24 }
 0x585   : > { %v3985_v20 = vpop.xlane.xlu0 %3984 }
 0x586   : > { %v4201_v52 = vadd.f32 1e-05, %v4153_v22  ;;  %v4154_v10 = vsub.f32 %v4122_v26, %v4138_v61  ;;  %v7962_v5 = vmul.f32 0.00390625, %v3985_v20  ;;  %v4171_v22 = vsub.f32 %v7739_v36, %v4026_v55 }
 0x587   : > { %v3988_v33 = vpop.xlane.xlu1 %3987  ;;  %v4172_v61 = vsub.f32 %v7745_v1, %v4026_v55 }
 0x588   : > { %5621 = vrsqrt.f32 %v4201_v52  ;;  %v4202_v58 = vadd.f32 1e-05, %v4154_v10  ;;  %v7964_v50 = vmul.f32 0.00390625, %v3988_v33  ;;  %v4139_v18 = vmul.f32 %v7962_v5, %v7962_v5 }
 0x589   : > { %v4081_v32 = vpop.xlane.xlu0 %4080 }
 0x58a   : > { %5623 = vrsqrt.f32 %v4202_v58  ;;  %v4123_v39 = vmul.f32 0.00390625, %v4081_v32  ;;  %v4140_v46 = vmul.f32 %v7964_v50, %v7964_v50 }
 0x58b   : > { %v4084_v38 = vpop.xlane.xlu1 %4083 }
 0x58c   : > { %v4155_v49 = vsub.f32 %v4123_v39, %v4139_v18  ;;  %v4124_v35 = vmul.f32 0.00390625, %v4084_v38 }
 0x58d   : > { %v3991_v19 = vpop.xlane.xlu0 %3990 }
 0x58e   : > { %v4203_v21 = vadd.f32 1e-05, %v4155_v49  ;;  %v4156_v53 = vsub.f32 %v4124_v35, %v4140_v46  ;;  %v7970_v59 = vmul.f32 0.00390625, %v3991_v19 }
 0x58f   : > { %v3994_v15 = vpop.xlane.xlu1 %3993 }
 0x590   : > { %5625 = vrsqrt.f32 %v4203_v21  ;;  %v4204_v28 = vadd.f32 1e-05, %v4156_v53  ;;  %v7972_v12 = vmul.f32 0.00390625, %v3994_v15  ;;  %v4141_v8 = vmul.f32 %v7970_v59, %v7970_v59 }
 0x591   : > { %v4087_v23 = vpop.xlane.xlu0 %4086  ;;  %v4173_v15 = vsub.f32 %v7757_v3, %v7962_v5 }
 0x592   : > { %v5622_v56 = vpop.eup %5621  ;;  %5627 = vrsqrt.f32 %v4204_v28  ;;  %v4125_v6 = vmul.f32 0.00390625, %v4087_v23  ;;  %v4142_v10 = vmul.f32 %v7972_v12, %v7972_v12  ;;  %v4174_v28 = vsub.f32 %v7760_v51, %v7962_v5 }
 0x593   : > { %v4090_v26 = vpop.xlane.xlu1 %4089  ;;  %v4234_v32 = vmul.f32 %v5622_v56, %v4170_v11  ;;  %v4233_v39 = vmul.f32 %v5622_v56, %v4169_v43  ;;  %v4175_v23 = vsub.f32 %v7763_v40, %v7964_v50  ;;  %v4176_v56 = vsub.f32 %v7769_v2, %v7964_v50 }
 0x594   : > { %v5624_v20 = vpop.eup %5623  ;;  %v4157_v52 = vsub.f32 %v4125_v6, %v4141_v8  ;;  %v4126_v33 = vmul.f32 0.00390625, %v4090_v26 }
 0x595   : > { %v3997_v58 = vpop.xlane.xlu0 %3996  ;;  %v4236_v18 = vmul.f32 %v5624_v20, %v4172_v61  ;;  %v4235_v38 = vmul.f32 %v5624_v20, %v4171_v22 }
 0x596   : > { %v4205_v49 = vadd.f32 1e-05, %v4157_v52  ;;  %v4158_v13 = vsub.f32 %v4126_v33, %v4142_v10  ;;  %v7982_v46 = vmul.f32 0.00390625, %v3997_v58 }
 0x597   : > { %v4000_v16 = vpop.xlane.xlu1 %3999  ;;  %v4266_v36 = vpack.c.bf16 %v4236_v18, %v4234_v32  ;;  %v4265_v24 = vpack.c.bf16 %v4235_v38, %v4233_v39 }
 0x598   : > { %5629 = vrsqrt.f32 %v4205_v49  ;;  %v4206_v1 = vadd.f32 1e-05, %v4158_v13  ;;  %v7984_v55 = vmul.f32 0.00390625, %v4000_v16  ;;  %v4143_v21 = vmul.f32 %v7982_v46, %v7982_v46 }
 0x599   : > { %4448 = vmatprep.mubr.bf16.mxu1 %v4266_v36  ;;  %v4093_v35 = vpop.xlane.xlu0 %4092  ;;  %v4177_v49 = vsub.f32 %v7781_v7, %v7970_v59  ;;  %v4178_v13 = vsub.f32 %v7784_v54, %v7970_v59  ;;  %v4179_v16 = vsub.f32 %v7787_v34, %v7972_v12  ;;  %v4180_v36 = vsub.f32 %v7793_v30, %v7972_v12 }
 0x59a   : > { %v5626_v19 = vpop.eup %5625  ;;  %5631 = vrsqrt.f32 %v4206_v1  ;;  %v4127_v53 = vmul.f32 0.00390625, %v4093_v35  ;;  %4449 = vmatmul.mubr.bf16.vlgmr.msra.gmra.mrb[80].mxu1 %v4265_v24  ;;  %v4144_v11 = vmul.f32 %v7984_v55, %v7984_v55 }
 0x59b   : > { %v4096_v8 = vpop.xlane.xlu1 %4095  ;;  %v4238_v26 = vmul.f32 %v5626_v19, %v4174_v28  ;;  %v4237_v3 = vmul.f32 %v5626_v19, %v4173_v15 }
 0x59c   : > { %v5628_v6 = vpop.eup %5627  ;;  %v4159_v43 = vsub.f32 %v4127_v53, %v4143_v21  ;;  %v4128_v22 = vmul.f32 0.00390625, %v4096_v8 }
 0x59d   : > { %v4003_v61 = vpop.xlane.xlu0 %4002  ;;  %v4240_v20 = vmul.f32 %v5628_v6, %v4176_v56  ;;  %v4239_v52 = vmul.f32 %v5628_v6, %v4175_v23 }
 0x59e   : > { %v4207_v10 = vadd.f32 1e-05, %v4159_v43  ;;  %v4160_v51 = vsub.f32 %v4128_v22, %v4144_v11  ;;  %v7998_v5 = vmul.f32 0.00390625, %v4003_v61 }
 0x59f   : > { %v4006_v40 = vpop.xlane.xlu1 %4005  ;;  %v4268_v33 = vpack.c.bf16 %v4240_v20, %v4238_v26  ;;  %v4267_v58 = vpack.c.bf16 %v4239_v52, %v4237_v3  ;;  %v4181_v26 = vsub.f32 %v7811_v47, %v7982_v46  ;;  %v4182_v20 = vsub.f32 %v7814_v25, %v7982_v46 }
 0x5a0   : > { %5633 = vrsqrt.f32 %v4207_v10  ;;  %v4208_v2 = vadd.f32 1e-05, %v4160_v51  ;;  %v8000_v50 = vmul.f32 0.00390625, %v4006_v40  ;;  %v4145_v39 = vmul.f32 %v7998_v5, %v7998_v5 }
 0x5a1   : > { %4456 = vmatprep.mubr.bf16.mxu1 %v4268_v33  ;;  %v4099_v32 = vpop.xlane.xlu0 %4098  ;;  %v4183_v3 = vsub.f32 %v7817_v9, %v7984_v55  ;;  %v4184_v52 = vsub.f32 %v7823_v44, %v7984_v55 }
 0x5a2   : > { %v5630_v18 = vpop.eup %5629  ;;  %5635 = vrsqrt.f32 %v4208_v2  ;;  %v4129_v38 = vmul.f32 0.00390625, %v4099_v32  ;;  %4457 = vmatmul.mubr.bf16.gmra.mrb[84].mxu1 %v4267_v58  ;;  %v4146_v19 = vmul.f32 %v8000_v50, %v8000_v50 }
 0x5a3   : > { %v4102_v24 = vpop.xlane.xlu1 %4101  ;;  %v4242_v15 = vmul.f32 %v5630_v18, %v4178_v13  ;;  %v4241_v7 = vmul.f32 %v5630_v18, %v4177_v49 }
 0x5a4   : > { %v5632_v1 = vpop.eup %5631  ;;  %v4161_v35 = vsub.f32 %v4129_v38, %v4145_v39  ;;  %v4130_v21 = vmul.f32 0.00390625, %v4102_v24 }
 0x5a5   : > { %v4009_v53 = vpop.xlane.xlu0 %4008  ;;  %v4244_v28 = vmul.f32 %v5632_v1, %v4180_v36  ;;  %v4243_v23 = vmul.f32 %v5632_v1, %v4179_v16 }
 0x5a6   : > { %v4209_v56 = vadd.f32 1e-05, %v4161_v35  ;;  %v4162_v54 = vsub.f32 %v4130_v21, %v4146_v19  ;;  %v8014_v59 = vmul.f32 0.00390625, %v4009_v53  ;;  %v4185_v35 = vsub.f32 %v7837_v57, %v7998_v5 }
 0x5a7   : > { %v4012_v34 = vpop.xlane.xlu1 %4011  ;;  %v4270_v8 = vpack.c.bf16 %v4244_v28, %v4242_v15  ;;  %v4269_v6 = vpack.c.bf16 %v4243_v23, %v4241_v7  ;;  %v4186_v19 = vsub.f32 %v7840_v37, %v7998_v5  ;;  %v4187_v21 = vsub.f32 %v7852_v4, %v8000_v50 }
 0x5a8   : > { %5637 = vrsqrt.f32 %v4209_v56  ;;  %v4210_v30 = vadd.f32 1e-05, %v4162_v54  ;;  %v8016_v12 = vmul.f32 0.00390625, %v4012_v34  ;;  %v4147_v22 = vmul.f32 %v8014_v59, %v8014_v59 }
 0x5a9   : > { %4464 = vmatprep.mubr.bf16.mxu1 %v4270_v8  ;;  %v4105_v43 = vpop.xlane.xlu0 %4104  ;;  %v4188_v53 = vsub.f32 %v7855_v31, %v8000_v50 }
 0x5aa   : > { %v5634_v11 = vpop.eup %5633  ;;  %5639 = vrsqrt.f32 %v4210_v30  ;;  %v4131_v61 = vmul.f32 0.00390625, %v4105_v43  ;;  %4465 = vmatmul.mubr.bf16.gmra.mrb[88].mxu1 %v4269_v6  ;;  %v4148_v33 = vmul.f32 %v8016_v12, %v8016_v12 }
 0x5ab   : > { %v4108_v10 = vpop.xlane.xlu1 %4107  ;;  %v4246_v32 = vmul.f32 %v5634_v11, %v4182_v20  ;;  %v4245_v47 = vmul.f32 %v5634_v11, %v4181_v26 }
 0x5ac   : > { %v5636_v51 = vpop.eup %5635  ;;  %v4163_v40 = vsub.f32 %v4131_v61, %v4147_v22  ;;  %v4132_v58 = vmul.f32 0.00390625, %v4108_v10  ;;  %v4191_v10 = vsub.f32 %v7888_v27, %v8016_v12 }
 0x5ad   : > { %v4015_v2 = vpop.xlane.xlu0 %4014  ;;  %v4248_v18 = vmul.f32 %v5636_v51, %v4184_v52  ;;  %v4247_v39 = vmul.f32 %v5636_v51, %v4183_v3  ;;  %v4189_v3 = vsub.f32 %v7873_v48, %v8014_v59  ;;  %v4190_v52 = vsub.f32 %v7876_v60, %v8014_v59 }
 0x5ae   : > { %v4211_v38 = vadd.f32 1e-05, %v4163_v40  ;;  %v4164_v25 = vsub.f32 %v4132_v58, %v4148_v33  ;;  %v8030_v46 = vmul.f32 0.00390625, %v4015_v2  ;;  %v4192_v51 = vsub.f32 %v7891_v41, %v8016_v12 }
 0x5af   : > { %v4018_v9 = vpop.xlane.xlu1 %4017  ;;  %v4272_v49 = vpack.c.bf16 %v4248_v18, %v4246_v32  ;;  %v4271_v13 = vpack.c.bf16 %v4247_v39, %v4245_v47 }
 0x5b0   : > { %5641 = vrsqrt.f32 %v4211_v38  ;;  %v4212_v44 = vadd.f32 1e-05, %v4164_v25  ;;  %v8032_v55 = vmul.f32 0.00390625, %v4018_v9  ;;  %v4149_v24 = vmul.f32 %v8030_v46, %v8030_v46 }
 0x5b1   : > { %4472 = vmatprep.mubr.bf16.mxu1 %v4272_v49  ;;  %v4111_v16 = vpop.xlane.xlu0 %4110  ;;  %v4193_v41 = vsub.f32 %v7909_v0, %v8030_v46  ;;  %v4194_v59 = vsub.f32 %v7912_v14, %v8030_v46 }
 0x5b2   : > { %v5638_v36 = vpop.eup %5637  ;;  %5643 = vrsqrt.f32 %v4212_v44  ;;  %v4133_v1 = vmul.f32 0.00390625, %v4111_v16  ;;  %4473 = vmatmul.mubr.bf16.gmra.mrb[92].mxu1 %v4271_v13  ;;  %v4150_v23 = vmul.f32 %v8032_v55, %v8032_v55  ;;  %v4195_v12 = vsub.f32 %v7921_v63, %v8032_v55 }
 0x5b3   : > { %v4114_v15 = vpop.xlane.xlu1 %4113  ;;  %v4250_v34 = vmul.f32 %v5638_v36, %v4186_v19  ;;  %v4249_v57 = vmul.f32 %v5638_v36, %v4185_v35  ;;  %v4196_v13 = vsub.f32 %v7924_v29, %v8032_v55 }
 0x5b4   : > { %v5640_v28 = vpop.eup %5639  ;;  %v4165_v7 = vsub.f32 %v4133_v1, %v4149_v24  ;;  %v4134_v56 = vmul.f32 0.00390625, %v4114_v15 }
 0x5b5   : > { %v4021_v54 = vpop.xlane.xlu0 %4020  ;;  %v4252_v8 = vmul.f32 %v5640_v28, %v4188_v53  ;;  %v4251_v6 = vmul.f32 %v5640_v28, %v4187_v21 }
 0x5b6   : > { %v4213_v30 = vadd.f32 1e-05, %v4165_v7  ;;  %v4166_v37 = vsub.f32 %v4134_v56, %v4150_v23  ;;  %v4039_v5 = vmul.f32 0.00390625, %v4021_v54 }
 0x5b7   : > { %v4024_v43 = vpop.xlane.xlu1 %4023  ;;  %v4274_v4 = vpack.c.bf16 %v4252_v8, %v4250_v34  ;;  %v4273_v11 = vpack.c.bf16 %v4251_v6, %v4249_v57 }
 0x5b8   : > { %5645 = vrsqrt.f32 %v4213_v30  ;;  %v4214_v31 = vadd.f32 1e-05, %v4166_v37  ;;  %v4040_v50 = vmul.f32 0.00390625, %v4024_v43  ;;  %v4151_v26 = vmul.f32 %v4039_v5, %v4039_v5 }
 0x5b9   : > { %4480 = vmatprep.mubr.bf16.mxu1 %v4274_v4  ;;  %v4117_v22 = vpop.xlane.xlu0 %4116  ;;  %v4197_v0 = vsub.f32 %v7939_v45, %v4039_v5  ;;  %v4198_v14 = vsub.f32 %v7942_v17, %v4039_v5  ;;  %v8072_v45 = vld [vmem:[%s8169_s9] ss:$0 sm:$0xff] }
 0x5ba   : > { %v5642_v61 = vpop.eup %5641  ;;  %5647 = vrsqrt.f32 %v4214_v31  ;;  %v4135_v20 = vmul.f32 0.00390625, %v4117_v22  ;;  %4481 = vmatmul.mubr.bf16.gmra.mrb[96].mxu1 %v4273_v11  ;;  %v4152_v2 = vmul.f32 %v4040_v50, %v4040_v50  ;;  %v4199_v63 = vsub.f32 %v7945_v62, %v4040_v50 }
 0x5bb   : > { %v4120_v40 = vpop.xlane.xlu1 %4119  ;;  %v4254_v18 = vmul.f32 %v5642_v61, %v4190_v52  ;;  %v4253_v39 = vmul.f32 %v5642_v61, %v4189_v3  ;;  %v4200_v29 = vsub.f32 %v7948_v42, %v4040_v50 }
 0x5bc   : > { %v5644_v33 = vpop.eup %5643  ;;  %v4167_v58 = vsub.f32 %v4135_v20, %v4151_v26  ;;  %v4136_v32 = vmul.f32 0.00390625, %v4120_v40 }
 0x5bd   : > { %v4256_v47 = vmul.f32 %v5644_v33, %v4192_v51  ;;  %v4255_v38 = vmul.f32 %v5644_v33, %v4191_v10 }
 0x5be   : > { %v4215_v25 = vadd.f32 1e-05, %v4167_v58  ;;  %v4168_v48 = vsub.f32 %v4136_v32, %v4152_v2 }
 0x5bf   : > { %v4276_v9 = vpack.c.bf16 %v4256_v47, %v4254_v18  ;;  %v4275_v49 = vpack.c.bf16 %v4255_v38, %v4253_v39 }
 0x5c0   : > { %5649 = vrsqrt.f32 %v4215_v25  ;;  %v4216_v60 = vadd.f32 1e-05, %v4168_v48 }
 0x5c1   : > { %4488 = vmatprep.mubr.bf16.mxu1 %v4276_v9 }
 0x5c2   : > { %v5646_v27 = vpop.eup %5645  ;;  %5651 = vrsqrt.f32 %v4216_v60  ;;  %4489 = vmatmul.mubr.bf16.gmra.mrb[100].mxu1 %v4275_v49 }
 0x5c3   : > { %v4258_v16 = vmul.f32 %v5646_v27, %v4194_v59  ;;  %v4257_v24 = vmul.f32 %v5646_v27, %v4193_v41 }
 0x5c4   : > { %v5648_v44 = vpop.eup %5647 }
 0x5c5   : > { %v4260_v36 = vmul.f32 %v5648_v44, %v4196_v13  ;;  %v4259_v1 = vmul.f32 %v5648_v44, %v4195_v12 }
 0x5c7   : > { %v4278_v35 = vpack.c.bf16 %v4260_v36, %v4258_v16  ;;  %v4277_v19 = vpack.c.bf16 %v4259_v1, %v4257_v24 }
 0x5c9   : > { %4496 = vmatprep.mubr.bf16.mxu1 %v4278_v35 }
 0x5ca   : > { %v5650_v21 = vpop.eup %5649  ;;  %4497 = vmatmul.mubr.bf16.gmra.mrb[104].mxu1 %v4277_v19 }
 0x5cb   : > { %v4262_v55 = vmul.f32 %v5650_v21, %v4198_v14  ;;  %v4261_v15 = vmul.f32 %v5650_v21, %v4197_v0 }
 0x5cc   : > { %v5652_v46 = vpop.eup %5651 }
 0x5cd   : > { %v4264_v53 = vmul.f32 %v5652_v46, %v4200_v29  ;;  %v4263_v28 = vmul.f32 %v5652_v46, %v4199_v63 }
 0x5cf   : > { %v4280_v7 = vpack.c.bf16 %v4264_v53, %v4262_v55  ;;  %v4279_v23 = vpack.c.bf16 %v4263_v28, %v4261_v15 }
 0x5d1   : > { %4504 = vmatprep.mubr.bf16.mxu1 %v4280_v7 }
 0x5d2   : > { %4505 = vmatmul.mubr.bf16.gmra.mrb[108].mxu1 %v4279_v23 }
 0x66d   : > { %v4912_v56 = vpop.f32.mrb[80].mxu1 }
 0x66e   : > { %v4913_v17 = vpop.f32.mrb[81].mxu1 }
 0x66f   : > { %v4914_v62 = vadd.f32 %v4913_v17, %v4912_v56  ;;  %v4915_v42 = vpop.f32.mrb[82].mxu1 }
 0x670   : > { %v4916_v54 = vpop.f32.mrb[83].mxu1 }
 0x671   : > { %v4451_v34 = vadd.f32 %v4914_v62, %v8072_v45  ;;  %v4917_v8 = vadd.f32 %v4916_v54, %v4915_v42 }
 0x673   : > { %4513 = vst [vmem:[%s8075_s22] sm:$0xff] %v4451_v34  ;;  %v4454_v57 = vadd.f32 %v4917_v8, %v8072_v45 }
 0x675   : > { %4514 = vst [vmem:[%s8075_s22 + $0x8] sm:$0xff] %v4454_v57  ;;  %v4918_v6 = vpop.f32.mrb[84].mxu1 }
 0x676   : > { %v4919_v30 = vpop.f32.mrb[85].mxu1 }
 0x677   : > { %v4920_v37 = vadd.f32 %v4919_v30, %v4918_v6  ;;  %v4921_v5 = vpop.f32.mrb[86].mxu1 }
 0x678   : > { %v4922_v43 = vpop.f32.mrb[87].mxu1 }
 0x679   : > { %v4459_v4 = vadd.f32 %v4920_v37, %v8072_v45  ;;  %v4923_v11 = vadd.f32 %v4922_v43, %v4921_v5 }
 0x67b   : > { %4515 = vst [vmem:[%s8075_s22 + $0x10] sm:$0xff] %v4459_v4  ;;  %v4462_v31 = vadd.f32 %v4923_v11, %v8072_v45 }
 0x67d   : > { %4516 = vst [vmem:[%s8075_s22 + $0x18] sm:$0xff] %v4462_v31  ;;  %v4924_v50 = vpop.f32.mrb[88].mxu1 }
 0x67e   : > { %v4925_v22 = vpop.f32.mrb[89].mxu1 }
 0x67f   : > { %v4926_v61 = vadd.f32 %v4925_v22, %v4924_v50  ;;  %v4927_v26 = vpop.f32.mrb[90].mxu1 }
 0x680   : > { %v4928_v20 = vpop.f32.mrb[91].mxu1 }
 0x681   : > { %v4467_v3 = vadd.f32 %v4926_v61, %v8072_v45  ;;  %v4929_v52 = vadd.f32 %v4928_v20, %v4927_v26 }
 0x683   : > { %4517 = vst [vmem:[%s8075_s22 + $0x20] sm:$0xff] %v4467_v3  ;;  %v4470_v10 = vadd.f32 %v4929_v52, %v8072_v45 }
 0x685   : > { %4518 = vst [vmem:[%s8075_s22 + $0x28] sm:$0xff] %v4470_v10  ;;  %v4930_v51 = vpop.f32.mrb[92].mxu1 }
 0x686   : > { %v4931_v40 = vpop.f32.mrb[93].mxu1 }
 0x687   : > { %v4932_v33 = vadd.f32 %v4931_v40, %v4930_v51  ;;  %v4933_v58 = vpop.f32.mrb[94].mxu1 }
 0x688   : > { %v4934_v2 = vpop.f32.mrb[95].mxu1 }
 0x689   : > { %v4475_v32 = vadd.f32 %v4932_v33, %v8072_v45  ;;  %v4935_v18 = vadd.f32 %v4934_v2, %v4933_v58 }
 0x68b   : > { %4519 = vst [vmem:[%s8075_s22 + $0x30] sm:$0xff] %v4475_v32  ;;  %v4478_v47 = vadd.f32 %v4935_v18, %v8072_v45 }
 0x68d   : > { %4520 = vst [vmem:[%s8075_s22 + $0x38] sm:$0xff] %v4478_v47  ;;  %v4936_v39 = vpop.f32.mrb[96].mxu1 }
 0x68e   : > { %v4937_v38 = vpop.f32.mrb[97].mxu1 }
 0x68f   : > { %v4938_v25 = vadd.f32 %v4937_v38, %v4936_v39  ;;  %v4939_v48 = vpop.f32.mrb[98].mxu1 }
 0x690   : > { %v4940_v9 = vpop.f32.mrb[99].mxu1 }
 0x691   : > { %v4483_v49 = vadd.f32 %v4938_v25, %v8072_v45  ;;  %v4941_v60 = vadd.f32 %v4940_v9, %v4939_v48 }
 0x693   : > { %4521 = vst [vmem:[%s8075_s22 + $0x40] sm:$0xff] %v4483_v49  ;;  %v4486_v27 = vadd.f32 %v4941_v60, %v8072_v45 }
 0x695   : > { %4522 = vst [vmem:[%s8075_s22 + $0x48] sm:$0xff] %v4486_v27  ;;  %v4942_v41 = vpop.f32.mrb[100].mxu1 }
 0x696   : > { %v4943_v59 = vpop.f32.mrb[101].mxu1 }
 0x697   : > { %v4944_v12 = vadd.f32 %v4943_v59, %v4942_v41  ;;  %v4945_v13 = vpop.f32.mrb[102].mxu1 }
 0x698   : > { %v4946_v44 = vpop.f32.mrb[103].mxu1 }
 0x699   : > { %v4491_v16 = vadd.f32 %v4944_v12, %v8072_v45  ;;  %v4947_v36 = vadd.f32 %v4946_v44, %v4945_v13 }
 0x69b   : > { %4523 = vst [vmem:[%s8075_s22 + $0x50] sm:$0xff] %v4491_v16  ;;  %v4494_v24 = vadd.f32 %v4947_v36, %v8072_v45 }
 0x69d   : > { %4524 = vst [vmem:[%s8075_s22 + $0x58] sm:$0xff] %v4494_v24  ;;  %v4948_v1 = vpop.f32.mrb[104].mxu1 }
 0x69e   : > { %v4949_v35 = vpop.f32.mrb[105].mxu1 }
 0x69f   : > { %v4950_v19 = vadd.f32 %v4949_v35, %v4948_v1  ;;  %v4951_v21 = vpop.f32.mrb[106].mxu1 }
 0x6a0   : > { %v4952_v0 = vpop.f32.mrb[107].mxu1 }
 0x6a1   : > { %v4499_v14 = vadd.f32 %v4950_v19, %v8072_v45  ;;  %v4953_v63 = vadd.f32 %v4952_v0, %v4951_v21 }
 0x6a3   : > { %4525 = vst [vmem:[%s8075_s22 + $0x60] sm:$0xff] %v4499_v14  ;;  %v4502_v29 = vadd.f32 %v4953_v63, %v8072_v45 }
 0x6a5   : > { %4526 = vst [vmem:[%s8075_s22 + $0x68] sm:$0xff] %v4502_v29  ;;  %v4954_v46 = vpop.f32.mrb[108].mxu1 }
 0x6a6   : > { %v4955_v55 = vpop.f32.mrb[109].mxu1 }
 0x6a7   : > { %v4956_v53 = vadd.f32 %v4955_v55, %v4954_v46  ;;  %v4957_v15 = vpop.f32.mrb[110].mxu1 }
 0x6a8   : > { %v4958_v28 = vpop.f32.mrb[111].mxu1 }
 0x6a9   : > { %v4507_v7 = vadd.f32 %v4956_v53, %v8072_v45  ;;  %v4959_v23 = vadd.f32 %v4958_v28, %v4957_v15 }
 0x6ab   : > { %4527 = vst [vmem:[%s8075_s22 + $0x70] sm:$0xff] %v4507_v7  ;;  %v4510_v56 = vadd.f32 %v4959_v23, %v8072_v45 }
 0x6ad   : > { %4528 = vst [vmem:[%s8075_s22 + $0x78] sm:$0xff] %v4510_v56 }
 0x6ae   : > { %5751 = shalt.err (!%p5748_p9)
}
 0x6af   : > { %s5752_s15 = scalar_lea.hbm %s8110_s25, 2048  ;;  %s5756_s21 = scalar_lea.hbm %s8170_s10, 4096 }
 0x6b0   : > { %p5753_p2 = scmp.ne.s32.totalorder %s8110_s25, %s5752_s15  ;;  %p5757_p5 = scmp.lt.u32.totalorder %s8110_s25, %s8170_s10 }
 0x6b1   : > { %p5758_p10 = scmp.lt.u32.totalorder %s5756_s21, %s5752_s15  ;;  %p5760_p4 = scmp.lt.u32.totalorder %s5752_s15, %s8110_s25 }
 0x6b2   : > { %p5754_p3 = pnand %p5753_p2, %p8474_p7 }
 0x6b3   : > { %p5759_p12 = por %p5758_p10, %p5757_p5 }
 0x6b4   : > { %p5755_p0 = pneg %p5754_p3 }
 0x6b5   : > { %p5761_p8 = por %p5760_p4, %p5759_p12 }
 0x6b7   : > { %p5762_p11 = pnand %p5761_p8, %p5755_p0 }
 0x6b9   : > { %5765 = shalt.err (!%p5762_p11)
}
 0x6ba   : > { %s5819_s11 = smov 128   ;;  %s5820_s22 = smov 8  }
 0x6bb   : > { %5132 = dma.vmem_to_hbm [thread:$0]  (%p8474_p7), %s8112_s30, 2048, %s8110_s25, %s8119_s17, %s5819_s11, %s5819_s11, %s5820_s22  }
 0x6bc PF: > { %s8475_s27 = sld [smem:[#allocation14_spill]]  ;;  %s8476_s18 = sld [smem:[#allocation12_spill]] }
 0x6bd   : > { %s8477_s20 = sld [smem:[#allocation17_spill]] }
 0x6c2   : > { %p5154_p13 = scmp.ge.s32.totalorder %s8475_s27, 2  ;;  %s4558_s28 = sand.u32 1, %s8476_s18  }
 0x6c3   : > { %p8478_p1 = scmp.ne.s32.totalorder %s8477_s20, 0  ;;  %s4559_s12 = scalar_lea.sflag [#allocation4], %s4558_s28 }
 0x6c5   : > { %p5145_p6 = pnand %p5154_p13, %p8478_p1 }
 0x6c7   : > { %5791 = dma.done.wait (!%p5145_p6), %s4559_s12, 2048  }
 0x6c8   : > { %5793 = vsyncadd (!%p5145_p6), %s4559_s12, 4294965248  ;;  %s8479_s16 = sld [smem:[#allocation15_spill]]  ;;  %s8480_s15 = sld [smem:[#allocation13_spill]] }
 0x6c9   : > { %s8481_s19 = sld [smem:[#allocation16_spill]]  ;;  %s8482_s13 = smov %s5800_s14 }
 0x6ce   : > { %p22_p9 = scmp.ge.s32.totalorder %s8479_s16, 4   ;;  %s8483_s14 = smov %s8480_s15 }
 0x6cf   : > { %s8484_s15 = smov %s8481_s19 }
 0x6d0   :  { %24 = sbr.rel (!%p22_p9) target bundleno = 5 (0x5), region = 108 }
 0x6d7   :  { %4564 = vsyncpa [#allocation3], 1 }
 0x6d8   :  { %4566 = vsyncpa [#allocation3 + $0x1], 1 }
 0x6d9   :  { %4567 = vsyncpa [#allocation6], 1 }
 0x6da   :  { %4568 = vsyncpa [#allocation4], 1 }
 0x6db   :  { %4570 = vsyncpa [#allocation4 + $0x1], 1 }

</bundles_post_ra>
